<compile_context>
chip_gen: v7x
topology: tpu7x:2x2x1
jax: 0.10.0
libtpu: 0.0.40
codegen_flags: <defaults>
</compile_context>

<pallas_src>
import functools
import math

import jax
import jax.numpy as jnp
from jax.experimental import pallas as pl
from jax.experimental.pallas import tpu as pltpu


# ------------------------------ fused kernel ----------------------------------

def _cleaning_block_kernel(x_ref, s1_ref, t1_ref, wb1_ref, sb1_ref,
                           wb2_ref, b2_ref, o_ref, hpad_ref, *, Nb, D, HWC):
    """Nb batch items: BN1+ReLU -> conv1(+BN2 folded) -> ReLU -> conv2 -> +residual.

    x_ref    : (Nb, D, H*W*C)      input activations (also the residual), f32
    s1/t1    : (1, H*W*C)          folded-BN1 scale/shift (lane vectors)
    wb1_ref  : (3, H*W*C, H*W*C)   banded conv1 weight, BN2 scale folded into columns
    sb1_ref  : (1, H*W*C)          folded bias  s2*b1 + t2
    wb2_ref  : (3, H*W*C, H*W*C)   banded conv2 weight
    b2_ref   : (1, H*W*C)          conv2 bias
    o_ref    : (Nb, D, H*W*C)
    hpad_ref : VMEM scratch (Nb, D+2, H*W*C) in the matmul dtype (D-halo padded)
    """
    mm_dtype = hpad_ref.dtype
    x = x_ref[...]                                     # (Nb, D, HWC), f32 residual

    # Zero ONLY the two D-halo faces; the interior is fully rewritten below and
    # the halos are never written, so the zero ring stays valid for both convs.
    # (Not gated on program_id==0: under megacore each core has its own scratch.)
    halo = jnp.zeros((Nb, 1, HWC), mm_dtype)
    hpad_ref[:, 0:1, :] = halo
    hpad_ref[:, D + 1:D + 2, :] = halo

    # ---- BN1 (folded affine, f32) + ReLU, written into the padded interior.
    h = jnp.maximum(x * s1_ref[...] + t1_ref[...], 0.0)
    hpad_ref[:, 1:1 + D, :] = h.astype(mm_dtype)

    def conv(wb_ref):
        # 3x3x3 "same" conv as 3 lane-dense MXU matmuls: kh/kw taps and the Cin
        # contraction are all folded into K = H*W*C via the banded weight; only
        # the kd tap remains a (static, unrolled) loop over D-shifted slabs.
        acc = jnp.zeros((Nb * D, HWC), jnp.float32)
        for kd in range(3):
            slab = hpad_ref[:, kd:kd + D, :].reshape(Nb * D, HWC)
            acc = acc + jnp.dot(slab, wb_ref[kd],
                                preferred_element_type=jnp.float32)
        return acc.reshape(Nb, D, HWC)

    # ---- conv1 (+ bias & BN2 folded into wb1/sb1) + ReLU, back into the scratch.
    h = jnp.maximum(conv(wb1_ref) + sb1_ref[...], 0.0)
    hpad_ref[:, 1:1 + D, :] = h.astype(mm_dtype)

    # ---- conv2 + bias + residual: single lane-dense store of the final result.
    o_ref[...] = (conv(wb2_ref) + b2_ref[...] + x).astype(o_ref.dtype)


# ------------------------------ wrapper helpers --------------------------------

def fold_bn(gamma, beta, mean, var, eps=1e-5):
    scale = gamma / jnp.sqrt(var + eps)
    shift = beta - mean * scale
    return scale, shift


def _banded_conv_weight_hw(w_oidhw, H, W):
    """torch (Cout, Cin, 3, 3, 3) -> (3, H*W*Cin, H*W*Cout) banded matrices.

    wb[kd, (hi*W+wi)*Cin + ci, (ho*W+wo)*Cout + co] = w[co, ci, kd, kh, kw]
    with hi = ho + kh - 1, wi = wo + kw - 1; entries outside [0,H)x[0,W) stay
    zero, i.e. the 'same' padding along H and W is folded into the weight.
    """
    Cout, Cin = w_oidhw.shape[0], w_oidhw.shape[1]
    wk = jnp.transpose(w_oidhw, (2, 3, 4, 1, 0))               # (kd, kh, kw, Cin, Cout)
    dh = jnp.arange(H)[:, None] - jnp.arange(H)[None, :] + 1   # (hi, ho) -> kh
    dw = jnp.arange(W)[:, None] - jnp.arange(W)[None, :] + 1   # (wi, wo) -> kw
    mask = (((dh >= 0) & (dh <= 2))[:, :, None, None]
            & ((dw >= 0) & (dw <= 2))[None, None, :, :])        # (hi, ho, wi, wo)
    blk = wk[:, jnp.clip(dh, 0, 2)]                             # (kd, hi, ho, kw, Ci, Co)
    blk = blk[:, :, :, jnp.clip(dw, 0, 2)]                      # (kd, hi, ho, wi, wo, Ci, Co)
    blk = blk * mask[None, :, :, :, :, None, None].astype(blk.dtype)
    blk = jnp.transpose(blk, (0, 1, 3, 5, 2, 4, 6))             # (kd, hi, wi, ci, ho, wo, co)
    return blk.reshape(3, H * W * Cin, H * W * Cout)


def _tile_hw(v, H, W):
    # per-channel vector -> (1, H*W*C) lane vector, lane index = (h*W + w)*C + c
    return jnp.tile(v, H * W).reshape(1, -1)


def _pick_items_per_step(N, D):
    # Fill the MXU M dimension (target >=128 rows) while keeping >=2 grid steps
    # so both v7x TensorCores stay busy under dimension_semantics=("parallel",).
    target = max(1, -(-128 // D))          # ceil(128 / D)
    nb = min(target, max(1, N // 2))
    while N % nb:
        nb -= 1
    return nb


def cleaning_block_forward_ndhwc(x_ndhwc, p, eps=1e-5,
                                 matmul_dtype=jnp.float32, items_per_step=None):
    """Channels-last entry point (avoids wrapper transposes). x: (N, D, H, W, C)."""
    N, D, H, W, C = x_ndhwc.shape
    HWC = H * W * C
    x = x_ndhwc.reshape(N, D, HWC)                      # free, contiguous reshape

    scale1, shift1 = fold_bn(p["gamma1"], p["beta1"], p["mean1"], p["var1"], eps)
    scale2, shift2 = fold_bn(p["gamma2"], p["beta2"], p["mean2"], p["var2"], eps)

    s1, t1 = _tile_hw(scale1, H, W), _tile_hw(shift1, H, W)
    # Fold BN2 + conv1 bias into conv1:  relu(s2*(conv1(h)+b1)+t2)
    #   == relu(conv1_with_s2_scaled_output_cols(h) + (s2*b1 + t2))
    wb1 = (_banded_conv_weight_hw(p["w1"], H, W)
           * jnp.tile(scale2, H * W)[None, None, :])
    sb1 = _tile_hw(scale2 * p["b1"] + shift2, H, W)
    wb2 = _banded_conv_weight_hw(p["w2"], H, W)
    b2 = _tile_hw(p["b2"], H, W)

    wb1 = wb1.astype(matmul_dtype)
    wb2 = wb2.astype(matmul_dtype)

    Nb = _pick_items_per_step(N, D) if items_per_step is None else items_per_step
    assert N % Nb == 0, f"items_per_step={Nb} must divide N={N}"

    kernel = functools.partial(_cleaning_block_kernel, Nb=Nb, D=D, HWC=HWC)

    act_spec = pl.BlockSpec((Nb, D, HWC), lambda n: (n, 0, 0))
    vec_spec = pl.BlockSpec((1, HWC), lambda n: (0, 0))
    wgt_spec = pl.BlockSpec((3, HWC, HWC), lambda n: (0, 0, 0))

    flops = 2 * 3 * 2 * N * D * HWC * HWC               # 2 convs x 3 matmuls each
    bytes_accessed = (2 * N * D * HWC * 4
                      + 2 * 3 * HWC * HWC * jnp.dtype(matmul_dtype).itemsize
                      + 4 * HWC * 4)

    out = pl.pallas_call(
        kernel,
        out_shape=jax.ShapeDtypeStruct((N, D, HWC), x.dtype),
        grid=(N // Nb,),
        in_specs=[act_spec,
                  vec_spec, vec_spec, wgt_spec, vec_spec,
                  wgt_spec, vec_spec],
        out_specs=act_spec,
        scratch_shapes=[pltpu.VMEM((Nb, D + 2, HWC), matmul_dtype)],
        compiler_params=pltpu.CompilerParams(
            dimension_semantics=("parallel",),
            vmem_limit_bytes=48 * 1024 * 1024),
        cost_estimate=pl.CostEstimate(flops=flops, transcendentals=0,
                                      bytes_accessed=bytes_accessed),
    )(x, s1, t1, wb1, sb1, wb2, b2)

    return out.reshape(N, D, H, W, C)


def cleaning_block_forward(x_ncdhw, p, eps=1e-5,
                           matmul_dtype=jnp.float32, items_per_step=None):
    """Mirrors CleaningBlock.forward. x_ncdhw: (N, C, D, H, W) float32.

    At production sizes, prefer cleaning_block_forward_ndhwc end-to-end to skip
    these two HBM round-trip transposes.
    """
    x_ndhwc = jnp.transpose(x_ncdhw, (0, 2, 3, 4, 1))
    out = cleaning_block_forward_ndhwc(x_ndhwc, p, eps, matmul_dtype, items_per_step)
    return jnp.transpose(out, (0, 4, 1, 2, 3))


# ------------------------- pure-JAX reference (check) --------------------------

def reference_forward(x, p, eps=1e-5):
    def bn(y, g, b, m, v):
        sh = (1, -1, 1, 1, 1)
        return ((y - m.reshape(sh)) / jnp.sqrt(v.reshape(sh) + eps)
                * g.reshape(sh) + b.reshape(sh))

    def conv(y, w, b):
        out = jax.lax.conv_general_dilated(
            y, w, window_strides=(1, 1, 1),
            padding=((1, 1), (1, 1), (1, 1)),
            dimension_numbers=("NCDHW", "OIDHW", "NCDHW"),
            precision=jax.lax.Precision.HIGHEST)
        return out + b.reshape(1, -1, 1, 1, 1)

    residual = x
    h = jax.nn.relu(bn(x, p["gamma1"], p["beta1"], p["mean1"], p["var1"]))
    h = conv(h, p["w1"], p["b1"])
    h = jax.nn.relu(bn(h, p["gamma2"], p["beta2"], p["mean2"], p["var2"]))
    h = conv(h, p["w2"], p["b2"])
    return h + residual


# ----------------------------------- main --------------------------------------

if __name__ == "__main__":
    N, C, D, H, W = 2, 8, 8, 8, 8
    key = jax.random.PRNGKey(0)
    ks = jax.random.split(key, 13)

    x = jax.random.normal(ks[0], (N, C, D, H, W), jnp.float32)

    fan = C * 3 * 3 * 3
    params = {
        "gamma1": 1.0 + 0.1 * jax.random.normal(ks[1], (C,), jnp.float32),
        "beta1": 0.1 * jax.random.normal(ks[2], (C,), jnp.float32),
        "mean1": 0.1 * jax.random.normal(ks[3], (C,), jnp.float32),
        "var1": 1.0 + 0.1 * jax.random.uniform(ks[4], (C,), jnp.float32),
        "w1": jax.random.normal(ks[5], (C, C, 3, 3, 3), jnp.float32)
              * (1.0 / math.sqrt(fan)),
        "b1": 0.1 * jax.random.normal(ks[6], (C,), jnp.float32),
        "gamma2": 1.0 + 0.1 * jax.random.normal(ks[7], (C,), jnp.float32),
        "beta2": 0.1 * jax.random.normal(ks[8], (C,), jnp.float32),
        "mean2": 0.1 * jax.random.normal(ks[9], (C,), jnp.float32),
        "var2": 1.0 + 0.1 * jax.random.uniform(ks[10], (C,), jnp.float32),
        "w2": jax.random.normal(ks[11], (C, C, 3, 3, 3), jnp.float32)
              * (1.0 / math.sqrt(fan)),
        "b2": 0.1 * jax.random.normal(ks[12], (C,), jnp.float32),
    }

    ref = jax.block_until_ready(reference_forward(x, params))

    # f32 matmul path: tight check against the reference.
    out = jax.block_until_ready(cleaning_block_forward(x, params))
    assert out.shape == (N, C, D, H, W)
    max_err = float(jnp.max(jnp.abs(out - ref)))
    assert max_err < 1e-3, f"f32 mismatch vs reference: max abs err = {max_err}"

    # bf16 matmul path (recommended on v6e/v7x): loose sanity check only.
    out_bf16 = jax.block_until_ready(
        cleaning_block_forward(x, params, matmul_dtype=jnp.bfloat16))
    max_err_bf16 = float(jnp.max(jnp.abs(out_bf16 - ref)))
    assert max_err_bf16 < 0.5, f"bf16 path diverged: max abs err = {max_err_bf16}"

    print("KERNEL_OK")
</pallas_src>

<mosaic_0001>
module attributes {stable_mosaic.version = 11 : i64} {
  func.func @_cleaning_block_kernel(%arg0: i32, %arg1: memref<1x8x512xf32, #tpu.memory_space<vmem>>, %arg2: memref<1x512xf32, #tpu.memory_space<vmem>>, %arg3: memref<1x512xf32, #tpu.memory_space<vmem>>, %arg4: memref<3x512x512xf32, #tpu.memory_space<vmem>>, %arg5: memref<1x512xf32, #tpu.memory_space<vmem>>, %arg6: memref<3x512x512xf32, #tpu.memory_space<vmem>>, %arg7: memref<1x512xf32, #tpu.memory_space<vmem>>, %arg8: memref<1x8x512xf32, #tpu.memory_space<vmem>>, %arg9: memref<1x10x512xf32, #tpu.memory_space<vmem>>) attributes {dimension_semantics = [#tpu.dimension_semantics<parallel>], iteration_bounds = array<i64: 2>, scalar_prefetch = 0 : i64, scratch_operands = 1 : i64, tpu.core_type = #tpu.core_type<tc>, window_params = [{transform_indices = @transform_0, window_bounds = array<i64: 1, 8, 512>}, {pipeline_mode = #tpu.pipeline_mode<synchronous>, transform_indices = @transform_1, window_bounds = array<i64: 1, 512>}, {pipeline_mode = #tpu.pipeline_mode<synchronous>, transform_indices = @transform_2, window_bounds = array<i64: 1, 512>}, {pipeline_mode = #tpu.pipeline_mode<synchronous>, transform_indices = @transform_3, window_bounds = array<i64: 3, 512, 512>}, {pipeline_mode = #tpu.pipeline_mode<synchronous>, transform_indices = @transform_4, window_bounds = array<i64: 1, 512>}, {pipeline_mode = #tpu.pipeline_mode<synchronous>, transform_indices = @transform_5, window_bounds = array<i64: 3, 512, 512>}, {pipeline_mode = #tpu.pipeline_mode<synchronous>, transform_indices = @transform_6, window_bounds = array<i64: 1, 512>}, {transform_indices = @transform_7, window_bounds = array<i64: 1, 8, 512>}]} {
    %c0 = arith.constant 0 : index
    %c0_0 = arith.constant 0 : index
    %c0_1 = arith.constant 0 : index
    %0 = vector.load %arg1[%c0, %c0_0, %c0_1] : memref<1x8x512xf32, #tpu.memory_space<vmem>>, vector<1x8x512xf32>
    %cst = arith.constant 0.000000e+00 : f32
    %1 = vector.broadcast %cst : f32 to vector<1x1x512xf32>
    %c0_2 = arith.constant 0 : index
    %c0_3 = arith.constant 0 : index
    %c0_4 = arith.constant 0 : index
    %2 = vector.load %arg9[%c0_2, %c0_3, %c0_4] : memref<1x10x512xf32, #tpu.memory_space<vmem>>, vector<1x1x512xf32>
    tpu.vector_store %arg9[%c0_2, %c0_3, %c0_4], %1 {strides = array<i32>} : memref<1x10x512xf32, #tpu.memory_space<vmem>>, vector<1x1x512xf32>,
    %c0_5 = arith.constant 0 : index
    %c9 = arith.constant 9 : index
    %c0_6 = arith.constant 0 : index
    %3 = vector.load %arg9[%c0_5, %c9, %c0_6] : memref<1x10x512xf32, #tpu.memory_space<vmem>>, vector<1x1x512xf32>
    tpu.vector_store %arg9[%c0_5, %c9, %c0_6], %1 {strides = array<i32>} : memref<1x10x512xf32, #tpu.memory_space<vmem>>, vector<1x1x512xf32>,
    %c0_7 = arith.constant 0 : index
    %c0_8 = arith.constant 0 : index
    %4 = vector.load %arg2[%c0_7, %c0_8] : memref<1x512xf32, #tpu.memory_space<vmem>>, vector<1x512xf32>
    %5 = vector.shape_cast %4 : vector<1x512xf32> to vector<1x1x512xf32>
    %6 = vector.broadcast %5 : vector<1x1x512xf32> to vector<1x8x512xf32>
    %7 = arith.mulf %0, %6 : vector<1x8x512xf32>
    %c0_9 = arith.constant 0 : index
    %c0_10 = arith.constant 0 : index
    %8 = vector.load %arg3[%c0_9, %c0_10] : memref<1x512xf32, #tpu.memory_space<vmem>>, vector<1x512xf32>
    %9 = vector.shape_cast %8 : vector<1x512xf32> to vector<1x1x512xf32>
    %10 = vector.broadcast %9 : vector<1x1x512xf32> to vector<1x8x512xf32>
    %11 = arith.addf %7, %10 : vector<1x8x512xf32>
    %cst_11 = arith.constant 0.000000e+00 : f32
    %12 = vector.broadcast %cst_11 : f32 to vector<1x8x512xf32>
    %13 = arith.maximumf %11, %12 : vector<1x8x512xf32>
    %c0_12 = arith.constant 0 : index
    %c1 = arith.constant 1 : index
    %c0_13 = arith.constant 0 : index
    %14 = vector.load %arg9[%c0_12, %c1, %c0_13] : memref<1x10x512xf32, #tpu.memory_space<vmem>>, vector<1x8x512xf32>
    tpu.vector_store %arg9[%c0_12, %c1, %c0_13], %13 {strides = array<i32>} : memref<1x10x512xf32, #tpu.memory_space<vmem>>, vector<1x8x512xf32>,
    %cst_14 = arith.constant 0.000000e+00 : f32
    %15 = vector.broadcast %cst_14 : f32 to vector<8x512xf32>
    %c0_15 = arith.constant 0 : index
    %c0_16 = arith.constant 0 : index
    %c0_17 = arith.constant 0 : index
    %16 = vector.load %arg9[%c0_15, %c0_16, %c0_17] : memref<1x10x512xf32, #tpu.memory_space<vmem>>, vector<1x8x512xf32>
    %17 = vector.shape_cast %16 : vector<1x8x512xf32> to vector<8x512xf32>
    %c0_18 = arith.constant 0 : index
    %c0_19 = arith.constant 0 : index
    %c0_20 = arith.constant 0 : index
    %18 = vector.load %arg4[%c0_18, %c0_19, %c0_20] : memref<3x512x512xf32, #tpu.memory_space<vmem>>, vector<1x512x512xf32>
    %19 = vector.shape_cast %18 : vector<1x512x512xf32> to vector<512x512xf32>
    %cst_21 = arith.constant dense<0.000000e+00> : vector<8x512xf32>
    %20 = tpu.matmul %17, %19, %cst_21 {dimension_numbers = #tpu.dot_dimension_numbers<[1], [0], [0], [1], [0, 0, 1, 1], [], []>} : vector<8x512xf32>, vector<512x512xf32>, vector<8x512xf32> -> vector<8x512xf32>
    %21 = arith.addf %15, %20 : vector<8x512xf32>
    %c0_22 = arith.constant 0 : index
    %c1_23 = arith.constant 1 : index
    %c0_24 = arith.constant 0 : index
    %22 = vector.load %arg9[%c0_22, %c1_23, %c0_24] : memref<1x10x512xf32, #tpu.memory_space<vmem>>, vector<1x8x512xf32>
    %23 = vector.shape_cast %22 : vector<1x8x512xf32> to vector<8x512xf32>
    %c1_25 = arith.constant 1 : index
    %c0_26 = arith.constant 0 : index
    %c0_27 = arith.constant 0 : index
    %24 = vector.load %arg4[%c1_25, %c0_26, %c0_27] : memref<3x512x512xf32, #tpu.memory_space<vmem>>, vector<1x512x512xf32>
    %25 = vector.shape_cast %24 : vector<1x512x512xf32> to vector<512x512xf32>
    %cst_28 = arith.constant dense<0.000000e+00> : vector<8x512xf32>
    %26 = tpu.matmul %23, %25, %cst_28 {dimension_numbers = #tpu.dot_dimension_numbers<[1], [0], [0], [1], [0, 0, 1, 1], [], []>} : vector<8x512xf32>, vector<512x512xf32>, vector<8x512xf32> -> vector<8x512xf32>
    %27 = arith.addf %21, %26 : vector<8x512xf32>
    %c0_29 = arith.constant 0 : index
    %c2 = arith.constant 2 : index
    %c0_30 = arith.constant 0 : index
    %28 = vector.load %arg9[%c0_29, %c2, %c0_30] : memref<1x10x512xf32, #tpu.memory_space<vmem>>, vector<1x8x512xf32>
    %29 = vector.shape_cast %28 : vector<1x8x512xf32> to vector<8x512xf32>
    %c2_31 = arith.constant 2 : index
    %c0_32 = arith.constant 0 : index
    %c0_33 = arith.constant 0 : index
    %30 = vector.load %arg4[%c2_31, %c0_32, %c0_33] : memref<3x512x512xf32, #tpu.memory_space<vmem>>, vector<1x512x512xf32>
    %31 = vector.shape_cast %30 : vector<1x512x512xf32> to vector<512x512xf32>
    %cst_34 = arith.constant dense<0.000000e+00> : vector<8x512xf32>
    %32 = tpu.matmul %29, %31, %cst_34 {dimension_numbers = #tpu.dot_dimension_numbers<[1], [0], [0], [1], [0, 0, 1, 1], [], []>} : vector<8x512xf32>, vector<512x512xf32>, vector<8x512xf32> -> vector<8x512xf32>
    %33 = arith.addf %27, %32 : vector<8x512xf32>
    %34 = vector.shape_cast %33 : vector<8x512xf32> to vector<1x8x512xf32>
    %c0_35 = arith.constant 0 : index
    %c0_36 = arith.constant 0 : index
    %35 = vector.load %arg5[%c0_35, %c0_36] : memref<1x512xf32, #tpu.memory_space<vmem>>, vector<1x512xf32>
    %36 = vector.shape_cast %35 : vector<1x512xf32> to vector<1x1x512xf32>
    %37 = vector.broadcast %36 : vector<1x1x512xf32> to vector<1x8x512xf32>
    %38 = arith.addf %34, %37 : vector<1x8x512xf32>
    %cst_37 = arith.constant 0.000000e+00 : f32
    %39 = vector.broadcast %cst_37 : f32 to vector<1x8x512xf32>
    %40 = arith.maximumf %38, %39 : vector<1x8x512xf32>
    %c0_38 = arith.constant 0 : index
    %c1_39 = arith.constant 1 : index
    %c0_40 = arith.constant 0 : index
    %41 = vector.load %arg9[%c0_38, %c1_39, %c0_40] : memref<1x10x512xf32, #tpu.memory_space<vmem>>, vector<1x8x512xf32>
    tpu.vector_store %arg9[%c0_38, %c1_39, %c0_40], %40 {strides = array<i32>} : memref<1x10x512xf32, #tpu.memory_space<vmem>>, vector<1x8x512xf32>,
    %cst_41 = arith.constant 0.000000e+00 : f32
    %42 = vector.broadcast %cst_41 : f32 to vector<8x512xf32>
    %c0_42 = arith.constant 0 : index
    %c0_43 = arith.constant 0 : index
    %c0_44 = arith.constant 0 : index
    %43 = vector.load %arg9[%c0_42, %c0_43, %c0_44] : memref<1x10x512xf32, #tpu.memory_space<vmem>>, vector<1x8x512xf32>
    %44 = vector.shape_cast %43 : vector<1x8x512xf32> to vector<8x512xf32>
    %c0_45 = arith.constant 0 : index
    %c0_46 = arith.constant 0 : index
    %c0_47 = arith.constant 0 : index
    %45 = vector.load %arg6[%c0_45, %c0_46, %c0_47] : memref<3x512x512xf32, #tpu.memory_space<vmem>>, vector<1x512x512xf32>
    %46 = vector.shape_cast %45 : vector<1x512x512xf32> to vector<512x512xf32>
    %cst_48 = arith.constant dense<0.000000e+00> : vector<8x512xf32>
    %47 = tpu.matmul %44, %46, %cst_48 {dimension_numbers = #tpu.dot_dimension_numbers<[1], [0], [0], [1], [0, 0, 1, 1], [], []>} : vector<8x512xf32>, vector<512x512xf32>, vector<8x512xf32> -> vector<8x512xf32>
    %48 = arith.addf %42, %47 : vector<8x512xf32>
    %c0_49 = arith.constant 0 : index
    %c1_50 = arith.constant 1 : index
    %c0_51 = arith.constant 0 : index
    %49 = vector.load %arg9[%c0_49, %c1_50, %c0_51] : memref<1x10x512xf32, #tpu.memory_space<vmem>>, vector<1x8x512xf32>
    %50 = vector.shape_cast %49 : vector<1x8x512xf32> to vector<8x512xf32>
    %c1_52 = arith.constant 1 : index
    %c0_53 = arith.constant 0 : index
    %c0_54 = arith.constant 0 : index
    %51 = vector.load %arg6[%c1_52, %c0_53, %c0_54] : memref<3x512x512xf32, #tpu.memory_space<vmem>>, vector<1x512x512xf32>
    %52 = vector.shape_cast %51 : vector<1x512x512xf32> to vector<512x512xf32>
    %cst_55 = arith.constant dense<0.000000e+00> : vector<8x512xf32>
    %53 = tpu.matmul %50, %52, %cst_55 {dimension_numbers = #tpu.dot_dimension_numbers<[1], [0], [0], [1], [0, 0, 1, 1], [], []>} : vector<8x512xf32>, vector<512x512xf32>, vector<8x512xf32> -> vector<8x512xf32>
    %54 = arith.addf %48, %53 : vector<8x512xf32>
    %c0_56 = arith.constant 0 : index
    %c2_57 = arith.constant 2 : index
    %c0_58 = arith.constant 0 : index
    %55 = vector.load %arg9[%c0_56, %c2_57, %c0_58] : memref<1x10x512xf32, #tpu.memory_space<vmem>>, vector<1x8x512xf32>
    %56 = vector.shape_cast %55 : vector<1x8x512xf32> to vector<8x512xf32>
    %c2_59 = arith.constant 2 : index
    %c0_60 = arith.constant 0 : index
    %c0_61 = arith.constant 0 : index
    %57 = vector.load %arg6[%c2_59, %c0_60, %c0_61] : memref<3x512x512xf32, #tpu.memory_space<vmem>>, vector<1x512x512xf32>
    %58 = vector.shape_cast %57 : vector<1x512x512xf32> to vector<512x512xf32>
    %cst_62 = arith.constant dense<0.000000e+00> : vector<8x512xf32>
    %59 = tpu.matmul %56, %58, %cst_62 {dimension_numbers = #tpu.dot_dimension_numbers<[1], [0], [0], [1], [0, 0, 1, 1], [], []>} : vector<8x512xf32>, vector<512x512xf32>, vector<8x512xf32> -> vector<8x512xf32>
    %60 = arith.addf %54, %59 : vector<8x512xf32>
    %61 = vector.shape_cast %60 : vector<8x512xf32> to vector<1x8x512xf32>
    %c0_63 = arith.constant 0 : index
    %c0_64 = arith.constant 0 : index
    %62 = vector.load %arg7[%c0_63, %c0_64] : memref<1x512xf32, #tpu.memory_space<vmem>>, vector<1x512xf32>
    %63 = vector.shape_cast %62 : vector<1x512xf32> to vector<1x1x512xf32>
    %64 = vector.broadcast %63 : vector<1x1x512xf32> to vector<1x8x512xf32>
    %65 = arith.addf %61, %64 : vector<1x8x512xf32>
    %66 = arith.addf %65, %0 : vector<1x8x512xf32>
    %c0_65 = arith.constant 0 : index
    %c0_66 = arith.constant 0 : index
    %c0_67 = arith.constant 0 : index
    %67 = vector.load %arg8[%c0_65, %c0_66, %c0_67] : memref<1x8x512xf32, #tpu.memory_space<vmem>>, vector<1x8x512xf32>
    tpu.vector_store %arg8[%c0_65, %c0_66, %c0_67], %66 {strides = array<i32>} : memref<1x8x512xf32, #tpu.memory_space<vmem>>, vector<1x8x512xf32>,
    return
  }
  func.func @transform_0(%arg0: i32) -> (i32, i32, i32) {
    %c0_i32 = arith.constant 0 : i32
    %c0_i32_0 = arith.constant 0 : i32
    %c0_i32_1 = arith.constant 0 : i32
    return %arg0, %c0_i32, %c0_i32_0 : i32, i32, i32
  }
  func.func @transform_1(%arg0: i32) -> (i32, i32) {
    %c0_i32 = arith.constant 0 : i32
    %c0_i32_0 = arith.constant 0 : i32
    %c0_i32_1 = arith.constant 0 : i32
    return %c0_i32, %c0_i32_0 : i32, i32
  }
  func.func @transform_2(%arg0: i32) -> (i32, i32) {
    %c0_i32 = arith.constant 0 : i32
    %c0_i32_0 = arith.constant 0 : i32
    %c0_i32_1 = arith.constant 0 : i32
    return %c0_i32, %c0_i32_0 : i32, i32
  }
  func.func @transform_3(%arg0: i32) -> (i32, i32, i32) {
    %c0_i32 = arith.constant 0 : i32
    %c0_i32_0 = arith.constant 0 : i32
    %c0_i32_1 = arith.constant 0 : i32
    %c0_i32_2 = arith.constant 0 : i32
    return %c0_i32, %c0_i32_0, %c0_i32_1 : i32, i32, i32
  }
  func.func @transform_4(%arg0: i32) -> (i32, i32) {
    %c0_i32 = arith.constant 0 : i32
    %c0_i32_0 = arith.constant 0 : i32
    %c0_i32_1 = arith.constant 0 : i32
    return %c0_i32, %c0_i32_0 : i32, i32
  }
  func.func @transform_5(%arg0: i32) -> (i32, i32, i32) {
    %c0_i32 = arith.constant 0 : i32
    %c0_i32_0 = arith.constant 0 : i32
    %c0_i32_1 = arith.constant 0 : i32
    %c0_i32_2 = arith.constant 0 : i32
    return %c0_i32, %c0_i32_0, %c0_i32_1 : i32, i32, i32
  }
  func.func @transform_6(%arg0: i32) -> (i32, i32) {
    %c0_i32 = arith.constant 0 : i32
    %c0_i32_0 = arith.constant 0 : i32
    %c0_i32_1 = arith.constant 0 : i32
    return %c0_i32, %c0_i32_0 : i32, i32
  }
  func.func @transform_7(%arg0: i32) -> (i32, i32, i32) {
    %c0_i32 = arith.constant 0 : i32
    %c0_i32_0 = arith.constant 0 : i32
    %c0_i32_1 = arith.constant 0 : i32
    return %arg0, %c0_i32, %c0_i32_0 : i32, i32, i32
  }
}

</mosaic_0001>

<bundles_post_ra>
// kernel: tpu_custom_call.1
= control target key start
LH: loop header
LB: loop body
LE: loop exit
PB: predicated region body
PF: predicated region fallthrough
CT: control target
= control target key end

     0   :  { %12 = vsyncpa [#allocation4], 0  ;;  %s6513_s0 = inlined_call_operand.hbm [shape: f32[2,8,512], index: 0, kind: input, shape index: {}]   ;;  %s6514_s1 = inlined_call_operand.hbm [shape: f32[1,512], index: 1, kind: input, shape index: {}]   ;;  %s6515_s2 = inlined_call_operand.hbm [shape: f32[1,512], index: 2, kind: input, shape index: {}]   ;;  %s6516_s3 = inlined_call_operand.hbm [shape: f32[3,512,512], index: 3, kind: input, shape index: {}]   ;;  %s6517_s4 = inlined_call_operand.hbm [shape: f32[1,512], index: 4, kind: input, shape index: {}]   ;;  %s6518_s5 = inlined_call_operand.hbm [shape: f32[3,512,512], index: 5, kind: input, shape index: {}]   ;;  %s6519_s6 = inlined_call_operand.hbm [shape: f32[1,512], index: 6, kind: input, shape index: {}]   ;;  %s6520_s7 = inlined_call_operand.hbm [shape: f32[2,8,512], index: 7, kind: output, shape index: {}]  }
   0x1   :  { %14 = vsyncpa [#allocation4 + $0x1], 0 }
   0x2   :  { %15 = vsyncpa [#allocation7], 0 }
   0x3   :  { %16 = vsyncpa [#allocation10], 0 }
   0x4   :  { %17 = vsyncpa [#allocation13], 0 }
   0x5   :  { %18 = vsyncpa [#allocation5], 0 }
   0x6   :  { %20 = vsyncpa [#allocation5 + $0x1], 0  ;;  %s6126_s24 = smov 0   ;;  %s6128_s25 = smov 0  }
   0x7   :  { %s6130_s26 = smov 0   ;;  %s6132_s27 = smov 0  }
   0x8 LB: > { %s6075_s28 = smov [#allocation6]   ;;  %s6147_s30 = sadd.s32 4294967295, %s6073_s27   ;;  %s6073_s27 = sphi %s6132_s27, %s6546_s27   ;;  %s6069_s26 = sphi %s6130_s26, %s6545_s26   ;;  %s6065_s25 = sphi %s6128_s25, %s6544_s25   ;;  %s6061_s24 = sphi %s6126_s24, %s6543_s24  }
   0x9   : > { %s222_s29 = sshll.u32 %s6075_s28, 4  ;;  %p4080_p0 = scmp.ge.s32.totalorder %s6073_s27, 1  ;;  %s223_s29 = int_to_ptr.vmem [resolvable:$true] %s222_s29 }
   0xa   : > { %p6521_p1 = scmp.eq.s32.totalorder %s6147_s30, 0  ;;  %p209_p2 = scmp.lt.s32.totalorder %s6073_s27, 3 }
   0xb   : > { %s6076_s9 = smov [#allocation9]   ;;  %s6077_s12 = smov [#allocation12]  }
   0xc   : > { %p6152_p3 = pnand %p4080_p0, %p209_p2  ;;  %s243_s10 = sshll.u32 %s6076_s9, 4  ;;  %s6159_s10 = int_to_ptr.vmem [resolvable:$true] %s243_s10 }
   0xd   : > { %s267_s13 = sshll.u32 %s6077_s12, 4  ;;  %s5797_s16 = scalar_lea.hbm %s6514_s1, 64  ;;  %s6167_s13 = int_to_ptr.vmem [resolvable:$true] %s267_s13 }
   0xe   : > { %s6524_s8 = scalar_select %p6152_p3, 1, 0 }
   0xf   : > { %p5711_p5 = pneg %p6152_p3  ;;  %p5798_p7 = scmp.ne.s32.totalorder %s6514_s1, %s5797_s16 }
  0x10   : > { %p5804_p11 = scmp.lt.u32.totalorder %s5797_s16, %s6514_s1 }
  0x11   : > { %p6163_p6 = pnand %p5711_p5, %p6521_p1 }
  0x13   : > { %p6177_p8 = pneg %p6163_p6 }
  0x15   : > { %p5800_p9 = pnand %p6177_p8, %p5798_p7 }
  0x17   : > { %p5801_p10 = pneg %p5800_p9 }
  0x19   : > { %p5806_p12 = pnand %p5804_p11, %p5801_p10 }
  0x1b   : > { %5809 = shalt.err (!%p5806_p12)
}
  0x1c   : > { %s5810_s22 = scalar_lea.vmem %s223_s29, 64  ;;  %p5818_p5 = scmp.lt.s32.totalorder %s223_s29, %s223_s29 }
  0x1d   : > { %p5811_p13 = scmp.ne.s32.totalorder %s223_s29, %s5810_s22  ;;  %p5819_p4 = scmp.lt.s32.totalorder %s5810_s22, %s5810_s22 }
  0x1f   : > { %p5813_p0 = pnand %p5811_p13, %p6177_p8  ;;  %p5820_p1 = por %p5819_p4, %p5818_p5 }
  0x21   : > { %p5814_p2 = pneg %p5813_p0 }
  0x23   : > { %p5821_p3 = pnand %p5820_p1, %p5814_p2 }
  0x25   : > { %5824 = shalt.err (!%p5821_p3)
}
  0x26   : > { %5714 = dma.hbm_to_vmem [thread:$0]  (!%p6163_p6), %s6514_s1, 64, %s223_s29, [#allocation7]  }
  0x27   : > { %s5825_s14 = scalar_lea.hbm %s6516_s3, 98304 }
  0x28   : > { %p5826_p7 = scmp.ne.s32.totalorder %s6516_s3, %s5825_s14  ;;  %p5832_p1 = scmp.lt.u32.totalorder %s5825_s14, %s6516_s3 }
  0x2a   : > { %p5828_p9 = pnand %p5826_p7, %p6177_p8 }
  0x2c   : > { %p5829_p4 = pneg %p5828_p9 }
  0x2e   : > { %p5834_p3 = pnand %p5832_p1, %p5829_p4 }
  0x30   : > { %5837 = shalt.err (!%p5834_p3)
}
  0x31   : > { %s5838_s29 = scalar_lea.vmem %s6159_s10, 98304  ;;  %p5846_p13 = scmp.lt.s32.totalorder %s6159_s10, %s6159_s10 }
  0x32   : > { %p5839_p10 = scmp.ne.s32.totalorder %s6159_s10, %s5838_s29  ;;  %p5847_p0 = scmp.lt.s32.totalorder %s5838_s29, %s5838_s29 }
  0x34   : > { %p5841_p11 = pnand %p5839_p10, %p6177_p8  ;;  %p5848_p2 = por %p5847_p0, %p5846_p13 }
  0x36   : > { %p5842_p12 = pneg %p5841_p11 }
  0x38   : > { %p5849_p5 = pnand %p5848_p2, %p5842_p12 }
  0x3a   : > { %5852 = shalt.err (!%p5849_p5)
}
  0x3b   : > { %s6078_s20 = smov 512   ;;  %s6079_s21 = smov 32  }
  0x3c   : > { %5720 = dma.hbm_to_vmem [thread:$0]  (!%p6163_p6), %s6516_s3, 98304, %s6159_s10, [#allocation10], %s6078_s20, %s6078_s20, %s6079_s21  }
  0x3d   : > { %s5853_s12 = scalar_lea.hbm %s6518_s5, 98304 }
  0x3e   : > { %p5854_p7 = scmp.ne.s32.totalorder %s6518_s5, %s5853_s12  ;;  %p5860_p1 = scmp.lt.u32.totalorder %s5853_s12, %s6518_s5 }
  0x40   : > { %p5856_p9 = pnand %p5854_p7, %p6177_p8 }
  0x42   : > { %p5857_p4 = pneg %p5856_p9 }
  0x44   : > { %p5862_p3 = pnand %p5860_p1, %p5857_p4 }
  0x46   : > { %5865 = shalt.err (!%p5862_p3)
}
  0x47   : > { %s5866_s10 = scalar_lea.vmem %s6167_s13, 98304  ;;  %p5874_p13 = scmp.lt.s32.totalorder %s6167_s13, %s6167_s13 }
  0x48   : > { %p5867_p10 = scmp.ne.s32.totalorder %s6167_s13, %s5866_s10  ;;  %p5875_p0 = scmp.lt.s32.totalorder %s5866_s10, %s5866_s10 }
  0x4a   : > { %p5869_p11 = pnand %p5867_p10, %p6177_p8  ;;  %p5876_p2 = por %p5875_p0, %p5874_p13 }
  0x4c   : > { %p5870_p12 = pneg %p5869_p11 }
  0x4e   : > { %p5877_p5 = pnand %p5876_p2, %p5870_p12 }
  0x50   : > { %5880 = shalt.err (!%p5877_p5)
}
  0x51   : > { %5726 = dma.hbm_to_vmem [thread:$0]  (!%p6163_p6), %s6518_s5, 98304, %s6167_s13, [#allocation13], %s6078_s20, %s6078_s20, %s6079_s21  }
  0x52   : > { %s6080_s22 = smov [#allocation8]   ;;  %s6081_s28 = smov [#allocation11]  }
  0x53   : > { %s233_s23 = sshll.u32 %s6080_s22, 4  ;;  %s257_s9 = sshll.u32 %s6081_s28, 4  ;;  %s234_s23 = int_to_ptr.vmem [resolvable:$true] %s233_s23  ;;  %s258_s9 = int_to_ptr.vmem [resolvable:$true] %s257_s9 }
  0x54   : > { %s5881_s15 = scalar_lea.hbm %s6515_s2, 64 }
  0x55   : > { %p5882_p7 = scmp.ne.s32.totalorder %s6515_s2, %s5881_s15  ;;  %p5888_p1 = scmp.lt.u32.totalorder %s5881_s15, %s6515_s2 }
  0x57   : > { %p5884_p9 = pnand %p5882_p7, %p6177_p8 }
  0x59   : > { %p5885_p4 = pneg %p5884_p9 }
  0x5b   : > { %p5890_p3 = pnand %p5888_p1, %p5885_p4 }
  0x5d   : > { %5893 = shalt.err (!%p5890_p3)
}
  0x5e   : > { %s5894_s13 = scalar_lea.vmem %s234_s23, 64  ;;  %p5902_p13 = scmp.lt.s32.totalorder %s234_s23, %s234_s23 }
  0x5f   : > { %p5895_p10 = scmp.ne.s32.totalorder %s234_s23, %s5894_s13  ;;  %p5903_p0 = scmp.lt.s32.totalorder %s5894_s13, %s5894_s13 }
  0x61   : > { %p5897_p11 = pnand %p5895_p10, %p6177_p8  ;;  %p5904_p2 = por %p5903_p0, %p5902_p13 }
  0x63   : > { %p5898_p12 = pneg %p5897_p11 }
  0x65   : > { %p5905_p5 = pnand %p5904_p2, %p5898_p12 }
  0x67   : > { %5908 = shalt.err (!%p5905_p5)
}
  0x68   : > { %5717 = dma.hbm_to_vmem [thread:$0]  (!%p6163_p6), %s6515_s2, 64, %s234_s23, [#allocation7]  }
  0x69   : > { %s5909_s28 = scalar_lea.hbm %s6517_s4, 64 }
  0x6a   : > { %p5910_p7 = scmp.ne.s32.totalorder %s6517_s4, %s5909_s28  ;;  %p5916_p1 = scmp.lt.u32.totalorder %s5909_s28, %s6517_s4 }
  0x6c   : > { %p5912_p9 = pnand %p5910_p7, %p6177_p8 }
  0x6e   : > { %p5913_p4 = pneg %p5912_p9 }
  0x70   : > { %p5918_p3 = pnand %p5916_p1, %p5913_p4 }
  0x72   : > { %5921 = shalt.err (!%p5918_p3)
}
  0x73   : > { %s5922_s17 = scalar_lea.vmem %s258_s9, 64  ;;  %p5930_p13 = scmp.lt.s32.totalorder %s258_s9, %s258_s9 }
  0x74   : > { %p5923_p10 = scmp.ne.s32.totalorder %s258_s9, %s5922_s17  ;;  %p5931_p0 = scmp.lt.s32.totalorder %s5922_s17, %s5922_s17 }
  0x76   : > { %p5925_p11 = pnand %p5923_p10, %p6177_p8  ;;  %p5932_p2 = por %p5931_p0, %p5930_p13 }
  0x78   : > { %p5926_p12 = pneg %p5925_p11 }
  0x7a   : > { %p5933_p5 = pnand %p5932_p2, %p5926_p12 }
  0x7c   : > { %5936 = shalt.err (!%p5933_p5)
}
  0x7d   : > { %5723 = dma.hbm_to_vmem [thread:$0]  (!%p6163_p6), %s6517_s4, 64, %s258_s9, [#allocation10]  }
  0x7e   : > { %s6082_s18 = smov [#allocation14]   ;;  %s5937_s29 = scalar_lea.hbm %s6519_s6, 64 }
  0x7f   : > { %s281_s13 = sshll.u32 %s6082_s18, 4  ;;  %p5938_p7 = scmp.ne.s32.totalorder %s6519_s6, %s5937_s29  ;;  %s282_s13 = int_to_ptr.vmem [resolvable:$true] %s281_s13 }
  0x80   : > { %p5944_p1 = scmp.lt.u32.totalorder %s5937_s29, %s6519_s6 }
  0x81   : > { %p5940_p9 = pnand %p5938_p7, %p6177_p8 }
  0x83   : > { %p5941_p4 = pneg %p5940_p9 }
  0x85   : > { %p5946_p3 = pnand %p5944_p1, %p5941_p4 }
  0x87   : > { %5949 = shalt.err (!%p5946_p3)
}
  0x88   : > { %s5950_s9 = scalar_lea.vmem %s282_s13, 64  ;;  %p5958_p13 = scmp.lt.s32.totalorder %s282_s13, %s282_s13 }
  0x89   : > { %p5951_p10 = scmp.ne.s32.totalorder %s282_s13, %s5950_s9  ;;  %p5959_p0 = scmp.lt.s32.totalorder %s5950_s9, %s5950_s9 }
  0x8b   : > { %p5953_p11 = pnand %p5951_p10, %p6177_p8  ;;  %p5960_p2 = por %p5959_p0, %p5958_p13 }
  0x8d   : > { %p5954_p12 = pneg %p5953_p11 }
  0x8f   : > { %p5961_p5 = pnand %p5960_p2, %p5954_p12 }
  0x91   : > { %5964 = shalt.err (!%p5961_p5)
}
  0x92   : > { %5729 = dma.hbm_to_vmem [thread:$0]  (!%p6163_p6), %s6519_s6, 64, %s282_s13, [#allocation13]  }
  0x93   : > { %s4079_s19 = sadd.s32 4294967294, %s6073_s27   ;;  %s6295_s11 = sadd.s32 1, %s6073_s27  }
  0x94   : > { %s30_s17 = ssub.s32 %s6073_s27, %s6295_s11  ;;  %s33_s23 = sadd.s32 1, %s6069_s26 }
  0x95   : > { %p31_p8 = scmp.eq.s32.totalorder %s30_s17, 0  ;;  %p40_p7 = scmp.ne.s32.totalorder %s6069_s26, %s6065_s25 }
  0x96   : > { %p41_p9 = scmp.eq.s32.totalorder %s6073_s27, 0  ;;  %p46_p4 = scmp.ne.s32.totalorder %s6065_s25, %s6061_s24 }
  0x97   : > { %s6306_s10 = scalar_select %p31_p8, %s6069_s26, %s33_s23  }
  0x98   : > { %p6308_p1 = por %p41_p9, %p40_p7  ;;  %p6528_p3 = scmp.eq.s32.totalorder %s6147_s30, 0 }
  0x99   : > { %p196_p10 = scmp.eq.s32.totalorder %s6147_s30, 1  ;;  %p202_p11 = scmp.eq.s32.totalorder %s4079_s19, 1 }
  0x9a   : > { %p6314_p6 = por %p6528_p3, %p46_p4  ;;  %p5744_p12 = scmp.lt.s32.totalorder %s6073_s27, 2 }
  0x9b   : > { %s292_s20 = sand.u32 1, %s6069_s26   ;;  %p6321_p13 = por %p196_p10, %p40_p7 }
  0x9c   : > { %p6325_p0 = por %p202_p11, %p46_p4  ;;  %s4088_s22 = sshll.u32 %s292_s20, 5 }
  0x9d   : > { %s6530_s21 = scalar_select %p6321_p13, 1, 0 }
  0x9e   : > { %s6531_s29 = scalar_select %p6325_p0, 1, 0 }
  0x9f   : > { %s4105_s28 = sshll.u32 %s6073_s27, 9  ;;  %s296_s15 = scalar_lea.vmem [#allocation3], %s4088_s22 }
  0xa0   : > { %s6333_s9 = scalar_lea.hbm %s6513_s0, %s4105_s28  ;;  %s304_s16 = sshll.u32 %s296_s15, 4  ;;  %s6335_s16 = int_to_ptr.vmem [resolvable:$true] %s304_s16 }
  0xa1   : > { %p6339_p2 = pnand %p5744_p12, %p6308_p1  ;;  %s293_s17 = scalar_lea.sflag [#allocation4], %s292_s20 }
  0xa2   : > { %s5965_s23 = scalar_lea.hbm %s6333_s9, 512  ;;  %s5970_s12 = scalar_lea.hbm %s6513_s0, 1024 }
  0xa3   : > { %p5966_p5 = scmp.ne.s32.totalorder %s6333_s9, %s5965_s23  ;;  %p5967_p8 = pneg %p6339_p2 }
  0xa4   : > { %p5971_p4 = scmp.lt.u32.totalorder %s6333_s9, %s6513_s0  ;;  %p5972_p1 = scmp.lt.u32.totalorder %s5970_s12, %s5965_s23 }
  0xa5   : > { %p5968_p7 = pnand %p5967_p8, %p5966_p5  ;;  %p5974_p10 = scmp.lt.u32.totalorder %s5965_s23, %s6333_s9 }
  0xa6   : > { %p5973_p3 = por %p5972_p1, %p5971_p4 }
  0xa7   : > { %p5969_p9 = pneg %p5968_p7 }
  0xa8   : > { %p5975_p11 = por %p5974_p10, %p5973_p3 }
  0xaa   : > { %p5976_p12 = pnand %p5975_p11, %p5969_p9 }
  0xac   : > { %5979 = shalt.err (!%p5976_p12)
}
  0xad   : > { %s5980_s20 = scalar_lea.vmem %s6335_s16, 512  ;;  %s6083_s15 = smov [#allocation3]  }
  0xae   : > { %p5981_p5 = scmp.ne.s32.totalorder %s6335_s16, %s5980_s20  ;;  %s5985_s22 = sshll.u32 %s6083_s15, 4  ;;  %s5986_s22 = int_to_ptr.vmem [resolvable:$false] %s5985_s22 }
  0xaf   : > { %s5987_s28 = scalar_lea.vmem %s5986_s22, 1024  ;;  %p5988_p13 = scmp.lt.s32.totalorder %s6335_s16, %s5986_s22 }
  0xb0   : > { %p5983_p7 = pnand %p5981_p5, %p5967_p8  ;;  %p5989_p4 = scmp.lt.s32.totalorder %s5987_s28, %s5980_s20 }
  0xb2   : > { %p5984_p0 = pneg %p5983_p7  ;;  %p5990_p1 = por %p5989_p4, %p5988_p13 }
  0xb4   : > { %p5991_p3 = pnand %p5990_p1, %p5984_p0 }
  0xb6   : > { %5994 = shalt.err (!%p5991_p3)
}
  0xb7   : > { %5733 = dma.hbm_to_vmem [thread:$0]  (!%p6339_p2), %s6333_s9, 512, %s6335_s16, %s293_s17  }
  0xb8   : > { %p6533_p9 = scmp.ne.s32.totalorder %s6524_s8, 0 }
  0xb9   : > { %s6371_s23 = sand.u32 (!%p6533_p9), 1, %s6065_s25  }
  0xba   : > { %313 = sbr.rel (%p6533_p9) target bundleno = 1376 (0x560), region = 48  ;;  %s4092_s12 = sshll.u32 (!%p6533_p9), %s6371_s23, 5 }
  0xbb   : > { %s316_s18 = scalar_lea.sflag (!%p6533_p9), [#allocation4], %s6371_s23  ;;  %s6377_s14 = scalar_lea.vmem (!%p6533_p9), [#allocation3], %s4092_s12 }
  0xc1   : > { %6040 = dma.done.wait (%p6314_p6), %s316_s18, 512  }
  0xc2   : > { %6042 = vsyncadd (%p6314_p6), %s316_s18, 4294966784  ;;  %p6534_p13 = scmp.eq.s32.totalorder %s6147_s30, 0 }
  0xc4   : > { %6044 = dma.done.wait (%p6534_p13), [#allocation7], 128   ;;  %p6535_p0 = pmov %p6534_p13 }
  0xc6   : > { %6046 = vsyncadd (%p6535_p0), [#allocation7], 4294967168  ;;  %p6536_p2 = pmov %p6535_p0 }
  0xc7   : > { %p6537_p8 = pmov %p6535_p0 }
  0xc8   : > { %6048 = dma.done.wait (%p6536_p2), [#allocation10], 98368  }
  0xc9   : > { %6050 = vsyncadd (%p6537_p8), [#allocation10], 4294868928  ;;  %p6538_p10 = pmov %p6535_p0 }
  0xca   : > { %p6539_p11 = pmov %p6535_p0 }
  0xcb   : > { %6052 = dma.done.wait (%p6538_p10), [#allocation13], 98368  }
  0xcc   : > { %6054 = vsyncadd (%p6539_p11), [#allocation13], 4294868928  ;;  %v733_v0 = vld [vmem:[#allocation9 + $0x808] sm:$0xff]  ;;  %v735_v2 = vld [vmem:[#allocation9 + $0x818] sm:$0xff]  ;;  %vm996_vm1 = vcmask 1046528   ;;  %vm1854_vm2 = vcmask 1045504  }
  0xcd   : > { %v737_v1 = vld [vmem:[#allocation9 + $0x828] sm:$0xff]  ;;  %v739_v4 = vld [vmem:[#allocation9 + $0x838] sm:$0xff]  ;;  %v732_v5 = vld [vmem:[#allocation9 + $0x800] sm:$0xff]  ;;  %s4106_s8 = sshll.u32 %s6147_s30, 9  ;;  %s373_s13 = scalar_lea.vmem [#allocation15], %s4092_s12 }
  0xce   : > { %v4107_v3 = vpack.c.bf16 %v737_v1, %v733_v0  ;;  %v736_v6 = vld [vmem:[#allocation9 + $0x820] sm:$0xff]  ;;  %v4235_v7 = vpack.c.bf16 %v739_v4, %v735_v2  ;;  %v734_v9 = vld [vmem:[#allocation9 + $0x810] sm:$0xff]  ;;  %v741_v11 = vld [vmem:[#allocation9 + $0x848] sm:$0xff]  ;;  %s3952_s9 = sshll.u32 %s373_s13, 4  ;;  %s6469_s17 = scalar_lea.hbm %s6520_s7, %s4106_s8  ;;  %s6471_s9 = int_to_ptr.vmem [resolvable:$true] %s3952_s9 }
  0xcf   : > { %v4109_v8 = vpack.c.bf16 %v736_v6, %v732_v5  ;;  %v738_v10 = vld [vmem:[#allocation9 + $0x830] sm:$0xff]  ;;  %v745_v13 = vld [vmem:[#allocation9 + $0x868] sm:$0xff]  ;;  %v743_v14 = vld [vmem:[#allocation9 + $0x858] sm:$0xff]  ;;  %s3938_s30 = scalar_lea.sflag [#allocation5], %s6371_s23  ;;  %s5995_s20 = scalar_lea.vmem %s6471_s9, 512 }
  0xd0   : > { %4108 = vmatprep.subr.bf16.mxu0 %v4107_v3  ;;  %v4237_v12 = vpack.c.bf16 %v738_v10, %v734_v9  ;;  %v747_v15 = vld [vmem:[#allocation9 + $0x878] sm:$0xff]  ;;  %4236 = vmatprep.subr.bf16.mxu1 %v4235_v7  ;;  %v4111_v16 = vpack.c.bf16 %v745_v13, %v741_v11  ;;  %v740_v18 = vld [vmem:[#allocation9 + $0x840] sm:$0xff]  ;;  %v742_v20 = vld [vmem:[#allocation9 + $0x850] sm:$0xff]  ;;  %p5996_p6 = scmp.ne.s32.totalorder %s6471_s9, %s5995_s20  ;;  %p6540_p12 = scmp.ne.s32.totalorder %s6530_s21, 0 }
  0xd1   : > { %4110 = vmatpush1.bf16.msra.mxu0 %v4109_v8  ;;  %v4239_v17 = vpack.c.bf16 %v747_v15, %v743_v14  ;;  %v744_v19 = vld [vmem:[#allocation9 + $0x860] sm:$0xff]  ;;  %v746_v22 = vld [vmem:[#allocation9 + $0x870] sm:$0xff]  ;;  %v749_v23 = vld [vmem:[#allocation9 + $0x888] sm:$0xff]  ;;  %s6085_s15 = smov [#allocation15]  }
  0xd2   : > { %4238 = vmatpush1.bf16.msra.mxu1 %v4237_v12  ;;  %v4113_v21 = vpack.c.bf16 %v744_v19, %v740_v18  ;;  %v753_v24 = vld [vmem:[#allocation9 + $0x8a8] sm:$0xff]  ;;  %4112 = vmatprep.subr.bf16.mxu0 %v4111_v16  ;;  %v4241_v25 = vpack.c.bf16 %v746_v22, %v742_v20  ;;  %v751_v27 = vld [vmem:[#allocation9 + $0x898] sm:$0xff]  ;;  %v748_v29 = vld [vmem:[#allocation9 + $0x880] sm:$0xff]  ;;  %p5997_p5 = pnand %p5996_p6, %p6540_p12  ;;  %s5999_s22 = sshll.u32 %s6085_s15, 4  ;;  %s6000_s22 = int_to_ptr.vmem [resolvable:$false] %s5999_s22 }
  0xd3   : > { %4240 = vmatprep.subr.bf16.mxu1 %v4239_v17  ;;  %v4115_v26 = vpack.c.bf16 %v753_v24, %v749_v23  ;;  %v755_v28 = vld [vmem:[#allocation9 + $0x8b8] sm:$0xff]  ;;  %v752_v31 = vld [vmem:[#allocation9 + $0x8a0] sm:$0xff]  ;;  %v750_v32 = vld [vmem:[#allocation9 + $0x890] sm:$0xff]  ;;  %s6001_s28 = scalar_lea.vmem %s6000_s22, 1024  ;;  %p6002_p4 = scmp.lt.s32.totalorder %s6471_s9, %s6000_s22 }
  0xd4   : > { %v4243_v30 = vpack.c.bf16 %v755_v28, %v751_v27  ;;  %v754_v33 = vld [vmem:[#allocation9 + $0x8b0] sm:$0xff]  ;;  %v4117_v34 = vpack.c.bf16 %v752_v31, %v748_v29  ;;  %v757_v35 = vld [vmem:[#allocation9 + $0x8c8] sm:$0xff]  ;;  %v759_v37 = vld [vmem:[#allocation9 + $0x8d8] sm:$0xff]  ;;  %p5998_p7 = pneg %p5997_p5  ;;  %p6003_p1 = scmp.lt.s32.totalorder %s6001_s28, %s5995_s20 }
  0xd5   : > { %4114 = vmatpush1.bf16.msra.mxu0 %v4113_v21  ;;  %v761_v36 = vld [vmem:[#allocation9 + $0x8e8] sm:$0xff]  ;;  %v4245_v38 = vpack.c.bf16 %v754_v33, %v750_v32  ;;  %v763_v40 = vld [vmem:[#allocation9 + $0x8f8] sm:$0xff]  ;;  %v756_v41 = vld [vmem:[#allocation9 + $0x8c0] sm:$0xff] }
  0xd6   : > { %4242 = vmatpush1.bf16.msra.mxu1 %v4241_v25  ;;  %4116 = vmatprep.subr.bf16.mxu0 %v4115_v26  ;;  %v4119_v39 = vpack.c.bf16 %v761_v36, %v757_v35  ;;  %v760_v42 = vld [vmem:[#allocation9 + $0x8e0] sm:$0xff]  ;;  %v4247_v43 = vpack.c.bf16 %v763_v40, %v759_v37  ;;  %v758_v44 = vld [vmem:[#allocation9 + $0x8d0] sm:$0xff]  ;;  %v765_v46 = vld [vmem:[#allocation9 + $0x908] sm:$0xff]  ;;  %p6004_p3 = por %p6003_p1, %p6002_p4 }
  0xd7   : > { %4244 = vmatprep.subr.bf16.mxu1 %v4243_v30  ;;  %v762_v45 = vld [vmem:[#allocation9 + $0x8f0] sm:$0xff]  ;;  %v769_v47 = vld [vmem:[#allocation9 + $0x928] sm:$0xff]  ;;  %v767_v48 = vld [vmem:[#allocation9 + $0x918] sm:$0xff]  ;;  %v4121_v50 = vpack.c.bf16 %v760_v42, %v756_v41 }
  0xd8   : > { %v771_v49 = vld [vmem:[#allocation9 + $0x938] sm:$0xff]  ;;  %v4249_v51 = vpack.c.bf16 %v762_v45, %v758_v44  ;;  %v4123_v52 = vpack.c.bf16 %v769_v47, %v765_v46  ;;  %v764_v53 = vld [vmem:[#allocation9 + $0x900] sm:$0xff]  ;;  %v766_v55 = vld [vmem:[#allocation9 + $0x910] sm:$0xff]  ;;  %v378_v47 = vlaneseq  ;;  %p6005_p9 = pnand %p6004_p3, %p5998_p7 }
  0xd9   : > { %4118 = vmatpush1.bf16.msra.mxu0 %v4117_v34  ;;  %v768_v54 = vld [vmem:[#allocation9 + $0x920] sm:$0xff]  ;;  %v4251_v56 = vpack.c.bf16 %v771_v49, %v767_v48  ;;  %v770_v57 = vld [vmem:[#allocation9 + $0x930] sm:$0xff]  ;;  %v773_v58 = vld [vmem:[#allocation9 + $0x948] sm:$0xff] }
  0xda   : > { %4246 = vmatpush1.bf16.msra.mxu1 %v4245_v38  ;;  %4120 = vmatprep.subr.bf16.mxu0 %v4119_v39  ;;  %v777_v59 = vld [vmem:[#allocation9 + $0x968] sm:$0xff]  ;;  %v775_v60 = vld [vmem:[#allocation9 + $0x958] sm:$0xff]  ;;  %v4125_v62 = vpack.c.bf16 %v768_v54, %v764_v53  ;;  %v4253_v63 = vpack.c.bf16 %v770_v57, %v766_v55  ;;  %v772_v1 = vld [vmem:[#allocation9 + $0x940] sm:$0xff]  ;;  %vm380_vm0 = vcmp.lt.s32.totalorder %v378_v47, 512 }
  0xdb   : > { %4248 = vmatprep.subr.bf16.mxu1 %v4247_v43  ;;  %v779_v61 = vld [vmem:[#allocation9 + $0x978] sm:$0xff]  ;;  %v4127_v0 = vpack.c.bf16 %v777_v59, %v773_v58  ;;  %v776_v2 = vld [vmem:[#allocation9 + $0x960] sm:$0xff]  ;;  %v774_v3 = vld [vmem:[#allocation9 + $0x950] sm:$0xff] }
  0xdc   : > { %v4255_v4 = vpack.c.bf16 %v779_v61, %v775_v60  ;;  %v778_v5 = vld [vmem:[#allocation9 + $0x970] sm:$0xff]  ;;  %v781_v6 = vld [vmem:[#allocation9 + $0x988] sm:$0xff]  ;;  %v783_v8 = vld [vmem:[#allocation9 + $0x998] sm:$0xff]  ;;  %v4129_v10 = vpack.c.bf16 %v776_v2, %v772_v1  ;;  %v6396_v60 = vshrl.u32 %v378_v47, 7 }
  0xdd   : > { %4122 = vmatpush1.bf16.msra.mxu0 %v4121_v50  ;;  %v785_v7 = vld [vmem:[#allocation9 + $0x9a8] sm:$0xff]  ;;  %v787_v9 = vld [vmem:[#allocation9 + $0x9b8] sm:$0xff]  ;;  %v4257_v11 = vpack.c.bf16 %v778_v5, %v774_v3  ;;  %v780_v13 = vld [vmem:[#allocation9 + $0x980] sm:$0xff] }
  0xde   : > { %4250 = vmatpush1.bf16.msra.mxu1 %v4249_v51  ;;  %4124 = vmatprep.subr.bf16.mxu0 %v4123_v52  ;;  %v4131_v12 = vpack.c.bf16 %v785_v7, %v781_v6  ;;  %v784_v14 = vld [vmem:[#allocation9 + $0x9a0] sm:$0xff]  ;;  %v782_v15 = vld [vmem:[#allocation9 + $0x990] sm:$0xff]  ;;  %v4259_v16 = vpack.c.bf16 %v787_v9, %v783_v8  ;;  %v789_v18 = vld [vmem:[#allocation9 + $0x9c8] sm:$0xff] }
  0xdf   : > { %4252 = vmatprep.subr.bf16.mxu1 %v4251_v56  ;;  %v786_v17 = vld [vmem:[#allocation9 + $0x9b0] sm:$0xff]  ;;  %v793_v19 = vld [vmem:[#allocation9 + $0x9e8] sm:$0xff]  ;;  %v791_v20 = vld [vmem:[#allocation9 + $0x9d8] sm:$0xff]  ;;  %v4133_v22 = vpack.c.bf16 %v784_v14, %v780_v13 }
  0xe0   : > { %v795_v21 = vld [vmem:[#allocation9 + $0x9f8] sm:$0xff]  ;;  %v4261_v23 = vpack.c.bf16 %v786_v17, %v782_v15  ;;  %v4135_v24 = vpack.c.bf16 %v793_v19, %v789_v18  ;;  %v788_v25 = vld [vmem:[#allocation9 + $0x9c0] sm:$0xff]  ;;  %v790_v27 = vld [vmem:[#allocation9 + $0x9d0] sm:$0xff] }
  0xe1   : > { %4126 = vmatpush1.bf16.msra.mxu0 %v4125_v62  ;;  %v792_v26 = vld [vmem:[#allocation9 + $0x9e0] sm:$0xff]  ;;  %v4263_v28 = vpack.c.bf16 %v795_v21, %v791_v20  ;;  %v794_v29 = vld [vmem:[#allocation9 + $0x9f0] sm:$0xff]  ;;  %v797_v30 = vld [vmem:[#allocation9 + $0xa08] sm:$0xff] }
  0xe2   : > { %4254 = vmatpush1.bf16.msra.mxu1 %v4253_v63  ;;  %4128 = vmatprep.subr.bf16.mxu0 %v4127_v0  ;;  %v801_v31 = vld [vmem:[#allocation9 + $0xa28] sm:$0xff]  ;;  %v799_v32 = vld [vmem:[#allocation9 + $0xa18] sm:$0xff]  ;;  %v4137_v34 = vpack.c.bf16 %v792_v26, %v788_v25  ;;  %v4265_v35 = vpack.c.bf16 %v794_v29, %v790_v27  ;;  %v796_v37 = vld [vmem:[#allocation9 + $0xa00] sm:$0xff] }
  0xe3   : > { %4256 = vmatprep.subr.bf16.mxu1 %v4255_v4  ;;  %v803_v33 = vld [vmem:[#allocation9 + $0xa38] sm:$0xff]  ;;  %v4139_v36 = vpack.c.bf16 %v801_v31, %v797_v30  ;;  %v800_v38 = vld [vmem:[#allocation9 + $0xa20] sm:$0xff]  ;;  %v798_v39 = vld [vmem:[#allocation9 + $0xa10] sm:$0xff] }
  0xe4   : > { %v4267_v40 = vpack.c.bf16 %v803_v33, %v799_v32  ;;  %v802_v41 = vld [vmem:[#allocation9 + $0xa30] sm:$0xff]  ;;  %v805_v42 = vld [vmem:[#allocation9 + $0xa48] sm:$0xff]  ;;  %v807_v44 = vld [vmem:[#allocation9 + $0xa58] sm:$0xff]  ;;  %v4141_v46 = vpack.c.bf16 %v800_v38, %v796_v37 }
  0xe5   : > { %4130 = vmatpush1.bf16.msra.mxu0 %v4129_v10  ;;  %v809_v43 = vld [vmem:[#allocation9 + $0xa68] sm:$0xff]  ;;  %v811_v45 = vld [vmem:[#allocation9 + $0xa78] sm:$0xff]  ;;  %v4269_v48 = vpack.c.bf16 %v802_v41, %v798_v39  ;;  %v804_v50 = vld [vmem:[#allocation9 + $0xa40] sm:$0xff] }
  0xe6   : > { %4258 = vmatpush1.bf16.msra.mxu1 %v4257_v11  ;;  %4132 = vmatprep.subr.bf16.mxu0 %v4131_v12  ;;  %v4143_v49 = vpack.c.bf16 %v809_v43, %v805_v42  ;;  %v808_v51 = vld [vmem:[#allocation9 + $0xa60] sm:$0xff]  ;;  %v806_v52 = vld [vmem:[#allocation9 + $0xa50] sm:$0xff]  ;;  %v4271_v53 = vpack.c.bf16 %v811_v45, %v807_v44  ;;  %v813_v55 = vld [vmem:[#allocation9 + $0xa88] sm:$0xff]  ;;  %v6399_v11 = vsub.s32 1, %v6396_v60  ;;  %v6402_v12 = vsub.s32 0, %v6396_v60 }
  0xe7   : > { %4260 = vmatprep.subr.bf16.mxu1 %v4259_v16  ;;  %v810_v54 = vld [vmem:[#allocation9 + $0xa70] sm:$0xff]  ;;  %v817_v56 = vld [vmem:[#allocation9 + $0xaa8] sm:$0xff]  ;;  %v815_v57 = vld [vmem:[#allocation9 + $0xa98] sm:$0xff]  ;;  %v4145_v59 = vpack.c.bf16 %v808_v51, %v804_v50 }
  0xe8   : > { %v819_v58 = vld [vmem:[#allocation9 + $0xab8] sm:$0xff]  ;;  %v4273_v61 = vpack.c.bf16 %v810_v54, %v806_v52  ;;  %v4147_v62 = vpack.c.bf16 %v817_v56, %v813_v55  ;;  %v812_v63 = vld [vmem:[#allocation9 + $0xa80] sm:$0xff]  ;;  %v814_v1 = vld [vmem:[#allocation9 + $0xa90] sm:$0xff] }
  0xe9   : > { %4134 = vmatpush1.bf16.msra.mxu0 %v4133_v22  ;;  %v816_v0 = vld [vmem:[#allocation9 + $0xaa0] sm:$0xff]  ;;  %v4275_v2 = vpack.c.bf16 %v819_v58, %v815_v57  ;;  %v818_v3 = vld [vmem:[#allocation9 + $0xab0] sm:$0xff]  ;;  %v821_v4 = vld [vmem:[#allocation9 + $0xac8] sm:$0xff] }
  0xea   : > { %4262 = vmatpush1.bf16.msra.mxu1 %v4261_v23  ;;  %4136 = vmatprep.subr.bf16.mxu0 %v4135_v24  ;;  %v825_v5 = vld [vmem:[#allocation9 + $0xae8] sm:$0xff]  ;;  %v823_v6 = vld [vmem:[#allocation9 + $0xad8] sm:$0xff]  ;;  %v4149_v8 = vpack.c.bf16 %v816_v0, %v812_v63  ;;  %v820_v9 = vld [vmem:[#allocation9 + $0xac0] sm:$0xff]  ;;  %v4277_v13 = vpack.c.bf16 %v818_v3, %v814_v1 }
  0xeb   : > { %4264 = vmatprep.subr.bf16.mxu1 %v4263_v28  ;;  %v827_v7 = vld [vmem:[#allocation9 + $0xaf8] sm:$0xff]  ;;  %v824_v10 = vld [vmem:[#allocation9 + $0xae0] sm:$0xff]  ;;  %v4151_v14 = vpack.c.bf16 %v825_v5, %v821_v4  ;;  %v822_v15 = vld [vmem:[#allocation9 + $0xad0] sm:$0xff] }
  0xec   : > { %v826_v16 = vld [vmem:[#allocation9 + $0xaf0] sm:$0xff]  ;;  %v829_v17 = vld [vmem:[#allocation9 + $0xb08] sm:$0xff]  ;;  %v4279_v18 = vpack.c.bf16 %v827_v7, %v823_v6  ;;  %v831_v20 = vld [vmem:[#allocation9 + $0xb18] sm:$0xff]  ;;  %v4153_v22 = vpack.c.bf16 %v824_v10, %v820_v9 }
  0xed   : > { %4138 = vmatpush1.bf16.msra.mxu0 %v4137_v34  ;;  %v833_v19 = vld [vmem:[#allocation9 + $0xb28] sm:$0xff]  ;;  %v835_v21 = vld [vmem:[#allocation9 + $0xb38] sm:$0xff]  ;;  %v375_v23 = vld [vmem:[%s6377_s14 + $0x8] sm:$0xff]  ;;  %v4281_v31 = vpack.c.bf16 %v826_v16, %v822_v15 }
  0xee   : > { %4266 = vmatpush1.bf16.msra.mxu1 %v4265_v35  ;;  %4140 = vmatprep.subr.bf16.mxu0 %v4139_v36  ;;  %v6405_v24 = vld [vmem:[#allocation6] sm:$0xf]  ;;  %v6407_v25 = vld [vmem:[#allocation8] sm:$0xf]  ;;  %v828_v26 = vld [vmem:[#allocation9 + $0xb00] sm:$0xff]  ;;  %v4155_v32 = vpack.c.bf16 %v833_v19, %v829_v17  ;;  %v4283_v36 = vpack.c.bf16 %v835_v21, %v831_v20 }
  0xef   : > { %4268 = vmatprep.subr.bf16.mxu1 %v4267_v40  ;;  %v396_v27 = vrot.slane %v6405_v24, %v6399_v11  ;;  %v422_v28 = vrot.slane %v6407_v25, %v6399_v11  ;;  %v392_v29 = vrot.slane %v6405_v24, %v6402_v12  ;;  %v418_v30 = vrot.slane %v6407_v25, %v6402_v12  ;;  %v832_v33 = vld [vmem:[#allocation9 + $0xb20] sm:$0xff]  ;;  %v830_v34 = vld [vmem:[#allocation9 + $0xb10] sm:$0xff]  ;;  %v374_v35 = vld [vmem:[%s6377_s14] sm:$0xff] }
  0xf0   : > { %v834_v37 = vld [vmem:[#allocation9 + $0xb30] sm:$0xff]  ;;  %v837_v38 = vld [vmem:[#allocation9 + $0xb48] sm:$0xff]  ;;  %v839_v42 = vld [vmem:[#allocation9 + $0xb58] sm:$0xff]  ;;  %v4157_v44 = vpack.c.bf16 %v832_v33, %v828_v26 }
  0xf1   : > { %4142 = vmatpush1.bf16.msra.mxu0 %v4141_v46  ;;  %v841_v39 = vld [vmem:[#allocation9 + $0xb68] sm:$0xff]  ;;  %v410_v40 = vmul.f32 %v396_v27, %v375_v23  ;;  %v409_v41 = vmul.f32 %v392_v29, %v374_v35  ;;  %v843_v43 = vld [vmem:[#allocation9 + $0xb78] sm:$0xff]  ;;  %v836_v50 = vld [vmem:[#allocation9 + $0xb40] sm:$0xff] }
  0xf2   : > { %4270 = vmatpush1.bf16.msra.mxu1 %v4269_v48  ;;  %4144 = vmatprep.subr.bf16.mxu0 %v4143_v49  ;;  %v4285_v48 = vpack.c.bf16 %v834_v37, %v830_v34  ;;  %v4159_v49 = vpack.c.bf16 %v841_v39, %v837_v38  ;;  %v840_v51 = vld [vmem:[#allocation9 + $0xb60] sm:$0xff]  ;;  %v838_v52 = vld [vmem:[#allocation9 + $0xb50] sm:$0xff]  ;;  %v845_v55 = vld [vmem:[#allocation9 + $0xb88] sm:$0xff]  ;;  %v6084_v34 = vmov 0.0  }
  0xf3   : > { %4272 = vmatprep.subr.bf16.mxu1 %v4271_v53  ;;  %v436_v45 = vadd.f32 %v422_v28, %v410_v40  ;;  %v435_v46 = vadd.f32 %v418_v30, %v409_v41  ;;  %v4287_v53 = vpack.c.bf16 %v843_v43, %v839_v42  ;;  %v842_v54 = vld [vmem:[#allocation9 + $0xb70] sm:$0xff]  ;;  %v849_v56 = vld [vmem:[#allocation9 + $0xba8] sm:$0xff]  ;;  %v844_v3 = vld [vmem:[#allocation9 + $0xb80] sm:$0xff]  ;;  %382 = vst.msk [vmem:[#allocation2] ss:$8 sm:$0xf] %vm380_vm0, %v6084_v34 }
  0xf4   : > { %v4289_v1 = vpack.c.bf16 %v842_v54, %v838_v52  ;;  %v848_v4 = vld [vmem:[#allocation9 + $0xba0] sm:$0xff]  ;;  %v846_v5 = vld [vmem:[#allocation9 + $0xb90] sm:$0xff]  ;;  %v857_v9 = vld [vmem:[#allocation9 + $0xbe8] sm:$0xff]  ;;  %385 = vst.msk [vmem:[#allocation2 + $0x21] ss:$8 sm:$0xf] %vm380_vm0, %v6084_v34 }
  0xf5   : > { %4146 = vmatpush1.bf16.msra.mxu0 %v4145_v59  ;;  %v440_v57 = vmax.f32 %v436_v45, 0.0  ;;  %v439_v58 = vmax.f32 %v435_v46, 0.0  ;;  %v847_v59 = vld [vmem:[#allocation9 + $0xb98] sm:$0xff]  ;;  %v850_v7 = vld [vmem:[#allocation9 + $0xbb0] sm:$0xff]  ;;  %v852_v15 = vld [vmem:[#allocation9 + $0xbc0] sm:$0xff] }
  0xf6   : > { %4274 = vmatpush1.bf16.msra.mxu1 %v4273_v61  ;;  %4148 = vmatprep.subr.bf16.mxu0 %v4147_v62  ;;  %v851_v61 = vld [vmem:[#allocation9 + $0xbb8] sm:$0xff]  ;;  %v4161_v62 = vpack.c.bf16 %v840_v51, %v836_v50  ;;  %v4293_v16 = vpack.c.bf16 %v850_v7, %v846_v5  ;;  %v854_v19 = vld [vmem:[#allocation9 + $0xbd0] sm:$0xff]  ;;  %v865_v23 = vld [vmem:[#allocation9 + $0xc28] sm:$0xff] }
  0xf7   : > { %4276 = vmatprep.subr.bf16.mxu1 %v4275_v2  ;;  %v448_v63 = vrot.slane %v440_v57, 7  ;;  %v447_v0 = vrot.slane %v439_v58, 7  ;;  %v4163_v2 = vpack.c.bf16 %v849_v56, %v845_v55  ;;  %v4291_v6 = vpack.c.bf16 %v851_v61, %v847_v59  ;;  %v855_v10 = vld [vmem:[#allocation9 + $0xbd8] sm:$0xff]  ;;  %v858_v20 = vld [vmem:[#allocation9 + $0xbf0] sm:$0xff]  ;;  %v860_v28 = vld [vmem:[#allocation9 + $0xc00] sm:$0xff] }
  0xf8   : > { %v863_v26 = vld [vmem:[#allocation9 + $0xc18] sm:$0xff]  ;;  %v864_v29 = vld [vmem:[#allocation9 + $0xc20] sm:$0xff]  ;;  %v869_v33 = vld [vmem:[#allocation9 + $0xc48] sm:$0xff]  ;;  %v4297_v35 = vpack.c.bf16 %v858_v20, %v854_v19 }
  0xf9   : > { %4150 = vmatpush1.bf16.msra.mxu0 %v4149_v8  ;;  %v853_v8 = vld [vmem:[#allocation9 + $0xbc8] sm:$0xff]  ;;  %456 = vst [vmem:[#allocation2 + $0x8] sm:$0xfe] %v448_v63  ;;  %460 = vst [vmem:[#allocation2 + $0x28] sm:$0x1] %v448_v63  ;;  %v867_v27 = vld [vmem:[#allocation9 + $0xc38] sm:$0xff]  ;;  %v4173_v50 = vpack.c.bf16 %v864_v29, %v860_v28 }
  0xfa   : > { %4278 = vmatpush1.bf16.msra.mxu1 %v4277_v13  ;;  %4152 = vmatprep.subr.bf16.mxu0 %v4151_v14  ;;  %455 = vst [vmem:[#allocation2] sm:$0xfe] %v447_v0  ;;  %459 = vst [vmem:[#allocation2 + $0x20] sm:$0x1] %v447_v0  ;;  %v859_v13 = vld [vmem:[#allocation9 + $0xbf8] sm:$0xff]  ;;  %v4165_v14 = vpack.c.bf16 %v848_v4, %v844_v3  ;;  %v4167_v17 = vpack.c.bf16 %v857_v9, %v853_v8  ;;  %v873_v43 = vld [vmem:[#allocation9 + $0xc68] sm:$0xff] }
  0xfb   : > { %4280 = vmatprep.subr.bf16.mxu1 %v4279_v18  ;;  %v856_v18 = vld [vmem:[#allocation9 + $0xbe0] sm:$0xff]  ;;  %v4295_v21 = vpack.c.bf16 %v859_v13, %v855_v10  ;;  %v871_v46 = vld [vmem:[#allocation9 + $0xc58] sm:$0xff]  ;;  %v870_v56 = vld [vmem:[#allocation9 + $0xc50] sm:$0xff] }
  0xfc   : > { %v4169_v30 = vpack.c.bf16 %v856_v18, %v852_v15  ;;  %v868_v54 = vld [vmem:[#allocation9 + $0xc40] sm:$0xff]  ;;  %v874_v58 = vld [vmem:[#allocation9 + $0xc70] sm:$0xff]  ;;  %v877_v59 = vld [vmem:[#allocation9 + $0xc88] sm:$0xff] }
  0xfd   : > { %4154 = vmatpush1.bf16.msra.mxu0 %v4153_v22  ;;  %v861_v22 = vld [vmem:[#allocation9 + $0xc08] sm:$0xff]  ;;  %v872_v55 = vld [vmem:[#allocation9 + $0xc60] sm:$0xff]  ;;  %v883_v63 = vld [vmem:[#allocation9 + $0xcb8] sm:$0xff] }
  0xfe   : > { %4282 = vmatpush1.bf16.msra.mxu1 %v4281_v31  ;;  %4156 = vmatprep.subr.bf16.mxu0 %v4155_v32  ;;  %v862_v31 = vld [vmem:[#allocation9 + $0xc10] sm:$0xff]  ;;  %v4171_v41 = vpack.c.bf16 %v865_v23, %v861_v22  ;;  %v881_v61 = vld [vmem:[#allocation9 + $0xca8] sm:$0xff]  ;;  %v4177_v0 = vpack.c.bf16 %v872_v55, %v868_v54  ;;  %v876_v3 = vld [vmem:[#allocation9 + $0xc80] sm:$0xff] }
  0xff   : > { %4284 = vmatprep.subr.bf16.mxu1 %v4283_v36  ;;  %v866_v32 = vld [vmem:[#allocation9 + $0xc30] sm:$0xff]  ;;  %v880_v4 = vld [vmem:[#allocation9 + $0xca0] sm:$0xff]  ;;  %v885_v8 = vld [vmem:[#allocation9 + $0xcc8] sm:$0xff] }
 0x100   : > { %v724_v36 = vld [vmem:[#allocation2 + $0x8] sm:$0xfe]  ;;  %v728_v37 = vld [vmem:[#allocation2 + $0x28] sm:$0x1]  ;;  %v4301_v52 = vpack.c.bf16 %v866_v32, %v862_v31  ;;  %v878_v5 = vld [vmem:[#allocation9 + $0xc90] sm:$0xff] }
 0x101   : > { %4158 = vmatpush1.bf16.msra.mxu0 %v4157_v44  ;;  %v723_v38 = vld [vmem:[#allocation2] sm:$0xfe]  ;;  %v1000_v39 = vrot.slane %v724_v36, 1  ;;  %v1001_v40 = vrot.slane %v728_v37, 1  ;;  %v727_v47 = vld [vmem:[#allocation2 + $0x20] sm:$0x1]  ;;  %v4299_v44 = vpack.c.bf16 %v867_v27, %v863_v26 }
 0x102   : > { %4286 = vmatpush1.bf16.msra.mxu1 %v4285_v48  ;;  %4160 = vmatprep.subr.bf16.mxu0 %v4159_v49  ;;  %v997_v42 = vrot.slane %v723_v38, 1  ;;  %v998_v45 = vrot.slane %v727_v47, 1  ;;  %v875_v48 = vld [vmem:[#allocation9 + $0xc78] sm:$0xff]  ;;  %v882_v7 = vld [vmem:[#allocation9 + $0xcb0] sm:$0xff]  ;;  %v889_v9 = vld [vmem:[#allocation9 + $0xce8] sm:$0xff] }
 0x103   : > { %4288 = vmatprep.subr.bf16.mxu1 %v4287_v53  ;;  %v1002_v49 = vsel %vm996_vm1, %v1000_v39, %v1001_v40  ;;  %v4175_v53 = vpack.c.bf16 %v873_v43, %v869_v33  ;;  %v4303_v57 = vpack.c.bf16 %v875_v48, %v871_v46  ;;  %v887_v10 = vld [vmem:[#allocation9 + $0xcd8] sm:$0xff]  ;;  %v4309_v15 = vpack.c.bf16 %v882_v7, %v878_v5  ;;  %v888_v18 = vld [vmem:[#allocation9 + $0xce0] sm:$0xff]  ;;  %v886_v19 = vld [vmem:[#allocation9 + $0xcd0] sm:$0xff] }
 0x104   : > { %1077 = vmatprep.mubr.f32.mxu0 %v1002_v49  ;;  %v999_v51 = vsel %vm996_vm1, %v997_v42, %v998_v45  ;;  %1219 = vmatprep.mubr.f32.mxu1 %v1002_v49  ;;  %v891_v13 = vld [vmem:[#allocation9 + $0xcf8] sm:$0xff]  ;;  %v893_v22 = vld [vmem:[#allocation9 + $0xd08] sm:$0xff]  ;;  %v892_v31 = vld [vmem:[#allocation9 + $0xd00] sm:$0xff]  ;;  %v6422_v45 = vsub.s32 3, %v6396_v60 }
 0x105   : > { %4162 = vmatpush1.bf16.msra.mxu0 %v4161_v62  ;;  %v879_v62 = vld [vmem:[#allocation9 + $0xc98] sm:$0xff]  ;;  %v4311_v20 = vpack.c.bf16 %v891_v13, %v887_v10  ;;  %v897_v23 = vld [vmem:[#allocation9 + $0xd28] sm:$0xff]  ;;  %v896_v32 = vld [vmem:[#allocation9 + $0xd20] sm:$0xff] }
 0x106   : > { %4290 = vmatpush1.bf16.msra.mxu1 %v4289_v1  ;;  %4164 = vmatprep.subr.bf16.mxu0 %v4163_v2  ;;  %v4305_v1 = vpack.c.bf16 %v874_v58, %v870_v56  ;;  %v4179_v2 = vpack.c.bf16 %v881_v61, %v877_v59  ;;  %v895_v26 = vld [vmem:[#allocation9 + $0xd18] sm:$0xff]  ;;  %v894_v33 = vld [vmem:[#allocation9 + $0xd10] sm:$0xff]  ;;  %v901_v36 = vld [vmem:[#allocation9 + $0xd48] sm:$0xff]  ;;  %v4189_v40 = vpack.c.bf16 %v896_v32, %v892_v31 }
 0x107   : > { %4292 = vmatprep.subr.bf16.mxu1 %v4291_v6  ;;  %v4307_v6 = vpack.c.bf16 %v883_v63, %v879_v62  ;;  %v899_v27 = vld [vmem:[#allocation9 + $0xd38] sm:$0xff]  ;;  %v905_v37 = vld [vmem:[#allocation9 + $0xd68] sm:$0xff]  ;;  %v900_v42 = vld [vmem:[#allocation9 + $0xd40] sm:$0xff]  ;;  %v404_v61 = vrot.slane %v6405_v24, %v6422_v45 }
 0x108   : > { %v4315_v34 = vpack.c.bf16 %v899_v27, %v895_v26  ;;  %v903_v38 = vld [vmem:[#allocation9 + $0xd58] sm:$0xff]  ;;  %v4191_v47 = vpack.c.bf16 %v905_v37, %v901_v36  ;;  %v904_v43 = vld [vmem:[#allocation9 + $0xd60] sm:$0xff]  ;;  %v906_v48 = vld [vmem:[#allocation9 + $0xd70] sm:$0xff] }
 0x109   : > { %4166 = vmatpush1.bf16.msra.mxu0 %v4165_v14  ;;  %v4181_v14 = vpack.c.bf16 %v880_v4, %v876_v3  ;;  %v907_v39 = vld [vmem:[#allocation9 + $0xd78] sm:$0xff]  ;;  %v909_v49 = vld [vmem:[#allocation9 + $0xd88] sm:$0xff]  ;;  %v4193_v54 = vpack.c.bf16 %v904_v43, %v900_v42  ;;  %v912_v58 = vld [vmem:[#allocation9 + $0xda0] sm:$0xff]  ;;  %v430_v3 = vrot.slane %v6407_v25, %v6422_v45 }
 0x10a   : > { %4294 = vmatpush1.bf16.msra.mxu1 %v4293_v16  ;;  %4168 = vmatprep.subr.bf16.mxu0 %v4167_v17  ;;  %v4183_v16 = vpack.c.bf16 %v889_v9, %v885_v8  ;;  %v884_v17 = vld [vmem:[#allocation9 + $0xcc0] sm:$0xff]  ;;  %v4319_v46 = vpack.c.bf16 %v907_v39, %v903_v38  ;;  %v910_v59 = vld [vmem:[#allocation9 + $0xd90] sm:$0xff]  ;;  %v937_v36 = vld [vmem:[#allocation9 + $0xe68] sm:$0xff] }
 0x10b   : > { %4296 = vmatprep.subr.bf16.mxu1 %v4295_v21  ;;  %v890_v21 = vld [vmem:[#allocation9 + $0xcf0] sm:$0xff]  ;;  %v4185_v28 = vpack.c.bf16 %v888_v18, %v884_v17  ;;  %v920_v13 = vld [vmem:[#allocation9 + $0xde0] sm:$0xff]  ;;  %v925_v18 = vld [vmem:[#allocation9 + $0xe08] sm:$0xff] }
 0x10c   : > { %v4313_v29 = vpack.c.bf16 %v890_v21, %v886_v19  ;;  %v914_v63 = vld [vmem:[#allocation9 + $0xdb0] sm:$0xff]  ;;  %v376_v19 = vld [vmem:[%s6377_s14 + $0x10] sm:$0xff]  ;;  %v931_v21 = vld [vmem:[#allocation9 + $0xe38] sm:$0xff] }
 0x10d   : > { %4170 = vmatpush1.bf16.msra.mxu0 %v4169_v30  ;;  %v4187_v30 = vpack.c.bf16 %v897_v23, %v893_v22  ;;  %v377_v7 = vld [vmem:[%s6377_s14 + $0x18] sm:$0xff]  ;;  %v4325_v9 = vpack.c.bf16 %v914_v63, %v910_v59  ;;  %v935_v37 = vld [vmem:[#allocation9 + $0xe58] sm:$0xff]  ;;  %v932_v43 = vld [vmem:[#allocation9 + $0xe40] sm:$0xff] }
 0x10e   : > { %4298 = vmatpush1.bf16.msra.mxu1 %v4297_v35  ;;  %4172 = vmatprep.subr.bf16.mxu0 %v4171_v41  ;;  %v898_v35 = vld [vmem:[#allocation9 + $0xd30] sm:$0xff]  ;;  %v939_v38 = vld [vmem:[#allocation9 + $0xe78] sm:$0xff]  ;;  %v940_v59 = vld [vmem:[#allocation9 + $0xe80] sm:$0xff] }
 0x10f   : > { %4300 = vmatprep.subr.bf16.mxu1 %v4299_v44  ;;  %v4317_v41 = vpack.c.bf16 %v898_v35, %v894_v33  ;;  %v902_v44 = vld [vmem:[#allocation9 + $0xd50] sm:$0xff]  ;;  %v933_v35 = vld [vmem:[#allocation9 + $0xe48] sm:$0xff] }
 0x110   : > { %1078 = vmatmul.mubr.f32.vlgmr.msra.gmra.mrb[0].mxu0 %v999_v51  ;;  %v4321_v55 = vpack.c.bf16 %v906_v48, %v902_v44  ;;  %v4207_v42 = vpack.c.bf16 %v937_v36, %v933_v35  ;;  %v936_v44 = vld [vmem:[#allocation9 + $0xe60] sm:$0xff] }
 0x111   : > { %4174 = vmatpush1.bf16.msra.mxu0 %v4173_v50  ;;  %1220 = vmatmul.mubr.f32.vlgmr.msra.gmra.mrb[0].mxu1 %v999_v51  ;;  %v913_v50 = vld [vmem:[#allocation9 + $0xda8] sm:$0xff]  ;;  %v911_v51 = vld [vmem:[#allocation9 + $0xd98] sm:$0xff] }
 0x112   : > { %4302 = vmatpush1.bf16.msra.mxu1 %v4301_v52  ;;  %4176 = vmatprep.subr.bf16.mxu0 %v4175_v53  ;;  %v915_v52 = vld [vmem:[#allocation9 + $0xdb8] sm:$0xff]  ;;  %v6425_v53 = vsub.s32 2, %v6396_v60  ;;  %v4195_v56 = vpack.c.bf16 %v913_v50, %v909_v49  ;;  %v4335_v49 = vpack.c.bf16 %v939_v38, %v935_v37  ;;  %v938_v50 = vld [vmem:[#allocation9 + $0xe70] sm:$0xff]  ;;  %v964_v38 = vld [vmem:[#allocation9 + $0xf40] sm:$0xff] }
 0x113   : > { %4304 = vmatprep.subr.bf16.mxu1 %v4303_v57  ;;  %v908_v57 = vld [vmem:[#allocation9 + $0xd80] sm:$0xff]  ;;  %v4323_v62 = vpack.c.bf16 %v915_v52, %v911_v51  ;;  %v919_v60 = vld [vmem:[#allocation9 + $0xdd8] sm:$0xff]  ;;  %v941_v51 = vld [vmem:[#allocation9 + $0xe88] sm:$0xff] }
 0x114   : > { %v400_v4 = vrot.slane %v6405_v24, %v6425_v53  ;;  %v4197_v5 = vpack.c.bf16 %v912_v58, %v908_v57  ;;  %v426_v8 = vrot.slane %v6407_v25, %v6425_v53  ;;  %v929_v24 = vld [vmem:[#allocation9 + $0xe28] sm:$0xff] }
 0x115   : > { %4178 = vmatpush1.bf16.msra.mxu0 %v4177_v0  ;;  %v917_v0 = vld [vmem:[#allocation9 + $0xdc8] sm:$0xff]  ;;  %v4203_v27 = vpack.c.bf16 %v929_v24, %v925_v18 }
 0x116   : > { %4306 = vmatpush1.bf16.msra.mxu1 %v4305_v1  ;;  %4180 = vmatprep.subr.bf16.mxu0 %v4179_v2  ;;  %v921_v1 = vld [vmem:[#allocation9 + $0xde8] sm:$0xff]  ;;  %v923_v2 = vld [vmem:[#allocation9 + $0xdf8] sm:$0xff]  ;;  %v411_v23 = vmul.f32 %v400_v4, %v376_v19 }
 0x117   : > { %4308 = vmatprep.subr.bf16.mxu1 %v4307_v6  ;;  %v916_v6 = vld [vmem:[#allocation9 + $0xdc0] sm:$0xff]  ;;  %v4199_v10 = vpack.c.bf16 %v921_v1, %v917_v0  ;;  %v4327_v17 = vpack.c.bf16 %v923_v2, %v919_v60  ;;  %v945_v52 = vld [vmem:[#allocation9 + $0xea8] sm:$0xff]  ;;  %v946_v0 = vld [vmem:[#allocation9 + $0xeb0] sm:$0xff] }
 0x118   : > { %v4201_v26 = vpack.c.bf16 %v920_v13, %v916_v6  ;;  %v437_v32 = vadd.f32 %v426_v8, %v411_v23  ;;  %v4211_v58 = vpack.c.bf16 %v945_v52, %v941_v51  ;;  %v949_v1 = vld [vmem:[#allocation9 + $0xec8] sm:$0xff]  ;;  %v951_v2 = vld [vmem:[#allocation9 + $0xed8] sm:$0xff]  ;;  %v950_v13 = vld [vmem:[#allocation9 + $0xed0] sm:$0xff] }
 0x119   : > { %4182 = vmatpush1.bf16.msra.mxu0 %v4181_v14  ;;  %v918_v14 = vld [vmem:[#allocation9 + $0xdd0] sm:$0xff]  ;;  %v953_v60 = vld [vmem:[#allocation9 + $0xee8] sm:$0xff]  ;;  %v959_v19 = vld [vmem:[#allocation9 + $0xf18] sm:$0xff] }
 0x11a   : > { %4310 = vmatpush1.bf16.msra.mxu1 %v4309_v15  ;;  %4184 = vmatprep.subr.bf16.mxu0 %v4183_v16  ;;  %v922_v15 = vld [vmem:[#allocation9 + $0xdf0] sm:$0xff]  ;;  %v412_v16 = vmul.f32 %v404_v61, %v377_v7  ;;  %v944_v61 = vld [vmem:[#allocation9 + $0xea0] sm:$0xff]  ;;  %v4215_v8 = vpack.c.bf16 %v953_v60, %v949_v1  ;;  %v957_v18 = vld [vmem:[#allocation9 + $0xf08] sm:$0xff] }
 0x11b   : > { %4312 = vmatprep.subr.bf16.mxu1 %v4311_v20  ;;  %v927_v20 = vld [vmem:[#allocation9 + $0xe18] sm:$0xff]  ;;  %v4329_v25 = vpack.c.bf16 %v922_v15, %v918_v14  ;;  %v4213_v4 = vpack.c.bf16 %v944_v61, %v940_v59  ;;  %v961_v24 = vld [vmem:[#allocation9 + $0xf28] sm:$0xff]  ;;  %v972_v51 = vld [vmem:[#allocation9 + $0xf80] sm:$0xff] }
 0x11c   : > { %v438_v22 = vadd.f32 %v430_v3, %v412_v16  ;;  %v4331_v33 = vpack.c.bf16 %v931_v21, %v927_v20  ;;  %v955_v3 = vld [vmem:[#allocation9 + $0xef8] sm:$0xff]  ;;  %v976_v52 = vld [vmem:[#allocation9 + $0xfa0] sm:$0xff] }
 0x11d   : > { %4186 = vmatpush1.bf16.msra.mxu0 %v4185_v28  ;;  %v924_v28 = vld [vmem:[#allocation9 + $0xe00] sm:$0xff]  ;;  %v4343_v16 = vpack.c.bf16 %v955_v3, %v951_v2  ;;  %v963_v20 = vld [vmem:[#allocation9 + $0xf38] sm:$0xff]  ;;  %v982_v2 = vld [vmem:[#allocation9 + $0xfd0] sm:$0xff] }
 0x11e   : > { %4314 = vmatpush1.bf16.msra.mxu1 %v4313_v29  ;;  %4188 = vmatprep.subr.bf16.mxu0 %v4187_v30  ;;  %v928_v29 = vld [vmem:[#allocation9 + $0xe20] sm:$0xff]  ;;  %v926_v30 = vld [vmem:[#allocation9 + $0xe10] sm:$0xff]  ;;  %v442_v31 = vmax.f32 %v438_v22, 0.0  ;;  %v983_v59 = vld [vmem:[#allocation9 + $0xfd8] sm:$0xff] }
 0x11f   : > { %4316 = vmatprep.subr.bf16.mxu1 %v4315_v34  ;;  %v930_v34 = vld [vmem:[#allocation9 + $0xe30] sm:$0xff]  ;;  %v987_v61 = vld [vmem:[#allocation9 + $0xff8] sm:$0xff] }
 0x120   : > { %v450_v39 = vrot.slane %v442_v31, 7  ;;  %v965_v31 = vld [vmem:[#allocation9 + $0xf48] sm:$0xff] }
 0x121   : > { %4190 = vmatpush1.bf16.msra.mxu0 %v4189_v40  ;;  %v441_v40 = vmax.f32 %v437_v32, 0.0  ;;  %v969_v32 = vld [vmem:[#allocation9 + $0xf68] sm:$0xff] }
 0x122   : > { %4318 = vmatpush1.bf16.msra.mxu1 %v4317_v41  ;;  %4192 = vmatprep.subr.bf16.mxu0 %v4191_v47  ;;  %v4205_v41 = vpack.c.bf16 %v928_v29, %v924_v28  ;;  %v4333_v47 = vpack.c.bf16 %v930_v34, %v926_v30  ;;  %458 = vst [vmem:[#allocation2 + $0x18] sm:$0xfe] %v450_v39  ;;  %462 = vst [vmem:[#allocation2 + $0x38] sm:$0x1] %v450_v39  ;;  %v958_v28 = vld [vmem:[#allocation9 + $0xf10] sm:$0xff]  ;;  %v971_v34 = vld [vmem:[#allocation9 + $0xf78] sm:$0xff] }
 0x123   : > { %4320 = vmatprep.subr.bf16.mxu1 %v4319_v46  ;;  %v934_v46 = vld [vmem:[#allocation9 + $0xe50] sm:$0xff]  ;;  %v449_v48 = vrot.slane %v441_v40, 7  ;;  %v4347_v29 = vpack.c.bf16 %v963_v20, %v959_v19  ;;  %v4223_v37 = vpack.c.bf16 %v969_v32, %v965_v31  ;;  %v968_v39 = vld [vmem:[#allocation9 + $0xf60] sm:$0xff] }
 0x124   : > { %v4337_v57 = vpack.c.bf16 %v938_v50, %v934_v46  ;;  %v962_v30 = vld [vmem:[#allocation9 + $0xf30] sm:$0xff]  ;;  %v979_v46 = vld [vmem:[#allocation9 + $0xfb8] sm:$0xff]  ;;  %v475_v31 = vld [vmem:[#allocation9 + $0x40] sm:$0xff] }
 0x125   : > { %4194 = vmatpush1.bf16.msra.mxu0 %v4193_v54  ;;  %v943_v54 = vld [vmem:[#allocation9 + $0xe98] sm:$0xff]  ;;  %457 = vst [vmem:[#allocation2 + $0x10] sm:$0xfe] %v449_v48  ;;  %461 = vst [vmem:[#allocation2 + $0x30] sm:$0x1] %v449_v48  ;;  %v4349_v36 = vpack.c.bf16 %v962_v30, %v958_v28  ;;  %v966_v40 = vld [vmem:[#allocation9 + $0xf50] sm:$0xff]  ;;  %v4225_v48 = vpack.c.bf16 %v968_v39, %v964_v38 }
 0x126   : > { %4322 = vmatpush1.bf16.msra.mxu1 %v4321_v55  ;;  %4196 = vmatprep.subr.bf16.mxu0 %v4195_v56  ;;  %v947_v55 = vld [vmem:[#allocation9 + $0xeb8] sm:$0xff]  ;;  %v4209_v56 = vpack.c.bf16 %v936_v44, %v932_v43  ;;  %v977_v43 = vld [vmem:[#allocation9 + $0xfa8] sm:$0xff]  ;;  %v469_v19 = vld [vmem:[#allocation9 + $0x10] sm:$0xff] }
 0x127   : > { %4324 = vmatprep.subr.bf16.mxu1 %v4323_v62  ;;  %v942_v62 = vld [vmem:[#allocation9 + $0xe90] sm:$0xff]  ;;  %v4339_v63 = vpack.c.bf16 %v947_v55, %v943_v54  ;;  %v975_v44 = vld [vmem:[#allocation9 + $0xf98] sm:$0xff]  ;;  %v479_v32 = vld [vmem:[#allocation9 + $0x60] sm:$0xff] }
 0x128   : > { %v4341_v7 = vpack.c.bf16 %v946_v0, %v942_v62  ;;  %v974_v54 = vld [vmem:[#allocation9 + $0xf90] sm:$0xff]  ;;  %v4355_v55 = vpack.c.bf16 %v979_v46, %v975_v44  ;;  %v4229_v62 = vpack.c.bf16 %v976_v52, %v972_v51  ;;  %v984_v0 = vld [vmem:[#allocation9 + $0xfe0] sm:$0xff]  ;;  %v486_v38 = vld [vmem:[#allocation9 + $0x98] sm:$0xff] }
 0x129   : > { %4198 = vmatpush1.bf16.msra.mxu0 %v4197_v5  ;;  %v726_v5 = vld [vmem:[#allocation2 + $0x18] sm:$0xfe]  ;;  %v730_v6 = vld [vmem:[#allocation2 + $0x38] sm:$0x1]  ;;  %v490_v39 = vld [vmem:[#allocation9 + $0xb8] sm:$0xff] }
 0x12a   : > { %4326 = vmatpush1.bf16.msra.mxu1 %v4325_v9  ;;  %4200 = vmatprep.subr.bf16.mxu0 %v4199_v10  ;;  %v948_v9 = vld [vmem:[#allocation9 + $0xec0] sm:$0xff]  ;;  %v1006_v14 = vrot.slane %v726_v5, 1  ;;  %v1007_v15 = vrot.slane %v730_v6, 1  ;;  %v4359_v5 = vpack.c.bf16 %v987_v61, %v983_v59  ;;  %v986_v6 = vld [vmem:[#allocation9 + $0xff0] sm:$0xff]  ;;  %v496_v51 = vld [vmem:[#allocation9 + $0xe8] sm:$0xff] }
 0x12b   : > { %4328 = vmatprep.subr.bf16.mxu1 %v4327_v17  ;;  %v952_v10 = vld [vmem:[#allocation9 + $0xee0] sm:$0xff]  ;;  %v954_v17 = vld [vmem:[#allocation9 + $0xef0] sm:$0xff]  ;;  %v494_v52 = vld [vmem:[#allocation9 + $0xd8] sm:$0xff] }
 0x12c   : > { %v1008_v21 = vsel %vm996_vm1, %v1006_v14, %v1007_v15  ;;  %v4217_v22 = vpack.c.bf16 %v952_v10, %v948_v9  ;;  %v4345_v23 = vpack.c.bf16 %v954_v17, %v950_v13  ;;  %v725_v3 = vld [vmem:[#allocation2 + $0x10] sm:$0xfe]  ;;  %v470_v9 = vld [vmem:[#allocation9 + $0x18] sm:$0xff]  ;;  %v485_v44 = vld [vmem:[#allocation9 + $0x90] sm:$0xff] }
 0x12d   : > { %4202 = vmatpush1.bf16.msra.mxu0 %v4201_v26  ;;  %1148 = vmatprep.mubr.f32.mxu0 %v1008_v21  ;;  %v4219_v26 = vpack.c.bf16 %v961_v24, %v957_v18  ;;  %v474_v10 = vld [vmem:[#allocation9 + $0x38] sm:$0xff]  ;;  %v1003_v14 = vrot.slane %v725_v3, 1  ;;  %v467_v18 = vld [vmem:[#allocation9] sm:$0xff]  ;;  %v493_v61 = vld [vmem:[#allocation9 + $0xd0] sm:$0xff] }
 0x12e   : > { %4330 = vmatpush1.bf16.msra.mxu1 %v4329_v25  ;;  %4204 = vmatprep.subr.bf16.mxu0 %v4203_v27  ;;  %v956_v25 = vld [vmem:[#allocation9 + $0xf00] sm:$0xff]  ;;  %v4491_v20 = vpack.c.bf16 %v474_v10, %v470_v9  ;;  %v505_v10 = vld [vmem:[#allocation9 + $0x130] sm:$0xff] }
 0x12f   : > { %4332 = vmatprep.subr.bf16.mxu1 %v4331_v33  ;;  %v960_v27 = vld [vmem:[#allocation9 + $0xf20] sm:$0xff]  ;;  %1290 = vmatprep.mubr.f32.mxu1 %v1008_v21  ;;  %v967_v33 = vld [vmem:[#allocation9 + $0xf58] sm:$0xff]  ;;  %v473_v21 = vld [vmem:[#allocation9 + $0x30] sm:$0xff] }
 0x130   : > { %v4221_v35 = vpack.c.bf16 %v960_v27, %v956_v25  ;;  %v471_v24 = vld [vmem:[#allocation9 + $0x20] sm:$0xff]  ;;  %v482_v25 = vld [vmem:[#allocation9 + $0x78] sm:$0xff] }
 0x131   : > { %4206 = vmatpush1.bf16.msra.mxu0 %v4205_v41  ;;  %v4351_v41 = vpack.c.bf16 %v971_v34, %v967_v33  ;;  %v4365_v28 = vpack.c.bf16 %v471_v24, %v467_v18  ;;  %v477_v33 = vld [vmem:[#allocation9 + $0x50] sm:$0xff]  ;;  %v464_v46 = vld [vmem:[#allocation2 + $0x8] sm:$0xff] }
 0x132   : > { %4334 = vmatpush1.bf16.msra.mxu1 %v4333_v47  ;;  %4208 = vmatprep.subr.bf16.mxu0 %v4207_v42  ;;  %v970_v47 = vld [vmem:[#allocation9 + $0xf70] sm:$0xff]  ;;  %v973_v42 = vld [vmem:[#allocation9 + $0xf88] sm:$0xff]  ;;  %v495_v59 = vld [vmem:[#allocation9 + $0xe0] sm:$0xff] }
 0x133   : > { %4336 = vmatprep.subr.bf16.mxu1 %v4335_v49  ;;  %v4353_v49 = vpack.c.bf16 %v970_v47, %v966_v40  ;;  %v4227_v50 = vpack.c.bf16 %v977_v43, %v973_v42  ;;  %v4369_v40 = vpack.c.bf16 %v479_v32, %v475_v31  ;;  %v487_v43 = vld [vmem:[#allocation9 + $0xa0] sm:$0xff] }
 0x134   : > { %v515_v32 = vld [vmem:[#allocation9 + $0x180] sm:$0xff] }
 0x135   : > { %4210 = vmatpush1.bf16.msra.mxu0 %v4209_v56  ;;  %v978_v56 = vld [vmem:[#allocation9 + $0xfb0] sm:$0xff] }
 0x136   : > { %4338 = vmatpush1.bf16.msra.mxu1 %v4337_v57  ;;  %4212 = vmatprep.subr.bf16.mxu0 %v4211_v58  ;;  %v981_v57 = vld [vmem:[#allocation9 + $0xfc8] sm:$0xff]  ;;  %v4357_v1 = vpack.c.bf16 %v978_v56, %v974_v54  ;;  %v498_v54 = vld [vmem:[#allocation9 + $0xf8] sm:$0xff] }
 0x137   : > { %4340 = vmatprep.subr.bf16.mxu1 %v4339_v63  ;;  %v985_v58 = vld [vmem:[#allocation9 + $0xfe8] sm:$0xff]  ;;  %v980_v63 = vld [vmem:[#allocation9 + $0xfc0] sm:$0xff] }
 0x138   : > { %v4231_v60 = vpack.c.bf16 %v985_v58, %v981_v57  ;;  %v4233_v13 = vpack.c.bf16 %v984_v0, %v980_v63  ;;  %v491_v58 = vld [vmem:[#allocation9 + $0xc0] sm:$0xff]  ;;  %v497_v63 = vld [vmem:[#allocation9 + $0xf0] sm:$0xff]  ;;  %v500_v0 = vld [vmem:[#allocation9 + $0x108] sm:$0xff] }
 0x139   : > { %4214 = vmatpush1.bf16.msra.mxu0 %v4213_v4  ;;  %v729_v4 = vld [vmem:[#allocation2 + $0x30] sm:$0x1]  ;;  %v4377_v3 = vpack.c.bf16 %v495_v59, %v491_v58  ;;  %v531_v58 = vld [vmem:[#allocation9 + $0x200] sm:$0xff] }
 0x13a   : > { %4342 = vmatpush1.bf16.msra.mxu1 %v4341_v7  ;;  %4216 = vmatprep.subr.bf16.mxu0 %v4215_v8  ;;  %v468_v7 = vld [vmem:[#allocation9 + $0x8] sm:$0xff]  ;;  %v1004_v15 = vrot.slane %v729_v4, 1  ;;  %v4505_v4 = vpack.c.bf16 %v497_v63, %v493_v61  ;;  %v535_v59 = vld [vmem:[#allocation9 + $0x220] sm:$0xff]  ;;  %v533_v61 = vld [vmem:[#allocation9 + $0x210] sm:$0xff] }
 0x13b   : > { %4344 = vmatprep.subr.bf16.mxu1 %v4343_v16  ;;  %v472_v8 = vld [vmem:[#allocation9 + $0x28] sm:$0xff]  ;;  %v4361_v16 = vpack.c.bf16 %v986_v6, %v982_v2  ;;  %v506_v2 = vld [vmem:[#allocation9 + $0x138] sm:$0xff]  ;;  %v499_v6 = vld [vmem:[#allocation9 + $0x100] sm:$0xff] }
 0x13c   : > { %v4363_v17 = vpack.c.bf16 %v472_v8, %v468_v7  ;;  %v1005_v27 = vsel %vm996_vm1, %v1003_v14, %v1004_v15  ;;  %v503_v7 = vld [vmem:[#allocation9 + $0x120] sm:$0xff]  ;;  %v501_v8 = vld [vmem:[#allocation9 + $0x110] sm:$0xff]  ;;  %v512_v14 = vld [vmem:[#allocation9 + $0x168] sm:$0xff] }
 0x13d   : > { %4218 = vmatpush1.bf16.msra.mxu0 %v4217_v22  ;;  %v476_v22 = vld [vmem:[#allocation9 + $0x48] sm:$0xff]  ;;  %v510_v15 = vld [vmem:[#allocation9 + $0x158] sm:$0xff]  ;;  %v4509_v18 = vpack.c.bf16 %v505_v10, %v501_v8  ;;  %v537_v63 = vld [vmem:[#allocation9 + $0x230] sm:$0xff] }
 0x13e   : > { %4346 = vmatpush1.bf16.msra.mxu1 %v4345_v23  ;;  %4220 = vmatprep.subr.bf16.mxu0 %v4219_v26  ;;  %v480_v23 = vld [vmem:[#allocation9 + $0x68] sm:$0xff]  ;;  %v478_v26 = vld [vmem:[#allocation9 + $0x58] sm:$0xff]  ;;  %v541_v8 = vld [vmem:[#allocation9 + $0x250] sm:$0xff] }
 0x13f   : > { %4348 = vmatprep.subr.bf16.mxu1 %v4347_v29  ;;  %v4493_v29 = vpack.c.bf16 %v473_v21, %v469_v19  ;;  %v4367_v30 = vpack.c.bf16 %v480_v23, %v476_v22  ;;  %v4495_v34 = vpack.c.bf16 %v482_v25, %v478_v26  ;;  %v507_v19 = vld [vmem:[#allocation9 + $0x140] sm:$0xff]  ;;  %v509_v21 = vld [vmem:[#allocation9 + $0x150] sm:$0xff]  ;;  %v516_v26 = vld [vmem:[#allocation9 + $0x188] sm:$0xff] }
 0x140   : > { %v513_v23 = vld [vmem:[#allocation9 + $0x170] sm:$0xff]  ;;  %v520_v25 = vld [vmem:[#allocation9 + $0x1a8] sm:$0xff] }
 0x141   : > { %4222 = vmatpush1.bf16.msra.mxu0 %v4221_v35  ;;  %v481_v35 = vld [vmem:[#allocation9 + $0x70] sm:$0xff]  ;;  %v4387_v31 = vpack.c.bf16 %v520_v25, %v516_v26  ;;  %v556_v26 = vld [vmem:[#allocation9 + $0x2c8] sm:$0xff] }
 0x142   : > { %4350 = vmatpush1.bf16.msra.mxu1 %v4349_v36  ;;  %4224 = vmatprep.subr.bf16.mxu0 %v4223_v37  ;;  %v484_v36 = vld [vmem:[#allocation9 + $0x88] sm:$0xff]  ;;  %v4497_v47 = vpack.c.bf16 %v481_v35, %v477_v33  ;;  %v519_v33 = vld [vmem:[#allocation9 + $0x1a0] sm:$0xff]  ;;  %v545_v10 = vld [vmem:[#allocation9 + $0x270] sm:$0xff] }
 0x143   : > { %4352 = vmatprep.subr.bf16.mxu1 %v4351_v41  ;;  %v488_v37 = vld [vmem:[#allocation9 + $0xa8] sm:$0xff]  ;;  %v483_v41 = vld [vmem:[#allocation9 + $0x80] sm:$0xff] }
 0x144   : > { %v4371_v42 = vpack.c.bf16 %v488_v37, %v484_v36  ;;  %v521_v36 = vld [vmem:[#allocation9 + $0x1b0] sm:$0xff]  ;;  %v524_v37 = vld [vmem:[#allocation9 + $0x1c8] sm:$0xff] }
 0x145   : > { %4226 = vmatpush1.bf16.msra.mxu0 %v4225_v48  ;;  %v4499_v48 = vpack.c.bf16 %v490_v39, %v486_v38  ;;  %v528_v38 = vld [vmem:[#allocation9 + $0x1e8] sm:$0xff]  ;;  %v526_v39 = vld [vmem:[#allocation9 + $0x1d8] sm:$0xff] }
 0x146   : > { %4354 = vmatpush1.bf16.msra.mxu1 %v4353_v49  ;;  %4228 = vmatprep.subr.bf16.mxu0 %v4227_v50  ;;  %v489_v49 = vld [vmem:[#allocation9 + $0xb0] sm:$0xff]  ;;  %v492_v50 = vld [vmem:[#allocation9 + $0xc8] sm:$0xff] }
 0x147   : > { %4356 = vmatprep.subr.bf16.mxu1 %v4355_v55  ;;  %v4373_v55 = vpack.c.bf16 %v487_v43, %v483_v41  ;;  %v4501_v56 = vpack.c.bf16 %v489_v49, %v485_v44  ;;  %v4375_v57 = vpack.c.bf16 %v496_v51, %v492_v50  ;;  %v4389_v41 = vpack.c.bf16 %v519_v33, %v515_v32  ;;  %v523_v43 = vld [vmem:[#allocation9 + $0x1c0] sm:$0xff]  ;;  %v529_v49 = vld [vmem:[#allocation9 + $0x1f0] sm:$0xff]  ;;  %v532_v50 = vld [vmem:[#allocation9 + $0x208] sm:$0xff] }
 0x148   : > { %v527_v44 = vld [vmem:[#allocation9 + $0x1e0] sm:$0xff]  ;;  %v536_v51 = vld [vmem:[#allocation9 + $0x228] sm:$0xff] }
 0x149   : > { %4230 = vmatpush1.bf16.msra.mxu0 %v4229_v62  ;;  %v4503_v62 = vpack.c.bf16 %v498_v54, %v494_v52  ;;  %v534_v52 = vld [vmem:[#allocation9 + $0x218] sm:$0xff]  ;;  %v560_v25 = vld [vmem:[#allocation9 + $0x2e8] sm:$0xff]  ;;  %v555_v32 = vld [vmem:[#allocation9 + $0x2c0] sm:$0xff] }
 0x14a   : > { %4358 = vmatpush1.bf16.msra.mxu1 %v4357_v1  ;;  %4232 = vmatprep.subr.bf16.mxu0 %v4231_v60  ;;  %v504_v1 = vld [vmem:[#allocation9 + $0x128] sm:$0xff]  ;;  %v502_v60 = vld [vmem:[#allocation9 + $0x118] sm:$0xff]  ;;  %v559_v33 = vld [vmem:[#allocation9 + $0x2e0] sm:$0xff] }
 0x14b   : > { %4360 = vmatprep.subr.bf16.mxu1 %v4359_v5  ;;  %v4379_v5 = vpack.c.bf16 %v504_v1, %v500_v0  ;;  %v4507_v9 = vpack.c.bf16 %v506_v2, %v502_v60  ;;  %v538_v54 = vld [vmem:[#allocation9 + $0x238] sm:$0xff]  ;;  %v540_v0 = vld [vmem:[#allocation9 + $0x248] sm:$0xff] }
 0x14c   : > { %v544_v1 = vld [vmem:[#allocation9 + $0x268] sm:$0xff]  ;;  %v542_v60 = vld [vmem:[#allocation9 + $0x258] sm:$0xff] }
 0x14d   : > { %4234 = vmatpush1.bf16.msra.mxu0 %v4233_v13  ;;  %v508_v13 = vld [vmem:[#allocation9 + $0x148] sm:$0xff]  ;;  %v546_v2 = vld [vmem:[#allocation9 + $0x278] sm:$0xff] }
 0x14e   : > { %4362 = vmatpush1.bf16.msra.mxu1 %v4361_v16  ;;  %4364 = vmatprep.subr.bf16.mxu0 %v4363_v17  ;;  %v514_v16 = vld [vmem:[#allocation9 + $0x178] sm:$0xff]  ;;  %v4381_v17 = vpack.c.bf16 %v503_v7, %v499_v6  ;;  %v4383_v24 = vpack.c.bf16 %v512_v14, %v508_v13  ;;  %v539_v6 = vld [vmem:[#allocation9 + $0x240] sm:$0xff]  ;;  %v548_v13 = vld [vmem:[#allocation9 + $0x288] sm:$0xff] }
 0x14f   : > { %4492 = vmatprep.subr.bf16.mxu1 %v4491_v20  ;;  %v511_v20 = vld [vmem:[#allocation9 + $0x160] sm:$0xff]  ;;  %v4511_v22 = vpack.c.bf16 %v514_v16, %v510_v15  ;;  %v552_v14 = vld [vmem:[#allocation9 + $0x2a8] sm:$0xff]  ;;  %v550_v15 = vld [vmem:[#allocation9 + $0x298] sm:$0xff] }
 0x150   : > { %1149 = vmatmul.mubr.f32.vlgmr.msra.gmra.mrb[0].mxu0 %v1005_v27  ;;  %v543_v7 = vld [vmem:[#allocation9 + $0x260] sm:$0xff]  ;;  %v554_v16 = vld [vmem:[#allocation9 + $0x2b8] sm:$0xff] }
 0x151   : > { %1291 = vmatmul.mubr.f32.vlgmr.msra.gmra.mrb[0].mxu1 %v1005_v27  ;;  %4366 = vmatpush1.bf16.msra.mxu0 %v4365_v28  ;;  %v518_v27 = vld [vmem:[#allocation9 + $0x198] sm:$0xff] }
 0x152   : > { %4494 = vmatpush1.bf16.msra.mxu1 %v4493_v29  ;;  %4368 = vmatprep.subr.bf16.mxu0 %v4367_v30  ;;  %v522_v28 = vld [vmem:[#allocation9 + $0x1b8] sm:$0xff]  ;;  %v4385_v29 = vpack.c.bf16 %v511_v20, %v507_v19  ;;  %v4513_v30 = vpack.c.bf16 %v513_v23, %v509_v21  ;;  %v547_v19 = vld [vmem:[#allocation9 + $0x280] sm:$0xff]  ;;  %v549_v21 = vld [vmem:[#allocation9 + $0x290] sm:$0xff] }
 0x153   : > { %4496 = vmatprep.subr.bf16.mxu1 %v4495_v34  ;;  %1361 = vmatprep.mubr.f32.mxu0 %v464_v46  ;;  %v517_v34 = vld [vmem:[#allocation9 + $0x190] sm:$0xff]  ;;  %v4515_v35 = vpack.c.bf16 %v522_v28, %v518_v27  ;;  %v551_v20 = vld [vmem:[#allocation9 + $0x2a0] sm:$0xff]  ;;  %v558_v27 = vld [vmem:[#allocation9 + $0x2d8] sm:$0xff] }
 0x154   : > { %1503 = vmatprep.mubr.f32.mxu1 %v464_v46  ;;  %v525_v46 = vld [vmem:[#allocation9 + $0x1d0] sm:$0xff]  ;;  %v562_v28 = vld [vmem:[#allocation9 + $0x2f8] sm:$0xff] }
 0x155   : > { %4370 = vmatpush1.bf16.msra.mxu0 %v4369_v40  ;;  %v530_v40 = vld [vmem:[#allocation9 + $0x1f8] sm:$0xff]  ;;  %v553_v23 = vld [vmem:[#allocation9 + $0x2b0] sm:$0xff] }
 0x156   : > { %4498 = vmatpush1.bf16.msra.mxu1 %v4497_v47  ;;  %4372 = vmatprep.subr.bf16.mxu0 %v4371_v42  ;;  %v4517_v47 = vpack.c.bf16 %v521_v36, %v517_v34  ;;  %v4391_v42 = vpack.c.bf16 %v528_v38, %v524_v37  ;;  %v557_v34 = vld [vmem:[#allocation9 + $0x2d0] sm:$0xff]  ;;  %v564_v37 = vld [vmem:[#allocation9 + $0x308] sm:$0xff] }
 0x157   : > { %4500 = vmatprep.subr.bf16.mxu1 %v4499_v48  ;;  %v4519_v48 = vpack.c.bf16 %v530_v40, %v526_v39  ;;  %v561_v36 = vld [vmem:[#allocation9 + $0x2f0] sm:$0xff]  ;;  %v568_v38 = vld [vmem:[#allocation9 + $0x328] sm:$0xff]  ;;  %v566_v39 = vld [vmem:[#allocation9 + $0x318] sm:$0xff] }
 0x158   : > { %v570_v40 = vld [vmem:[#allocation9 + $0x338] sm:$0xff] }
 0x159   : > { %4374 = vmatpush1.bf16.msra.mxu0 %v4373_v55  ;;  %v4393_v55 = vpack.c.bf16 %v527_v44, %v523_v43  ;;  %v563_v43 = vld [vmem:[#allocation9 + $0x300] sm:$0xff] }
 0x15a   : > { %4502 = vmatpush1.bf16.msra.mxu1 %v4501_v56  ;;  %4376 = vmatprep.subr.bf16.mxu0 %v4375_v57  ;;  %v4521_v56 = vpack.c.bf16 %v529_v49, %v525_v46  ;;  %v4395_v57 = vpack.c.bf16 %v536_v51, %v532_v50  ;;  %v567_v44 = vld [vmem:[#allocation9 + $0x320] sm:$0xff]  ;;  %v565_v46 = vld [vmem:[#allocation9 + $0x310] sm:$0xff]  ;;  %v572_v50 = vld [vmem:[#allocation9 + $0x348] sm:$0xff] }
 0x15b   : > { %4504 = vmatprep.subr.bf16.mxu1 %v4503_v62  ;;  %v4523_v62 = vpack.c.bf16 %v538_v54, %v534_v52  ;;  %v569_v49 = vld [vmem:[#allocation9 + $0x330] sm:$0xff]  ;;  %v576_v51 = vld [vmem:[#allocation9 + $0x368] sm:$0xff]  ;;  %v574_v52 = vld [vmem:[#allocation9 + $0x358] sm:$0xff] }
 0x15c   : > { %v578_v54 = vld [vmem:[#allocation9 + $0x378] sm:$0xff] }
 0x15d   : > { %4378 = vmatpush1.bf16.msra.mxu0 %v4377_v3  ;;  %v4397_v3 = vpack.c.bf16 %v535_v59, %v531_v58  ;;  %v571_v58 = vld [vmem:[#allocation9 + $0x340] sm:$0xff] }
 0x15e   : > { %4506 = vmatpush1.bf16.msra.mxu1 %v4505_v4  ;;  %4380 = vmatprep.subr.bf16.mxu0 %v4379_v5  ;;  %v4525_v4 = vpack.c.bf16 %v537_v63, %v533_v61  ;;  %v4399_v5 = vpack.c.bf16 %v544_v1, %v540_v0  ;;  %v575_v59 = vld [vmem:[#allocation9 + $0x360] sm:$0xff]  ;;  %v573_v61 = vld [vmem:[#allocation9 + $0x350] sm:$0xff]  ;;  %v580_v0 = vld [vmem:[#allocation9 + $0x388] sm:$0xff] }
 0x15f   : > { %4508 = vmatprep.subr.bf16.mxu1 %v4507_v9  ;;  %v4527_v9 = vpack.c.bf16 %v546_v2, %v542_v60  ;;  %v577_v63 = vld [vmem:[#allocation9 + $0x370] sm:$0xff]  ;;  %v584_v1 = vld [vmem:[#allocation9 + $0x3a8] sm:$0xff]  ;;  %v582_v60 = vld [vmem:[#allocation9 + $0x398] sm:$0xff] }
 0x160   : > { %v586_v2 = vld [vmem:[#allocation9 + $0x3b8] sm:$0xff] }
 0x161   : > { %4382 = vmatpush1.bf16.msra.mxu0 %v4381_v17  ;;  %v4401_v17 = vpack.c.bf16 %v543_v7, %v539_v6  ;;  %v579_v6 = vld [vmem:[#allocation9 + $0x380] sm:$0xff] }
 0x162   : > { %4510 = vmatpush1.bf16.msra.mxu1 %v4509_v18  ;;  %4384 = vmatprep.subr.bf16.mxu0 %v4383_v24  ;;  %v4529_v18 = vpack.c.bf16 %v545_v10, %v541_v8  ;;  %v4403_v24 = vpack.c.bf16 %v552_v14, %v548_v13  ;;  %v583_v7 = vld [vmem:[#allocation9 + $0x3a0] sm:$0xff]  ;;  %v581_v8 = vld [vmem:[#allocation9 + $0x390] sm:$0xff]  ;;  %v588_v13 = vld [vmem:[#allocation9 + $0x3c8] sm:$0xff] }
 0x163   : > { %4512 = vmatprep.subr.bf16.mxu1 %v4511_v22  ;;  %v4531_v22 = vpack.c.bf16 %v554_v16, %v550_v15  ;;  %v585_v10 = vld [vmem:[#allocation9 + $0x3b0] sm:$0xff]  ;;  %v592_v14 = vld [vmem:[#allocation9 + $0x3e8] sm:$0xff]  ;;  %v590_v15 = vld [vmem:[#allocation9 + $0x3d8] sm:$0xff] }
 0x164   : > { %v594_v16 = vld [vmem:[#allocation9 + $0x3f8] sm:$0xff] }
 0x165   : > { %4386 = vmatpush1.bf16.msra.mxu0 %v4385_v29  ;;  %v4405_v29 = vpack.c.bf16 %v551_v20, %v547_v19  ;;  %v587_v19 = vld [vmem:[#allocation9 + $0x3c0] sm:$0xff] }
 0x166   : > { %4514 = vmatpush1.bf16.msra.mxu1 %v4513_v30  ;;  %4388 = vmatprep.subr.bf16.mxu0 %v4387_v31  ;;  %v4533_v30 = vpack.c.bf16 %v553_v23, %v549_v21  ;;  %v4407_v31 = vpack.c.bf16 %v560_v25, %v556_v26  ;;  %v591_v20 = vld [vmem:[#allocation9 + $0x3e0] sm:$0xff]  ;;  %v589_v21 = vld [vmem:[#allocation9 + $0x3d0] sm:$0xff]  ;;  %v596_v26 = vld [vmem:[#allocation9 + $0x408] sm:$0xff] }
 0x167   : > { %4516 = vmatprep.subr.bf16.mxu1 %v4515_v35  ;;  %v4535_v35 = vpack.c.bf16 %v562_v28, %v558_v27  ;;  %v593_v23 = vld [vmem:[#allocation9 + $0x3f0] sm:$0xff]  ;;  %v600_v25 = vld [vmem:[#allocation9 + $0x428] sm:$0xff]  ;;  %v598_v27 = vld [vmem:[#allocation9 + $0x418] sm:$0xff] }
 0x168   : > { %v602_v28 = vld [vmem:[#allocation9 + $0x438] sm:$0xff] }
 0x169   : > { %4390 = vmatpush1.bf16.msra.mxu0 %v4389_v41  ;;  %v4409_v41 = vpack.c.bf16 %v559_v33, %v555_v32  ;;  %v595_v32 = vld [vmem:[#allocation9 + $0x400] sm:$0xff] }
 0x16a   : > { %4518 = vmatpush1.bf16.msra.mxu1 %v4517_v47  ;;  %4392 = vmatprep.subr.bf16.mxu0 %v4391_v42  ;;  %v4537_v47 = vpack.c.bf16 %v561_v36, %v557_v34  ;;  %v4411_v42 = vpack.c.bf16 %v568_v38, %v564_v37  ;;  %v599_v33 = vld [vmem:[#allocation9 + $0x420] sm:$0xff]  ;;  %v597_v34 = vld [vmem:[#allocation9 + $0x410] sm:$0xff]  ;;  %v604_v37 = vld [vmem:[#allocation9 + $0x448] sm:$0xff] }
 0x16b   : > { %4520 = vmatprep.subr.bf16.mxu1 %v4519_v48  ;;  %v4539_v48 = vpack.c.bf16 %v570_v40, %v566_v39  ;;  %v601_v36 = vld [vmem:[#allocation9 + $0x430] sm:$0xff]  ;;  %v608_v38 = vld [vmem:[#allocation9 + $0x468] sm:$0xff]  ;;  %v606_v39 = vld [vmem:[#allocation9 + $0x458] sm:$0xff] }
 0x16c   : > { %v610_v40 = vld [vmem:[#allocation9 + $0x478] sm:$0xff] }
 0x16d   : > { %4394 = vmatpush1.bf16.msra.mxu0 %v4393_v55  ;;  %v4413_v55 = vpack.c.bf16 %v567_v44, %v563_v43  ;;  %v4431_v43 = vpack.c.bf16 %v608_v38, %v604_v37  ;;  %v603_v44 = vld [vmem:[#allocation9 + $0x440] sm:$0xff]  ;;  %v641_v38 = vld [vmem:[#allocation9 + $0x570] sm:$0xff] }
 0x16e   : > { %4522 = vmatpush1.bf16.msra.mxu1 %v4521_v56  ;;  %4396 = vmatprep.subr.bf16.mxu0 %v4395_v57  ;;  %v4541_v56 = vpack.c.bf16 %v569_v49, %v565_v46  ;;  %v4415_v57 = vpack.c.bf16 %v576_v51, %v572_v50  ;;  %v607_v46 = vld [vmem:[#allocation9 + $0x460] sm:$0xff]  ;;  %v4559_v49 = vpack.c.bf16 %v610_v40, %v606_v39  ;;  %v609_v50 = vld [vmem:[#allocation9 + $0x470] sm:$0xff]  ;;  %v612_v51 = vld [vmem:[#allocation9 + $0x488] sm:$0xff] }
 0x16f   : > { %4524 = vmatprep.subr.bf16.mxu1 %v4523_v62  ;;  %v4543_v62 = vpack.c.bf16 %v578_v54, %v574_v52  ;;  %v616_v52 = vld [vmem:[#allocation9 + $0x4a8] sm:$0xff]  ;;  %v614_v54 = vld [vmem:[#allocation9 + $0x498] sm:$0xff] }
 0x170   : > { %v644_v39 = vld [vmem:[#allocation9 + $0x588] sm:$0xff] }
 0x171   : > { %4398 = vmatpush1.bf16.msra.mxu0 %v4397_v3  ;;  %v4417_v3 = vpack.c.bf16 %v575_v59, %v571_v58  ;;  %v4435_v59 = vpack.c.bf16 %v616_v52, %v612_v51  ;;  %v648_v40 = vld [vmem:[#allocation9 + $0x5a8] sm:$0xff]  ;;  %v649_v51 = vld [vmem:[#allocation9 + $0x5b0] sm:$0xff] }
 0x172   : > { %4526 = vmatpush1.bf16.msra.mxu1 %v4525_v4  ;;  %4400 = vmatprep.subr.bf16.mxu0 %v4399_v5  ;;  %v4545_v4 = vpack.c.bf16 %v577_v63, %v573_v61  ;;  %v4419_v5 = vpack.c.bf16 %v584_v1, %v580_v0  ;;  %v611_v61 = vld [vmem:[#allocation9 + $0x480] sm:$0xff]  ;;  %v613_v63 = vld [vmem:[#allocation9 + $0x490] sm:$0xff]  ;;  %v652_v52 = vld [vmem:[#allocation9 + $0x5c8] sm:$0xff] }
 0x173   : > { %4528 = vmatprep.subr.bf16.mxu1 %v4527_v9  ;;  %v4547_v9 = vpack.c.bf16 %v586_v2, %v582_v60  ;;  %v617_v1 = vld [vmem:[#allocation9 + $0x4b0] sm:$0xff]  ;;  %v620_v60 = vld [vmem:[#allocation9 + $0x4c8] sm:$0xff] }
 0x174   : > { %v624_v2 = vld [vmem:[#allocation9 + $0x4e8] sm:$0xff] }
 0x175   : > { %4402 = vmatpush1.bf16.msra.mxu0 %v4401_v17  ;;  %v4421_v17 = vpack.c.bf16 %v583_v7, %v579_v6  ;;  %v4565_v6 = vpack.c.bf16 %v617_v1, %v613_v63  ;;  %v4439_v7 = vpack.c.bf16 %v624_v2, %v620_v60  ;;  %v653_v63 = vld [vmem:[#allocation9 + $0x5d0] sm:$0xff]  ;;  %v660_v60 = vld [vmem:[#allocation9 + $0x608] sm:$0xff] }
 0x176   : > { %4530 = vmatpush1.bf16.msra.mxu1 %v4529_v18  ;;  %4404 = vmatprep.subr.bf16.mxu0 %v4403_v24  ;;  %v4549_v18 = vpack.c.bf16 %v585_v10, %v581_v8  ;;  %v4423_v24 = vpack.c.bf16 %v592_v14, %v588_v13  ;;  %v619_v8 = vld [vmem:[#allocation9 + $0x4c0] sm:$0xff]  ;;  %v621_v10 = vld [vmem:[#allocation9 + $0x4d0] sm:$0xff]  ;;  %v664_v2 = vld [vmem:[#allocation9 + $0x628] sm:$0xff] }
 0x177   : > { %4532 = vmatprep.subr.bf16.mxu1 %v4531_v22  ;;  %v4551_v22 = vpack.c.bf16 %v594_v16, %v590_v15  ;;  %v625_v14 = vld [vmem:[#allocation9 + $0x4f0] sm:$0xff]  ;;  %v628_v15 = vld [vmem:[#allocation9 + $0x508] sm:$0xff] }
 0x178   : > { %v632_v16 = vld [vmem:[#allocation9 + $0x528] sm:$0xff]  ;;  %v657_v1 = vld [vmem:[#allocation9 + $0x5f0] sm:$0xff] }
 0x179   : > { %4406 = vmatpush1.bf16.msra.mxu0 %v4405_v29  ;;  %v4425_v29 = vpack.c.bf16 %v591_v20, %v587_v19  ;;  %v4569_v19 = vpack.c.bf16 %v625_v14, %v621_v10  ;;  %v4443_v20 = vpack.c.bf16 %v632_v16, %v628_v15  ;;  %v661_v10 = vld [vmem:[#allocation9 + $0x610] sm:$0xff]  ;;  %v668_v15 = vld [vmem:[#allocation9 + $0x648] sm:$0xff] }
 0x17a   : > { %4534 = vmatpush1.bf16.msra.mxu1 %v4533_v30  ;;  %4408 = vmatprep.subr.bf16.mxu0 %v4407_v31  ;;  %v4553_v30 = vpack.c.bf16 %v593_v23, %v589_v21  ;;  %v4427_v31 = vpack.c.bf16 %v600_v25, %v596_v26  ;;  %v627_v21 = vld [vmem:[#allocation9 + $0x500] sm:$0xff]  ;;  %v629_v23 = vld [vmem:[#allocation9 + $0x510] sm:$0xff]  ;;  %v672_v16 = vld [vmem:[#allocation9 + $0x668] sm:$0xff] }
 0x17b   : > { %4536 = vmatprep.subr.bf16.mxu1 %v4535_v35  ;;  %v4555_v35 = vpack.c.bf16 %v602_v28, %v598_v27  ;;  %v633_v25 = vld [vmem:[#allocation9 + $0x530] sm:$0xff]  ;;  %v636_v27 = vld [vmem:[#allocation9 + $0x548] sm:$0xff] }
 0x17c   : > { %v640_v28 = vld [vmem:[#allocation9 + $0x568] sm:$0xff]  ;;  %v665_v14 = vld [vmem:[#allocation9 + $0x630] sm:$0xff] }
 0x17d   : > { %4410 = vmatpush1.bf16.msra.mxu0 %v4409_v41  ;;  %v463_v41 = vld [vmem:[#allocation2] sm:$0xff] }
 0x17e   : > { %4538 = vmatpush1.bf16.msra.mxu1 %v4537_v47  ;;  %4412 = vmatprep.subr.bf16.mxu0 %v4411_v42  ;;  %v4429_v47 = vpack.c.bf16 %v599_v33, %v595_v32  ;;  %v4557_v42 = vpack.c.bf16 %v601_v36, %v597_v34  ;;  %v4573_v32 = vpack.c.bf16 %v633_v25, %v629_v23  ;;  %v635_v34 = vld [vmem:[#allocation9 + $0x540] sm:$0xff]  ;;  %v637_v36 = vld [vmem:[#allocation9 + $0x550] sm:$0xff] }
 0x17f   : > { %4540 = vmatprep.subr.bf16.mxu1 %v4539_v48  ;;  %v605_v48 = vld [vmem:[#allocation9 + $0x450] sm:$0xff]  ;;  %v4447_v33 = vpack.c.bf16 %v640_v28, %v636_v27  ;;  %v676_v27 = vld [vmem:[#allocation9 + $0x688] sm:$0xff] }
 0x180   : > { %v4561_v58 = vpack.c.bf16 %v609_v50, %v605_v48  ;;  %v647_v48 = vld [vmem:[#allocation9 + $0x5a0] sm:$0xff]  ;;  %v669_v23 = vld [vmem:[#allocation9 + $0x650] sm:$0xff]  ;;  %v680_v28 = vld [vmem:[#allocation9 + $0x6a8] sm:$0xff] }
 0x181   : > { %4414 = vmatpush1.bf16.msra.mxu0 %v4413_v55  ;;  %v618_v55 = vld [vmem:[#allocation9 + $0x4b8] sm:$0xff]  ;;  %v673_v25 = vld [vmem:[#allocation9 + $0x670] sm:$0xff] }
 0x182   : > { %4542 = vmatpush1.bf16.msra.mxu1 %v4541_v56  ;;  %4416 = vmatprep.subr.bf16.mxu0 %v4415_v57  ;;  %v466_v56 = vld [vmem:[#allocation2 + $0x18] sm:$0xff]  ;;  %v4433_v57 = vpack.c.bf16 %v607_v46, %v603_v44  ;;  %v4563_v0 = vpack.c.bf16 %v618_v55, %v614_v54  ;;  %v4451_v44 = vpack.c.bf16 %v648_v40, %v644_v39  ;;  %v643_v46 = vld [vmem:[#allocation9 + $0x580] sm:$0xff]  ;;  %v656_v54 = vld [vmem:[#allocation9 + $0x5e8] sm:$0xff] }
 0x183   : > { %4544 = vmatprep.subr.bf16.mxu1 %v4543_v62  ;;  %v615_v62 = vld [vmem:[#allocation9 + $0x4a0] sm:$0xff]  ;;  %v654_v55 = vld [vmem:[#allocation9 + $0x5d8] sm:$0xff]  ;;  %v684_v39 = vld [vmem:[#allocation9 + $0x6c8] sm:$0xff] }
 0x184   : > { %v688_v40 = vld [vmem:[#allocation9 + $0x6e8] sm:$0xff] }
 0x185   : > { %4418 = vmatpush1.bf16.msra.mxu0 %v4417_v3  ;;  %v622_v3 = vld [vmem:[#allocation9 + $0x4d8] sm:$0xff] }
 0x186   : > { %4546 = vmatpush1.bf16.msra.mxu1 %v4545_v4  ;;  %4420 = vmatprep.subr.bf16.mxu0 %v4419_v5  ;;  %v626_v4 = vld [vmem:[#allocation9 + $0x4f8] sm:$0xff]  ;;  %v4437_v5 = vpack.c.bf16 %v615_v62, %v611_v61  ;;  %v651_v61 = vld [vmem:[#allocation9 + $0x5c0] sm:$0xff] }
 0x187   : > { %4548 = vmatprep.subr.bf16.mxu1 %v4547_v9  ;;  %v623_v9 = vld [vmem:[#allocation9 + $0x4e0] sm:$0xff]  ;;  %v4567_v13 = vpack.c.bf16 %v626_v4, %v622_v3  ;;  %v662_v3 = vld [vmem:[#allocation9 + $0x618] sm:$0xff] }
 0x188   : > { %v655_v62 = vld [vmem:[#allocation9 + $0x5e0] sm:$0xff]  ;;  %v666_v4 = vld [vmem:[#allocation9 + $0x638] sm:$0xff] }
 0x189   : > { %4422 = vmatpush1.bf16.msra.mxu0 %v4421_v17  ;;  %v630_v17 = vld [vmem:[#allocation9 + $0x518] sm:$0xff] }
 0x18a   : > { %4550 = vmatpush1.bf16.msra.mxu1 %v4549_v18  ;;  %4424 = vmatprep.subr.bf16.mxu0 %v4423_v24  ;;  %v634_v18 = vld [vmem:[#allocation9 + $0x538] sm:$0xff]  ;;  %v4441_v24 = vpack.c.bf16 %v623_v9, %v619_v8  ;;  %v659_v8 = vld [vmem:[#allocation9 + $0x600] sm:$0xff] }
 0x18b   : > { %4552 = vmatprep.subr.bf16.mxu1 %v4551_v22  ;;  %v631_v22 = vld [vmem:[#allocation9 + $0x520] sm:$0xff]  ;;  %v4571_v26 = vpack.c.bf16 %v634_v18, %v630_v17  ;;  %v670_v17 = vld [vmem:[#allocation9 + $0x658] sm:$0xff] }
 0x18c   : > { %v663_v9 = vld [vmem:[#allocation9 + $0x620] sm:$0xff]  ;;  %v674_v18 = vld [vmem:[#allocation9 + $0x678] sm:$0xff] }
 0x18d   : > { %4426 = vmatpush1.bf16.msra.mxu0 %v4425_v29  ;;  %v638_v29 = vld [vmem:[#allocation9 + $0x558] sm:$0xff] }
 0x18e   : > { %4554 = vmatpush1.bf16.msra.mxu1 %v4553_v30  ;;  %4428 = vmatprep.subr.bf16.mxu0 %v4427_v31  ;;  %v642_v30 = vld [vmem:[#allocation9 + $0x578] sm:$0xff]  ;;  %v4445_v31 = vpack.c.bf16 %v631_v22, %v627_v21  ;;  %v667_v21 = vld [vmem:[#allocation9 + $0x640] sm:$0xff] }
 0x18f   : > { %4556 = vmatprep.subr.bf16.mxu1 %v4555_v35  ;;  %v639_v35 = vld [vmem:[#allocation9 + $0x560] sm:$0xff]  ;;  %v4575_v37 = vpack.c.bf16 %v642_v30, %v638_v29  ;;  %v678_v29 = vld [vmem:[#allocation9 + $0x698] sm:$0xff] }
 0x190   : > { %1362 = vmatmul.mubr.f32.vlgmr.msra.gmra.mrb[0].mxu0 %v463_v41  ;;  %v671_v22 = vld [vmem:[#allocation9 + $0x660] sm:$0xff]  ;;  %v682_v30 = vld [vmem:[#allocation9 + $0x6b8] sm:$0xff] }
 0x191   : > { %4430 = vmatpush1.bf16.msra.mxu0 %v4429_v47  ;;  %1504 = vmatmul.mubr.f32.vlgmr.msra.gmra.mrb[0].mxu1 %v463_v41  ;;  %v646_v41 = vld [vmem:[#allocation9 + $0x598] sm:$0xff] }
 0x192   : > { %4558 = vmatpush1.bf16.msra.mxu1 %v4557_v42  ;;  %4432 = vmatprep.subr.bf16.mxu0 %v4431_v43  ;;  %v650_v47 = vld [vmem:[#allocation9 + $0x5b8] sm:$0xff]  ;;  %v4449_v42 = vpack.c.bf16 %v639_v35, %v635_v34  ;;  %v4577_v43 = vpack.c.bf16 %v641_v38, %v637_v36  ;;  %v675_v34 = vld [vmem:[#allocation9 + $0x680] sm:$0xff]  ;;  %v677_v36 = vld [vmem:[#allocation9 + $0x690] sm:$0xff] }
 0x193   : > { %4560 = vmatprep.subr.bf16.mxu1 %v4559_v49  ;;  %1432 = vmatprep.mubr.f32.mxu0 %v466_v56  ;;  %v645_v49 = vld [vmem:[#allocation9 + $0x590] sm:$0xff]  ;;  %v4579_v50 = vpack.c.bf16 %v650_v47, %v646_v41  ;;  %v679_v35 = vld [vmem:[#allocation9 + $0x6a0] sm:$0xff]  ;;  %v686_v41 = vld [vmem:[#allocation9 + $0x6d8] sm:$0xff] }
 0x194   : > { %1574 = vmatprep.mubr.f32.mxu1 %v466_v56  ;;  %v658_v56 = vld [vmem:[#allocation9 + $0x5f8] sm:$0xff]  ;;  %v681_v38 = vld [vmem:[#allocation9 + $0x6b0] sm:$0xff] }
 0x195   : > { %4434 = vmatpush1.bf16.msra.mxu0 %v4433_v57  ;;  %v4453_v57 = vpack.c.bf16 %v647_v48, %v643_v46  ;;  %v690_v47 = vld [vmem:[#allocation9 + $0x6f8] sm:$0xff]  ;;  %v683_v46 = vld [vmem:[#allocation9 + $0x6c0] sm:$0xff] }
 0x196   : > { %4562 = vmatpush1.bf16.msra.mxu1 %v4561_v58  ;;  %4436 = vmatprep.subr.bf16.mxu0 %v4435_v59  ;;  %v4581_v58 = vpack.c.bf16 %v649_v51, %v645_v49  ;;  %v4455_v59 = vpack.c.bf16 %v656_v54, %v652_v52  ;;  %v687_v48 = vld [vmem:[#allocation9 + $0x6e0] sm:$0xff]  ;;  %v685_v49 = vld [vmem:[#allocation9 + $0x6d0] sm:$0xff]  ;;  %v692_v52 = vld [vmem:[#allocation9 + $0x708] sm:$0xff] }
 0x197   : > { %4564 = vmatprep.subr.bf16.mxu1 %v4563_v0  ;;  %v4583_v0 = vpack.c.bf16 %v658_v56, %v654_v55  ;;  %v689_v51 = vld [vmem:[#allocation9 + $0x6f0] sm:$0xff]  ;;  %v696_v54 = vld [vmem:[#allocation9 + $0x728] sm:$0xff]  ;;  %v694_v55 = vld [vmem:[#allocation9 + $0x718] sm:$0xff] }
 0x198   : > { %v698_v56 = vld [vmem:[#allocation9 + $0x738] sm:$0xff] }
 0x199   : > { %4438 = vmatpush1.bf16.msra.mxu0 %v4437_v5  ;;  %v4457_v5 = vpack.c.bf16 %v655_v62, %v651_v61  ;;  %v691_v61 = vld [vmem:[#allocation9 + $0x700] sm:$0xff] }
 0x19a   : > { %4566 = vmatpush1.bf16.msra.mxu1 %v4565_v6  ;;  %4440 = vmatprep.subr.bf16.mxu0 %v4439_v7  ;;  %v4585_v6 = vpack.c.bf16 %v657_v1, %v653_v63  ;;  %v4459_v7 = vpack.c.bf16 %v664_v2, %v660_v60  ;;  %v695_v62 = vld [vmem:[#allocation9 + $0x720] sm:$0xff]  ;;  %v693_v63 = vld [vmem:[#allocation9 + $0x710] sm:$0xff]  ;;  %v700_v60 = vld [vmem:[#allocation9 + $0x748] sm:$0xff] }
 0x19b   : > { %4568 = vmatprep.subr.bf16.mxu1 %v4567_v13  ;;  %v4587_v13 = vpack.c.bf16 %v666_v4, %v662_v3  ;;  %v697_v1 = vld [vmem:[#allocation9 + $0x730] sm:$0xff]  ;;  %v704_v2 = vld [vmem:[#allocation9 + $0x768] sm:$0xff]  ;;  %v702_v3 = vld [vmem:[#allocation9 + $0x758] sm:$0xff] }
 0x19c   : > { %v706_v4 = vld [vmem:[#allocation9 + $0x778] sm:$0xff] }
 0x19d   : > { %4442 = vmatpush1.bf16.msra.mxu0 %v4441_v24  ;;  %v4461_v24 = vpack.c.bf16 %v663_v9, %v659_v8  ;;  %v699_v8 = vld [vmem:[#allocation9 + $0x740] sm:$0xff] }
 0x19e   : > { %4570 = vmatpush1.bf16.msra.mxu1 %v4569_v19  ;;  %4444 = vmatprep.subr.bf16.mxu0 %v4443_v20  ;;  %v4589_v19 = vpack.c.bf16 %v665_v14, %v661_v10  ;;  %v4463_v20 = vpack.c.bf16 %v672_v16, %v668_v15  ;;  %v703_v9 = vld [vmem:[#allocation9 + $0x760] sm:$0xff]  ;;  %v701_v10 = vld [vmem:[#allocation9 + $0x750] sm:$0xff]  ;;  %v708_v15 = vld [vmem:[#allocation9 + $0x788] sm:$0xff] }
 0x19f   : > { %4572 = vmatprep.subr.bf16.mxu1 %v4571_v26  ;;  %v4591_v26 = vpack.c.bf16 %v674_v18, %v670_v17  ;;  %v705_v14 = vld [vmem:[#allocation9 + $0x770] sm:$0xff]  ;;  %v712_v16 = vld [vmem:[#allocation9 + $0x7a8] sm:$0xff]  ;;  %v710_v17 = vld [vmem:[#allocation9 + $0x798] sm:$0xff] }
 0x1a0   : > { %v714_v18 = vld [vmem:[#allocation9 + $0x7b8] sm:$0xff] }
 0x1a1   : > { %4446 = vmatpush1.bf16.msra.mxu0 %v4445_v31  ;;  %v4465_v31 = vpack.c.bf16 %v671_v22, %v667_v21  ;;  %v707_v21 = vld [vmem:[#allocation9 + $0x780] sm:$0xff] }
 0x1a2   : > { %4574 = vmatpush1.bf16.msra.mxu1 %v4573_v32  ;;  %4448 = vmatprep.subr.bf16.mxu0 %v4447_v33  ;;  %v4593_v32 = vpack.c.bf16 %v673_v25, %v669_v23  ;;  %v4467_v33 = vpack.c.bf16 %v680_v28, %v676_v27  ;;  %v711_v22 = vld [vmem:[#allocation9 + $0x7a0] sm:$0xff]  ;;  %v709_v23 = vld [vmem:[#allocation9 + $0x790] sm:$0xff]  ;;  %v716_v27 = vld [vmem:[#allocation9 + $0x7c8] sm:$0xff] }
 0x1a3   : > { %4576 = vmatprep.subr.bf16.mxu1 %v4575_v37  ;;  %v4595_v37 = vpack.c.bf16 %v682_v30, %v678_v29  ;;  %v713_v25 = vld [vmem:[#allocation9 + $0x7b0] sm:$0xff]  ;;  %v720_v28 = vld [vmem:[#allocation9 + $0x7e8] sm:$0xff]  ;;  %v718_v29 = vld [vmem:[#allocation9 + $0x7d8] sm:$0xff] }
 0x1a4   : > { %v722_v30 = vld [vmem:[#allocation9 + $0x7f8] sm:$0xff] }
 0x1a5   : > { %4450 = vmatpush1.bf16.msra.mxu0 %v4449_v42  ;;  %v4469_v42 = vpack.c.bf16 %v679_v35, %v675_v34  ;;  %v715_v34 = vld [vmem:[#allocation9 + $0x7c0] sm:$0xff] }
 0x1a6   : > { %4578 = vmatpush1.bf16.msra.mxu1 %v4577_v43  ;;  %4452 = vmatprep.subr.bf16.mxu0 %v4451_v44  ;;  %v4597_v43 = vpack.c.bf16 %v681_v38, %v677_v36  ;;  %v4471_v44 = vpack.c.bf16 %v688_v40, %v684_v39  ;;  %v719_v35 = vld [vmem:[#allocation9 + $0x7e0] sm:$0xff]  ;;  %v717_v36 = vld [vmem:[#allocation9 + $0x7d0] sm:$0xff]  ;;  %v1591_v39 = vld [vmem:[#allocation9 + $0x1008] sm:$0xff] }
 0x1a7   : > { %4580 = vmatprep.subr.bf16.mxu1 %v4579_v50  ;;  %v4599_v50 = vpack.c.bf16 %v690_v47, %v686_v41  ;;  %v721_v38 = vld [vmem:[#allocation9 + $0x7f0] sm:$0xff]  ;;  %v1595_v40 = vld [vmem:[#allocation9 + $0x1028] sm:$0xff]  ;;  %v1593_v41 = vld [vmem:[#allocation9 + $0x1018] sm:$0xff] }
 0x1a8   : > { %v1597_v47 = vld [vmem:[#allocation9 + $0x1038] sm:$0xff] }
 0x1a9   : > { %4454 = vmatpush1.bf16.msra.mxu0 %v4453_v57  ;;  %v4473_v57 = vpack.c.bf16 %v687_v48, %v683_v46  ;;  %v4617_v46 = vpack.c.bf16 %v721_v38, %v717_v36  ;;  %v4619_v48 = vpack.c.bf16 %v1595_v40, %v1591_v39  ;;  %v1629_v36 = vld [vmem:[#allocation9 + $0x1138] sm:$0xff]  ;;  %v1622_v40 = vld [vmem:[#allocation9 + $0x1100] sm:$0xff] }
 0x1aa   : > { %4582 = vmatpush1.bf16.msra.mxu1 %v4581_v58  ;;  %4456 = vmatprep.subr.bf16.mxu0 %v4455_v59  ;;  %v4601_v58 = vpack.c.bf16 %v689_v51, %v685_v49  ;;  %v4475_v59 = vpack.c.bf16 %v696_v54, %v692_v52  ;;  %v1590_v49 = vld [vmem:[#allocation9 + $0x1000] sm:$0xff]  ;;  %v1592_v51 = vld [vmem:[#allocation9 + $0x1010] sm:$0xff]  ;;  %v4747_v52 = vpack.c.bf16 %v1597_v47, %v1593_v41 }
 0x1ab   : > { %4584 = vmatprep.subr.bf16.mxu1 %v4583_v0  ;;  %v4603_v0 = vpack.c.bf16 %v698_v56, %v694_v55  ;;  %v1596_v54 = vld [vmem:[#allocation9 + $0x1030] sm:$0xff]  ;;  %v1599_v55 = vld [vmem:[#allocation9 + $0x1048] sm:$0xff]  ;;  %v1626_v41 = vld [vmem:[#allocation9 + $0x1120] sm:$0xff] }
 0x1ac   : > { %v1603_v56 = vld [vmem:[#allocation9 + $0x1068] sm:$0xff]  ;;  %v1624_v47 = vld [vmem:[#allocation9 + $0x1110] sm:$0xff] }
 0x1ad   : > { %4458 = vmatpush1.bf16.msra.mxu0 %v4457_v5  ;;  %v4477_v5 = vpack.c.bf16 %v695_v62, %v691_v61  ;;  %v465_v62 = vld [vmem:[#allocation2 + $0x10] sm:$0xff] }
 0x1ae   : > { %4586 = vmatpush1.bf16.msra.mxu1 %v4585_v6  ;;  %4460 = vmatprep.subr.bf16.mxu0 %v4459_v7  ;;  %v4605_v6 = vpack.c.bf16 %v697_v1, %v693_v63  ;;  %v4479_v7 = vpack.c.bf16 %v704_v2, %v700_v60  ;;  %v4623_v1 = vpack.c.bf16 %v1603_v56, %v1599_v55  ;;  %v1598_v60 = vld [vmem:[#allocation9 + $0x1040] sm:$0xff]  ;;  %v1632_v56 = vld [vmem:[#allocation9 + $0x1150] sm:$0xff] }
 0x1af   : > { %4588 = vmatprep.subr.bf16.mxu1 %v4587_v13  ;;  %v4607_v13 = vpack.c.bf16 %v706_v4, %v702_v3  ;;  %v1602_v2 = vld [vmem:[#allocation9 + $0x1060] sm:$0xff]  ;;  %v1600_v3 = vld [vmem:[#allocation9 + $0x1050] sm:$0xff] }
 0x1b0   : > { %v1634_v55 = vld [vmem:[#allocation9 + $0x1160] sm:$0xff] }
 0x1b1   : > { %4462 = vmatpush1.bf16.msra.mxu0 %v4461_v24  ;;  %v4481_v24 = vpack.c.bf16 %v703_v9, %v699_v8  ;;  %v1609_v8 = vld [vmem:[#allocation9 + $0x1098] sm:$0xff] }
 0x1b2   : > { %4590 = vmatpush1.bf16.msra.mxu1 %v4589_v19  ;;  %4464 = vmatprep.subr.bf16.mxu0 %v4463_v20  ;;  %v4609_v19 = vpack.c.bf16 %v705_v14, %v701_v10  ;;  %v4483_v20 = vpack.c.bf16 %v712_v16, %v708_v15  ;;  %v1613_v9 = vld [vmem:[#allocation9 + $0x10b8] sm:$0xff]  ;;  %v1606_v16 = vld [vmem:[#allocation9 + $0x1080] sm:$0xff] }
 0x1b3   : > { %4592 = vmatprep.subr.bf16.mxu1 %v4591_v26  ;;  %v4611_v26 = vpack.c.bf16 %v714_v18, %v710_v17  ;;  %v1610_v17 = vld [vmem:[#allocation9 + $0x10a0] sm:$0xff]  ;;  %v1608_v18 = vld [vmem:[#allocation9 + $0x1090] sm:$0xff] }
 0x1b5   : > { %4466 = vmatpush1.bf16.msra.mxu0 %v4465_v31  ;;  %v4485_v31 = vpack.c.bf16 %v711_v22, %v707_v21  ;;  %v1619_v21 = vld [vmem:[#allocation9 + $0x10e8] sm:$0xff]  ;;  %v1617_v22 = vld [vmem:[#allocation9 + $0x10d8] sm:$0xff] }
 0x1b6   : > { %4594 = vmatpush1.bf16.msra.mxu1 %v4593_v32  ;;  %4468 = vmatprep.subr.bf16.mxu0 %v4467_v33  ;;  %v4613_v32 = vpack.c.bf16 %v713_v25, %v709_v23  ;;  %v4487_v33 = vpack.c.bf16 %v720_v28, %v716_v27  ;;  %v1621_v23 = vld [vmem:[#allocation9 + $0x10f8] sm:$0xff]  ;;  %v1614_v28 = vld [vmem:[#allocation9 + $0x10c0] sm:$0xff] }
 0x1b7   : > { %4596 = vmatprep.subr.bf16.mxu1 %v4595_v37  ;;  %v4615_v37 = vpack.c.bf16 %v722_v30, %v718_v29  ;;  %v1618_v29 = vld [vmem:[#allocation9 + $0x10e0] sm:$0xff]  ;;  %v1616_v30 = vld [vmem:[#allocation9 + $0x10d0] sm:$0xff] }
 0x1b9   : > { %4470 = vmatpush1.bf16.msra.mxu0 %v4469_v42  ;;  %v4489_v42 = vpack.c.bf16 %v719_v35, %v715_v34  ;;  %v1627_v34 = vld [vmem:[#allocation9 + $0x1128] sm:$0xff]  ;;  %v1625_v35 = vld [vmem:[#allocation9 + $0x1118] sm:$0xff] }
 0x1ba   : > { %4598 = vmatpush1.bf16.msra.mxu1 %v4597_v43  ;;  %4472 = vmatprep.subr.bf16.mxu0 %v4471_v44  ;;  %v1582_v43 = vld [vmem:[#allocation2 + $0x8] sm:$0xfc]  ;;  %v1586_v44 = vld [vmem:[#allocation2 + $0x28] sm:$0x3] }
 0x1bb   : > { %4600 = vmatprep.subr.bf16.mxu1 %v4599_v50  ;;  %v1594_v50 = vld [vmem:[#allocation9 + $0x1020] sm:$0xff]  ;;  %v1859_v61 = vrot.slane %v1586_v44, 2  ;;  %v1631_v44 = vld [vmem:[#allocation9 + $0x1148] sm:$0xff] }
 0x1bc   : > { %v4621_v63 = vpack.c.bf16 %v1594_v50, %v1590_v49  ;;  %v1637_v49 = vld [vmem:[#allocation9 + $0x1178] sm:$0xff]  ;;  %v4637_v50 = vpack.c.bf16 %v1626_v41, %v1622_v40  ;;  %v1662_v40 = vld [vmem:[#allocation9 + $0x1240] sm:$0xff] }
 0x1bd   : > { %4474 = vmatpush1.bf16.msra.mxu0 %v4473_v57  ;;  %v1601_v57 = vld [vmem:[#allocation9 + $0x1058] sm:$0xff]  ;;  %v1666_v41 = vld [vmem:[#allocation9 + $0x1260] sm:$0xff] }
 0x1be   : > { %4602 = vmatpush1.bf16.msra.mxu1 %v4601_v58  ;;  %4476 = vmatprep.subr.bf16.mxu0 %v4475_v59  ;;  %v1605_v58 = vld [vmem:[#allocation9 + $0x1078] sm:$0xff]  ;;  %v1858_v59 = vrot.slane %v1582_v43, 2  ;;  %v1628_v43 = vld [vmem:[#allocation9 + $0x1130] sm:$0xff] }
 0x1bf   : > { %4604 = vmatprep.subr.bf16.mxu1 %v4603_v0  ;;  %v4749_v0 = vpack.c.bf16 %v1596_v54, %v1592_v51  ;;  %v4751_v4 = vpack.c.bf16 %v1605_v58, %v1601_v57  ;;  %v4765_v51 = vpack.c.bf16 %v1628_v43, %v1624_v47  ;;  %v1630_v54 = vld [vmem:[#allocation9 + $0x1140] sm:$0xff]  ;;  %v1636_v58 = vld [vmem:[#allocation9 + $0x1170] sm:$0xff] }
 0x1c0   : > { %v1860_v10 = vsel %vm1854_vm2, %v1858_v59, %v1859_v61  ;;  %v1639_v59 = vld [vmem:[#allocation9 + $0x1188] sm:$0xff]  ;;  %v1664_v47 = vld [vmem:[#allocation9 + $0x1250] sm:$0xff] }
 0x1c1   : > { %4478 = vmatpush1.bf16.msra.mxu0 %v4477_v5  ;;  %v1604_v5 = vld [vmem:[#allocation9 + $0x1070] sm:$0xff]  ;;  %v1643_v61 = vld [vmem:[#allocation9 + $0x11a8] sm:$0xff] }
 0x1c2   : > { %4606 = vmatpush1.bf16.msra.mxu1 %v4605_v6  ;;  %4480 = vmatprep.subr.bf16.mxu0 %v4479_v7  ;;  %v1607_v6 = vld [vmem:[#allocation9 + $0x1088] sm:$0xff]  ;;  %v4753_v14 = vpack.c.bf16 %v1604_v5, %v1600_v3  ;;  %v1642_v3 = vld [vmem:[#allocation9 + $0x11a0] sm:$0xff]  ;;  %v1668_v43 = vld [vmem:[#allocation9 + $0x1270] sm:$0xff] }
 0x1c3   : > { %4608 = vmatprep.subr.bf16.mxu1 %v4607_v13  ;;  %v1611_v7 = vld [vmem:[#allocation9 + $0x10a8] sm:$0xff]  ;;  %v4625_v13 = vpack.c.bf16 %v1602_v2, %v1598_v60  ;;  %v4643_v60 = vpack.c.bf16 %v1643_v61, %v1639_v59  ;;  %v1638_v2 = vld [vmem:[#allocation9 + $0x1180] sm:$0xff] }
 0x1c4   : > { %v4627_v15 = vpack.c.bf16 %v1611_v7, %v1607_v6  ;;  %v1644_v6 = vld [vmem:[#allocation9 + $0x11b0] sm:$0xff]  ;;  %v1647_v7 = vld [vmem:[#allocation9 + $0x11c8] sm:$0xff] }
 0x1c5   : > { %4482 = vmatpush1.bf16.msra.mxu0 %v4481_v24  ;;  %v4755_v24 = vpack.c.bf16 %v1613_v9, %v1609_v8  ;;  %v1651_v8 = vld [vmem:[#allocation9 + $0x11e8] sm:$0xff]  ;;  %v1649_v9 = vld [vmem:[#allocation9 + $0x11d8] sm:$0xff] }
 0x1c6   : > { %4610 = vmatpush1.bf16.msra.mxu1 %v4609_v19  ;;  %4484 = vmatprep.subr.bf16.mxu0 %v4483_v20  ;;  %v1612_v19 = vld [vmem:[#allocation9 + $0x10b0] sm:$0xff]  ;;  %v1615_v20 = vld [vmem:[#allocation9 + $0x10c8] sm:$0xff] }
 0x1c7   : > { %4612 = vmatprep.subr.bf16.mxu1 %v4611_v26  ;;  %v4629_v26 = vpack.c.bf16 %v1610_v17, %v1606_v16  ;;  %v4757_v25 = vpack.c.bf16 %v1612_v19, %v1608_v18  ;;  %v4631_v27 = vpack.c.bf16 %v1619_v21, %v1615_v20  ;;  %v1646_v16 = vld [vmem:[#allocation9 + $0x11c0] sm:$0xff]  ;;  %v1648_v18 = vld [vmem:[#allocation9 + $0x11d0] sm:$0xff]  ;;  %v1655_v20 = vld [vmem:[#allocation9 + $0x1208] sm:$0xff] }
 0x1c8   : > { %v1650_v17 = vld [vmem:[#allocation9 + $0x11e0] sm:$0xff]  ;;  %v1652_v19 = vld [vmem:[#allocation9 + $0x11f0] sm:$0xff]  ;;  %v1659_v21 = vld [vmem:[#allocation9 + $0x1228] sm:$0xff] }
 0x1c9   : > { %4486 = vmatpush1.bf16.msra.mxu0 %v4485_v31  ;;  %v4759_v31 = vpack.c.bf16 %v1621_v23, %v1617_v22  ;;  %v1657_v22 = vld [vmem:[#allocation9 + $0x1218] sm:$0xff]  ;;  %v1679_v59 = vld [vmem:[#allocation9 + $0x12c8] sm:$0xff] }
 0x1ca   : > { %4614 = vmatpush1.bf16.msra.mxu1 %v4613_v32  ;;  %4488 = vmatprep.subr.bf16.mxu0 %v4487_v33  ;;  %v1620_v32 = vld [vmem:[#allocation9 + $0x10f0] sm:$0xff]  ;;  %v1623_v33 = vld [vmem:[#allocation9 + $0x1108] sm:$0xff]  ;;  %v1661_v23 = vld [vmem:[#allocation9 + $0x1238] sm:$0xff] }
 0x1cb   : > { %4616 = vmatprep.subr.bf16.mxu1 %v4615_v37  ;;  %v4633_v37 = vpack.c.bf16 %v1618_v29, %v1614_v28  ;;  %v4761_v38 = vpack.c.bf16 %v1620_v32, %v1616_v30  ;;  %v4635_v39 = vpack.c.bf16 %v1627_v34, %v1623_v33  ;;  %v1654_v28 = vld [vmem:[#allocation9 + $0x1200] sm:$0xff]  ;;  %v1656_v30 = vld [vmem:[#allocation9 + $0x1210] sm:$0xff]  ;;  %v1663_v33 = vld [vmem:[#allocation9 + $0x1248] sm:$0xff] }
 0x1cc   : > { %v1658_v29 = vld [vmem:[#allocation9 + $0x1220] sm:$0xff]  ;;  %v1660_v32 = vld [vmem:[#allocation9 + $0x1230] sm:$0xff]  ;;  %v1667_v34 = vld [vmem:[#allocation9 + $0x1268] sm:$0xff] }
 0x1cd   : > { %4490 = vmatpush1.bf16.msra.mxu0 %v4489_v42  ;;  %v4763_v42 = vpack.c.bf16 %v1629_v36, %v1625_v35  ;;  %v1665_v35 = vld [vmem:[#allocation9 + $0x1258] sm:$0xff]  ;;  %v1683_v61 = vld [vmem:[#allocation9 + $0x12e8] sm:$0xff] }
 0x1ce   : > { %4618 = vmatpush1.bf16.msra.mxu1 %v4617_v46  ;;  %4620 = vmatprep.subr.bf16.mxu0 %v4619_v48  ;;  %v1635_v46 = vld [vmem:[#allocation9 + $0x1168] sm:$0xff]  ;;  %v1633_v48 = vld [vmem:[#allocation9 + $0x1158] sm:$0xff] }
 0x1cf   : > { %4748 = vmatprep.subr.bf16.mxu1 %v4747_v52  ;;  %v4639_v52 = vpack.c.bf16 %v1635_v46, %v1631_v44  ;;  %v4767_v57 = vpack.c.bf16 %v1637_v49, %v1633_v48  ;;  %v1669_v36 = vld [vmem:[#allocation9 + $0x1278] sm:$0xff]  ;;  %v1671_v44 = vld [vmem:[#allocation9 + $0x1288] sm:$0xff] }
 0x1d0   : > { %1433 = vmatmul.mubr.f32.vlgmr.msra.gmra.mrb[0].mxu0 %v465_v62  ;;  %v1675_v46 = vld [vmem:[#allocation9 + $0x12a8] sm:$0xff]  ;;  %v1673_v48 = vld [vmem:[#allocation9 + $0x1298] sm:$0xff] }
 0x1d1   : > { %1575 = vmatmul.mubr.f32.vlgmr.msra.gmra.mrb[0].mxu1 %v465_v62  ;;  %4622 = vmatpush1.bf16.msra.mxu0 %v4621_v63  ;;  %v1641_v62 = vld [vmem:[#allocation9 + $0x1198] sm:$0xff] }
 0x1d2   : > { %4750 = vmatpush1.bf16.msra.mxu1 %v4749_v0  ;;  %4624 = vmatprep.subr.bf16.mxu0 %v4623_v1  ;;  %v1645_v63 = vld [vmem:[#allocation9 + $0x11b8] sm:$0xff]  ;;  %v4641_v0 = vpack.c.bf16 %v1634_v55, %v1630_v54  ;;  %v4769_v1 = vpack.c.bf16 %v1636_v58, %v1632_v56  ;;  %v1670_v54 = vld [vmem:[#allocation9 + $0x1280] sm:$0xff]  ;;  %v1672_v56 = vld [vmem:[#allocation9 + $0x1290] sm:$0xff] }
 0x1d3   : > { %4752 = vmatprep.subr.bf16.mxu1 %v4751_v4  ;;  %1935 = vmatprep.mubr.f32.mxu0 %v1860_v10  ;;  %v1640_v4 = vld [vmem:[#allocation9 + $0x1190] sm:$0xff]  ;;  %v4771_v5 = vpack.c.bf16 %v1645_v63, %v1641_v62  ;;  %v1677_v49 = vld [vmem:[#allocation9 + $0x12b8] sm:$0xff]  ;;  %v1674_v55 = vld [vmem:[#allocation9 + $0x12a0] sm:$0xff] }
 0x1d4   : > { %2077 = vmatprep.mubr.f32.mxu1 %v1860_v10  ;;  %v1653_v10 = vld [vmem:[#allocation9 + $0x11f8] sm:$0xff]  ;;  %v1676_v58 = vld [vmem:[#allocation9 + $0x12b0] sm:$0xff] }
 0x1d5   : > { %4626 = vmatpush1.bf16.msra.mxu0 %v4625_v13  ;;  %v4645_v13 = vpack.c.bf16 %v1642_v3, %v1638_v2  ;;  %v1681_v62 = vld [vmem:[#allocation9 + $0x12d8] sm:$0xff]  ;;  %v1678_v2 = vld [vmem:[#allocation9 + $0x12c0] sm:$0xff] }
 0x1d6   : > { %4754 = vmatpush1.bf16.msra.mxu1 %v4753_v14  ;;  %4628 = vmatprep.subr.bf16.mxu0 %v4627_v15  ;;  %v4773_v14 = vpack.c.bf16 %v1644_v6, %v1640_v4  ;;  %v4647_v15 = vpack.c.bf16 %v1651_v8, %v1647_v7  ;;  %v1685_v63 = vld [vmem:[#allocation9 + $0x12f8] sm:$0xff]  ;;  %v1682_v3 = vld [vmem:[#allocation9 + $0x12e0] sm:$0xff]  ;;  %v1680_v4 = vld [vmem:[#allocation9 + $0x12d0] sm:$0xff] }
 0x1d7   : > { %4756 = vmatprep.subr.bf16.mxu1 %v4755_v24  ;;  %v4775_v24 = vpack.c.bf16 %v1653_v10, %v1649_v9  ;;  %v1684_v6 = vld [vmem:[#allocation9 + $0x12f0] sm:$0xff]  ;;  %v1687_v7 = vld [vmem:[#allocation9 + $0x1308] sm:$0xff]  ;;  %v1689_v9 = vld [vmem:[#allocation9 + $0x1318] sm:$0xff] }
 0x1d8   : > { %v1691_v8 = vld [vmem:[#allocation9 + $0x1328] sm:$0xff]  ;;  %v1693_v10 = vld [vmem:[#allocation9 + $0x1338] sm:$0xff] }
 0x1d9   : > { %4630 = vmatpush1.bf16.msra.mxu0 %v4629_v26  ;;  %v4649_v26 = vpack.c.bf16 %v1650_v17, %v1646_v16  ;;  %v1686_v16 = vld [vmem:[#allocation9 + $0x1300] sm:$0xff] }
 0x1da   : > { %4758 = vmatpush1.bf16.msra.mxu1 %v4757_v25  ;;  %4632 = vmatprep.subr.bf16.mxu0 %v4631_v27  ;;  %v4777_v25 = vpack.c.bf16 %v1652_v19, %v1648_v18  ;;  %v4651_v27 = vpack.c.bf16 %v1659_v21, %v1655_v20  ;;  %v1690_v17 = vld [vmem:[#allocation9 + $0x1320] sm:$0xff]  ;;  %v1688_v18 = vld [vmem:[#allocation9 + $0x1310] sm:$0xff]  ;;  %v1695_v20 = vld [vmem:[#allocation9 + $0x1348] sm:$0xff] }
 0x1db   : > { %4760 = vmatprep.subr.bf16.mxu1 %v4759_v31  ;;  %v4779_v31 = vpack.c.bf16 %v1661_v23, %v1657_v22  ;;  %v1692_v19 = vld [vmem:[#allocation9 + $0x1330] sm:$0xff]  ;;  %v1699_v21 = vld [vmem:[#allocation9 + $0x1368] sm:$0xff]  ;;  %v1697_v22 = vld [vmem:[#allocation9 + $0x1358] sm:$0xff] }
 0x1dc   : > { %v1701_v23 = vld [vmem:[#allocation9 + $0x1378] sm:$0xff] }
 0x1dd   : > { %4634 = vmatpush1.bf16.msra.mxu0 %v4633_v37  ;;  %v4653_v37 = vpack.c.bf16 %v1658_v29, %v1654_v28  ;;  %v1694_v28 = vld [vmem:[#allocation9 + $0x1340] sm:$0xff] }
 0x1de   : > { %4762 = vmatpush1.bf16.msra.mxu1 %v4761_v38  ;;  %4636 = vmatprep.subr.bf16.mxu0 %v4635_v39  ;;  %v4781_v38 = vpack.c.bf16 %v1660_v32, %v1656_v30  ;;  %v4655_v39 = vpack.c.bf16 %v1667_v34, %v1663_v33  ;;  %v1698_v29 = vld [vmem:[#allocation9 + $0x1360] sm:$0xff]  ;;  %v1696_v30 = vld [vmem:[#allocation9 + $0x1350] sm:$0xff]  ;;  %v1703_v33 = vld [vmem:[#allocation9 + $0x1388] sm:$0xff] }
 0x1df   : > { %4764 = vmatprep.subr.bf16.mxu1 %v4763_v42  ;;  %v4783_v42 = vpack.c.bf16 %v1669_v36, %v1665_v35  ;;  %v1700_v32 = vld [vmem:[#allocation9 + $0x1370] sm:$0xff]  ;;  %v1707_v34 = vld [vmem:[#allocation9 + $0x13a8] sm:$0xff]  ;;  %v1705_v35 = vld [vmem:[#allocation9 + $0x1398] sm:$0xff] }
 0x1e0   : > { %v1709_v36 = vld [vmem:[#allocation9 + $0x13b8] sm:$0xff] }
 0x1e1   : > { %4638 = vmatpush1.bf16.msra.mxu0 %v4637_v50  ;;  %v4657_v50 = vpack.c.bf16 %v1666_v41, %v1662_v40  ;;  %v1702_v40 = vld [vmem:[#allocation9 + $0x1380] sm:$0xff] }
 0x1e2   : > { %4766 = vmatpush1.bf16.msra.mxu1 %v4765_v51  ;;  %4640 = vmatprep.subr.bf16.mxu0 %v4639_v52  ;;  %v4785_v51 = vpack.c.bf16 %v1668_v43, %v1664_v47  ;;  %v4659_v52 = vpack.c.bf16 %v1675_v46, %v1671_v44  ;;  %v1706_v41 = vld [vmem:[#allocation9 + $0x13a0] sm:$0xff]  ;;  %v1704_v47 = vld [vmem:[#allocation9 + $0x1390] sm:$0xff]  ;;  %v1711_v44 = vld [vmem:[#allocation9 + $0x13c8] sm:$0xff] }
 0x1e3   : > { %4768 = vmatprep.subr.bf16.mxu1 %v4767_v57  ;;  %v4787_v57 = vpack.c.bf16 %v1677_v49, %v1673_v48  ;;  %v1708_v43 = vld [vmem:[#allocation9 + $0x13b0] sm:$0xff]  ;;  %v1715_v46 = vld [vmem:[#allocation9 + $0x13e8] sm:$0xff]  ;;  %v1713_v48 = vld [vmem:[#allocation9 + $0x13d8] sm:$0xff] }
 0x1e4   : > { %v1717_v49 = vld [vmem:[#allocation9 + $0x13f8] sm:$0xff] }
 0x1e5   : > { %4642 = vmatpush1.bf16.msra.mxu0 %v4641_v0  ;;  %v4661_v0 = vpack.c.bf16 %v1674_v55, %v1670_v54  ;;  %v4805_v54 = vpack.c.bf16 %v1708_v43, %v1704_v47  ;;  %v4679_v55 = vpack.c.bf16 %v1715_v46, %v1711_v44  ;;  %v1740_v47 = vld [vmem:[#allocation9 + $0x14b0] sm:$0xff]  ;;  %v1747_v43 = vld [vmem:[#allocation9 + $0x14e8] sm:$0xff]  ;;  %v1745_v44 = vld [vmem:[#allocation9 + $0x14d8] sm:$0xff] }
 0x1e6   : > { %4770 = vmatpush1.bf16.msra.mxu1 %v4769_v1  ;;  %4644 = vmatprep.subr.bf16.mxu0 %v4643_v60  ;;  %v4789_v1 = vpack.c.bf16 %v1676_v58, %v1672_v56  ;;  %v4663_v60 = vpack.c.bf16 %v1683_v61, %v1679_v59  ;;  %v1712_v56 = vld [vmem:[#allocation9 + $0x13d0] sm:$0xff]  ;;  %v1585_v58 = vld [vmem:[#allocation2 + $0x20] sm:$0x3]  ;;  %v4807_v59 = vpack.c.bf16 %v1717_v49, %v1713_v48 }
 0x1e7   : > { %4772 = vmatprep.subr.bf16.mxu1 %v4771_v5  ;;  %v4791_v5 = vpack.c.bf16 %v1685_v63, %v1681_v62  ;;  %v1716_v61 = vld [vmem:[#allocation9 + $0x13f0] sm:$0xff]  ;;  %v1719_v62 = vld [vmem:[#allocation9 + $0x1408] sm:$0xff]  ;;  %v1749_v46 = vld [vmem:[#allocation9 + $0x14f8] sm:$0xff] }
 0x1e8   : > { %v1723_v63 = vld [vmem:[#allocation9 + $0x1428] sm:$0xff] }
 0x1e9   : > { %4646 = vmatpush1.bf16.msra.mxu0 %v4645_v13  ;;  %v4665_v13 = vpack.c.bf16 %v1682_v3, %v1678_v2  ;;  %v1856_v3 = vrot.slane %v1585_v58, 2  ;;  %v1755_v58 = vld [vmem:[#allocation9 + $0x1528] sm:$0xff] }
 0x1ea   : > { %4774 = vmatpush1.bf16.msra.mxu1 %v4773_v14  ;;  %4648 = vmatprep.subr.bf16.mxu0 %v4647_v15  ;;  %v4793_v14 = vpack.c.bf16 %v1684_v6, %v1680_v4  ;;  %v4667_v15 = vpack.c.bf16 %v1691_v8, %v1687_v7  ;;  %v1584_v4 = vld [vmem:[#allocation2 + $0x18] sm:$0xfc]  ;;  %v4809_v6 = vpack.c.bf16 %v1716_v61, %v1712_v56  ;;  %v1718_v8 = vld [vmem:[#allocation9 + $0x1400] sm:$0xff]  ;;  %v1757_v61 = vld [vmem:[#allocation9 + $0x1538] sm:$0xff] }
 0x1eb   : > { %4776 = vmatprep.subr.bf16.mxu1 %v4775_v24  ;;  %v4795_v24 = vpack.c.bf16 %v1693_v10, %v1689_v9  ;;  %v4683_v7 = vpack.c.bf16 %v1723_v63, %v1719_v62  ;;  %v1722_v9 = vld [vmem:[#allocation9 + $0x1420] sm:$0xff]  ;;  %v1720_v10 = vld [vmem:[#allocation9 + $0x1410] sm:$0xff] }
 0x1ec   : > { %v1748_v56 = vld [vmem:[#allocation9 + $0x14f0] sm:$0xff] }
 0x1ed   : > { %4650 = vmatpush1.bf16.msra.mxu0 %v4649_v26  ;;  %v4669_v26 = vpack.c.bf16 %v1690_v17, %v1686_v16  ;;  %v1731_v16 = vld [vmem:[#allocation9 + $0x1468] sm:$0xff]  ;;  %v1729_v17 = vld [vmem:[#allocation9 + $0x1458] sm:$0xff] }
 0x1ee   : > { %4778 = vmatpush1.bf16.msra.mxu1 %v4777_v25  ;;  %4652 = vmatprep.subr.bf16.mxu0 %v4651_v27  ;;  %v4797_v25 = vpack.c.bf16 %v1692_v19, %v1688_v18  ;;  %v4671_v27 = vpack.c.bf16 %v1699_v21, %v1695_v20  ;;  %v1733_v18 = vld [vmem:[#allocation9 + $0x1478] sm:$0xff]  ;;  %v4685_v21 = vpack.c.bf16 %v1722_v9, %v1718_v8 }
 0x1ef   : > { %4780 = vmatprep.subr.bf16.mxu1 %v4779_v31  ;;  %v4799_v31 = vpack.c.bf16 %v1701_v23, %v1697_v22  ;;  %v1765_v8 = vld [vmem:[#allocation9 + $0x1578] sm:$0xff] }
 0x1f1   : > { %4654 = vmatpush1.bf16.msra.mxu0 %v4653_v37  ;;  %v4673_v37 = vpack.c.bf16 %v1698_v29, %v1694_v28  ;;  %v4815_v28 = vpack.c.bf16 %v1733_v18, %v1729_v17  ;;  %v1732_v29 = vld [vmem:[#allocation9 + $0x1470] sm:$0xff] }
 0x1f2   : > { %4782 = vmatpush1.bf16.msra.mxu1 %v4781_v38  ;;  %4656 = vmatprep.subr.bf16.mxu0 %v4655_v39  ;;  %v4801_v38 = vpack.c.bf16 %v1700_v32, %v1696_v30  ;;  %v4675_v39 = vpack.c.bf16 %v1707_v34, %v1703_v33  ;;  %v1735_v30 = vld [vmem:[#allocation9 + $0x1488] sm:$0xff]  ;;  %v1737_v32 = vld [vmem:[#allocation9 + $0x1498] sm:$0xff]  ;;  %v1764_v18 = vld [vmem:[#allocation9 + $0x1570] sm:$0xff] }
 0x1f3   : > { %4784 = vmatprep.subr.bf16.mxu1 %v4783_v42  ;;  %v4803_v42 = vpack.c.bf16 %v1709_v36, %v1705_v35  ;;  %v1741_v33 = vld [vmem:[#allocation9 + $0x14b8] sm:$0xff] }
 0x1f5   : > { %4658 = vmatpush1.bf16.msra.mxu0 %v4657_v50  ;;  %v4677_v50 = vpack.c.bf16 %v1706_v41, %v1702_v40  ;;  %v1736_v40 = vld [vmem:[#allocation9 + $0x1490] sm:$0xff]  ;;  %v4819_v41 = vpack.c.bf16 %v1741_v33, %v1737_v32  ;;  %v1779_v32 = vld [vmem:[#allocation9 + $0x15e8] sm:$0xff]  ;;  %v1777_v33 = vld [vmem:[#allocation9 + $0x15d8] sm:$0xff] }
 0x1f6   : > { %4786 = vmatpush1.bf16.msra.mxu1 %v4785_v51  ;;  %4660 = vmatprep.subr.bf16.mxu0 %v4659_v52  ;;  %v1710_v51 = vld [vmem:[#allocation9 + $0x13c0] sm:$0xff]  ;;  %v4821_v49 = vpack.c.bf16 %v1740_v47, %v1736_v40  ;;  %v1776_v40 = vld [vmem:[#allocation9 + $0x15d0] sm:$0xff] }
 0x1f7   : > { %4788 = vmatprep.subr.bf16.mxu1 %v4787_v57  ;;  %v1714_v52 = vld [vmem:[#allocation9 + $0x13e0] sm:$0xff]  ;;  %v1581_v57 = vld [vmem:[#allocation2] sm:$0xfc]  ;;  %v1780_v47 = vld [vmem:[#allocation9 + $0x15f0] sm:$0xff] }
 0x1f8   : > { %v1855_v2 = vrot.slane %v1581_v57, 2  ;;  %v1751_v57 = vld [vmem:[#allocation9 + $0x1508] sm:$0xff] }
 0x1f9   : > { %4662 = vmatpush1.bf16.msra.mxu0 %v4661_v0  ;;  %v1721_v0 = vld [vmem:[#allocation9 + $0x1418] sm:$0xff] }
 0x1fa   : > { %4790 = vmatpush1.bf16.msra.mxu1 %v4789_v1  ;;  %4664 = vmatprep.subr.bf16.mxu0 %v4663_v60  ;;  %v1725_v1 = vld [vmem:[#allocation9 + $0x1438] sm:$0xff]  ;;  %v4681_v60 = vpack.c.bf16 %v1714_v52, %v1710_v51  ;;  %v1857_v20 = vsel %vm1854_vm2, %v1855_v2, %v1856_v3  ;;  %v1742_v51 = vld [vmem:[#allocation9 + $0x14c0] sm:$0xff]  ;;  %v1752_v2 = vld [vmem:[#allocation9 + $0x1510] sm:$0xff] }
 0x1fb   : > { %4792 = vmatprep.subr.bf16.mxu1 %v4791_v5  ;;  %v1588_v5 = vld [vmem:[#allocation2 + $0x38] sm:$0x3]  ;;  %v1746_v52 = vld [vmem:[#allocation9 + $0x14e0] sm:$0xff] }
 0x1fc   : > { %v1865_v19 = vrot.slane %v1588_v5, 2  ;;  %v4697_v62 = vpack.c.bf16 %v1746_v52, %v1742_v51  ;;  %v1759_v5 = vld [vmem:[#allocation9 + $0x1548] sm:$0xff]  ;;  %v1782_v51 = vld [vmem:[#allocation9 + $0x1600] sm:$0xff] }
 0x1fd   : > { %4666 = vmatpush1.bf16.msra.mxu0 %v4665_v13  ;;  %v4811_v13 = vpack.c.bf16 %v1725_v1, %v1721_v0  ;;  %v4699_v0 = vpack.c.bf16 %v1755_v58, %v1751_v57  ;;  %v1750_v1 = vld [vmem:[#allocation9 + $0x1500] sm:$0xff]  ;;  %v1791_v57 = vld [vmem:[#allocation9 + $0x1648] sm:$0xff] }
 0x1fe   : > { %4794 = vmatpush1.bf16.msra.mxu1 %v4793_v14  ;;  %4668 = vmatprep.subr.bf16.mxu0 %v4667_v15  ;;  %v1724_v14 = vld [vmem:[#allocation9 + $0x1430] sm:$0xff]  ;;  %v1727_v15 = vld [vmem:[#allocation9 + $0x1448] sm:$0xff]  ;;  %v1786_v52 = vld [vmem:[#allocation9 + $0x1620] sm:$0xff] }
 0x1ff   : > { %4796 = vmatprep.subr.bf16.mxu1 %v4795_v24  ;;  %v1864_v24 = vrot.slane %v1584_v4, 2  ;;  %v4813_v22 = vpack.c.bf16 %v1724_v14, %v1720_v10  ;;  %v4687_v23 = vpack.c.bf16 %v1731_v16, %v1727_v15  ;;  %v1756_v4 = vld [vmem:[#allocation9 + $0x1530] sm:$0xff]  ;;  %v1758_v14 = vld [vmem:[#allocation9 + $0x1540] sm:$0xff]  ;;  %v1795_v58 = vld [vmem:[#allocation9 + $0x1668] sm:$0xff] }
 0x200   : > { %v4829_v10 = vpack.c.bf16 %v1756_v4, %v1752_v2  ;;  %v1762_v15 = vld [vmem:[#allocation9 + $0x1560] sm:$0xff]  ;;  %v1760_v16 = vld [vmem:[#allocation9 + $0x1550] sm:$0xff] }
 0x201   : > { %4670 = vmatpush1.bf16.msra.mxu0 %v4669_v26  ;;  %v1726_v26 = vld [vmem:[#allocation9 + $0x1440] sm:$0xff]  ;;  %v1866_v34 = vsel %vm1854_vm2, %v1864_v24, %v1865_v19  ;;  %v1767_v24 = vld [vmem:[#allocation9 + $0x1588] sm:$0xff]  ;;  %v1792_v2 = vld [vmem:[#allocation9 + $0x1650] sm:$0xff] }
 0x202   : > { %4798 = vmatpush1.bf16.msra.mxu1 %v4797_v25  ;;  %4672 = vmatprep.subr.bf16.mxu0 %v4671_v27  ;;  %v1730_v25 = vld [vmem:[#allocation9 + $0x1460] sm:$0xff]  ;;  %v1728_v27 = vld [vmem:[#allocation9 + $0x1450] sm:$0xff]  ;;  %v1771_v19 = vld [vmem:[#allocation9 + $0x15a8] sm:$0xff] }
 0x203   : > { %4800 = vmatprep.subr.bf16.mxu1 %v4799_v31  ;;  %v1739_v31 = vld [vmem:[#allocation9 + $0x14a8] sm:$0xff]  ;;  %v4689_v35 = vpack.c.bf16 %v1730_v25, %v1726_v26  ;;  %v4817_v36 = vpack.c.bf16 %v1732_v29, %v1728_v27  ;;  %v4707_v26 = vpack.c.bf16 %v1771_v19, %v1767_v24  ;;  %v1766_v25 = vld [vmem:[#allocation9 + $0x1580] sm:$0xff]  ;;  %v1796_v4 = vld [vmem:[#allocation9 + $0x1670] sm:$0xff] }
 0x204   : > { %v1770_v27 = vld [vmem:[#allocation9 + $0x15a0] sm:$0xff]  ;;  %v1807_v24 = vld [vmem:[#allocation9 + $0x16c8] sm:$0xff] }
 0x205   : > { %4674 = vmatpush1.bf16.msra.mxu0 %v4673_v37  ;;  %v4691_v37 = vpack.c.bf16 %v1739_v31, %v1735_v30  ;;  %v1772_v30 = vld [vmem:[#allocation9 + $0x15b0] sm:$0xff]  ;;  %v1775_v31 = vld [vmem:[#allocation9 + $0x15c8] sm:$0xff] }
 0x206   : > { %4802 = vmatpush1.bf16.msra.mxu1 %v4801_v38  ;;  %4676 = vmatprep.subr.bf16.mxu0 %v4675_v39  ;;  %v1734_v38 = vld [vmem:[#allocation9 + $0x1480] sm:$0xff]  ;;  %v1811_v19 = vld [vmem:[#allocation9 + $0x16e8] sm:$0xff] }
 0x207   : > { %4804 = vmatprep.subr.bf16.mxu1 %v4803_v42  ;;  %v1738_v39 = vld [vmem:[#allocation9 + $0x14a0] sm:$0xff]  ;;  %v1743_v42 = vld [vmem:[#allocation9 + $0x14c8] sm:$0xff] }
 0x208   : > { %v4693_v48 = vpack.c.bf16 %v1738_v39, %v1734_v38  ;;  %v1774_v38 = vld [vmem:[#allocation9 + $0x15c0] sm:$0xff] }
 0x209   : > { %4678 = vmatpush1.bf16.msra.mxu0 %v4677_v50  ;;  %v4695_v50 = vpack.c.bf16 %v1747_v43, %v1743_v42  ;;  %v1778_v39 = vld [vmem:[#allocation9 + $0x15e0] sm:$0xff]  ;;  %v1783_v42 = vld [vmem:[#allocation9 + $0x1608] sm:$0xff] }
 0x20a   : > { %4806 = vmatpush1.bf16.msra.mxu1 %v4805_v54  ;;  %4680 = vmatprep.subr.bf16.mxu0 %v4679_v55  ;;  %v1744_v54 = vld [vmem:[#allocation9 + $0x14d0] sm:$0xff]  ;;  %v4823_v55 = vpack.c.bf16 %v1749_v46, %v1745_v44  ;;  %v1787_v43 = vld [vmem:[#allocation9 + $0x1628] sm:$0xff]  ;;  %v1785_v44 = vld [vmem:[#allocation9 + $0x1618] sm:$0xff] }
 0x20b   : > { %4808 = vmatprep.subr.bf16.mxu1 %v4807_v59  ;;  %v1753_v59 = vld [vmem:[#allocation9 + $0x1518] sm:$0xff]  ;;  %v4825_v63 = vpack.c.bf16 %v1748_v56, %v1744_v54  ;;  %v1784_v54 = vld [vmem:[#allocation9 + $0x1610] sm:$0xff] }
 0x20c   : > { %v4827_v3 = vpack.c.bf16 %v1757_v61, %v1753_v59  ;;  %v1789_v46 = vld [vmem:[#allocation9 + $0x1638] sm:$0xff]  ;;  %v1788_v56 = vld [vmem:[#allocation9 + $0x1630] sm:$0xff] }
 0x20d   : > { %4682 = vmatpush1.bf16.msra.mxu0 %v4681_v60  ;;  %v1754_v60 = vld [vmem:[#allocation9 + $0x1520] sm:$0xff]  ;;  %v1793_v59 = vld [vmem:[#allocation9 + $0x1658] sm:$0xff] }
 0x20e   : > { %4810 = vmatpush1.bf16.msra.mxu1 %v4809_v6  ;;  %4684 = vmatprep.subr.bf16.mxu0 %v4683_v7  ;;  %v1763_v6 = vld [vmem:[#allocation9 + $0x1568] sm:$0xff]  ;;  %v1761_v7 = vld [vmem:[#allocation9 + $0x1558] sm:$0xff]  ;;  %v4701_v9 = vpack.c.bf16 %v1754_v60, %v1750_v1  ;;  %v1790_v1 = vld [vmem:[#allocation9 + $0x1640] sm:$0xff] }
 0x20f   : > { %4812 = vmatprep.subr.bf16.mxu1 %v4811_v13  ;;  %v4703_v13 = vpack.c.bf16 %v1763_v6, %v1759_v5  ;;  %v4831_v17 = vpack.c.bf16 %v1765_v8, %v1761_v7  ;;  %v1797_v61 = vld [vmem:[#allocation9 + $0x1678] sm:$0xff]  ;;  %v1794_v60 = vld [vmem:[#allocation9 + $0x1660] sm:$0xff]  ;;  %v1799_v5 = vld [vmem:[#allocation9 + $0x1688] sm:$0xff] }
 0x210   : > { %1936 = vmatmul.mubr.f32.vlgmr.msra.gmra.mrb[0].mxu0 %v1857_v20  ;;  %v1803_v6 = vld [vmem:[#allocation9 + $0x16a8] sm:$0xff]  ;;  %v1801_v7 = vld [vmem:[#allocation9 + $0x1698] sm:$0xff] }
 0x211   : > { %4686 = vmatpush1.bf16.msra.mxu0 %v4685_v21  ;;  %2078 = vmatmul.mubr.f32.vlgmr.msra.gmra.mrb[0].mxu1 %v1857_v20  ;;  %v1769_v20 = vld [vmem:[#allocation9 + $0x1598] sm:$0xff] }
 0x212   : > { %4814 = vmatpush1.bf16.msra.mxu1 %v4813_v22  ;;  %4688 = vmatprep.subr.bf16.mxu0 %v4687_v23  ;;  %v1773_v21 = vld [vmem:[#allocation9 + $0x15b8] sm:$0xff]  ;;  %v4705_v22 = vpack.c.bf16 %v1762_v15, %v1758_v14  ;;  %v4833_v23 = vpack.c.bf16 %v1764_v18, %v1760_v16  ;;  %v1798_v14 = vld [vmem:[#allocation9 + $0x1680] sm:$0xff]  ;;  %v1800_v16 = vld [vmem:[#allocation9 + $0x1690] sm:$0xff] }
 0x213   : > { %4816 = vmatprep.subr.bf16.mxu1 %v4815_v28  ;;  %2006 = vmatprep.mubr.f32.mxu0 %v1866_v34  ;;  %v1768_v28 = vld [vmem:[#allocation9 + $0x1590] sm:$0xff]  ;;  %v4835_v29 = vpack.c.bf16 %v1773_v21, %v1769_v20  ;;  %v1805_v8 = vld [vmem:[#allocation9 + $0x16b8] sm:$0xff]  ;;  %v1802_v15 = vld [vmem:[#allocation9 + $0x16a0] sm:$0xff] }
 0x214   : > { %2148 = vmatprep.mubr.f32.mxu1 %v1866_v34  ;;  %v1781_v34 = vld [vmem:[#allocation9 + $0x15f8] sm:$0xff]  ;;  %v1804_v18 = vld [vmem:[#allocation9 + $0x16b0] sm:$0xff] }
 0x215   : > { %4690 = vmatpush1.bf16.msra.mxu0 %v4689_v35  ;;  %v4709_v35 = vpack.c.bf16 %v1770_v27, %v1766_v25  ;;  %v1809_v20 = vld [vmem:[#allocation9 + $0x16d8] sm:$0xff]  ;;  %v1806_v25 = vld [vmem:[#allocation9 + $0x16c0] sm:$0xff] }
 0x216   : > { %4818 = vmatpush1.bf16.msra.mxu1 %v4817_v36  ;;  %4692 = vmatprep.subr.bf16.mxu0 %v4691_v37  ;;  %v4837_v36 = vpack.c.bf16 %v1772_v30, %v1768_v28  ;;  %v4711_v37 = vpack.c.bf16 %v1779_v32, %v1775_v31  ;;  %v1813_v21 = vld [vmem:[#allocation9 + $0x16f8] sm:$0xff]  ;;  %v1810_v27 = vld [vmem:[#allocation9 + $0x16e0] sm:$0xff]  ;;  %v1808_v28 = vld [vmem:[#allocation9 + $0x16d0] sm:$0xff] }
 0x217   : > { %4820 = vmatprep.subr.bf16.mxu1 %v4819_v41  ;;  %v4839_v41 = vpack.c.bf16 %v1781_v34, %v1777_v33  ;;  %v1812_v30 = vld [vmem:[#allocation9 + $0x16f0] sm:$0xff]  ;;  %v1815_v31 = vld [vmem:[#allocation9 + $0x1708] sm:$0xff]  ;;  %v1817_v33 = vld [vmem:[#allocation9 + $0x1718] sm:$0xff] }
 0x218   : > { %v1819_v32 = vld [vmem:[#allocation9 + $0x1728] sm:$0xff]  ;;  %v1821_v34 = vld [vmem:[#allocation9 + $0x1738] sm:$0xff] }
 0x219   : > { %4694 = vmatpush1.bf16.msra.mxu0 %v4693_v48  ;;  %v4713_v48 = vpack.c.bf16 %v1778_v39, %v1774_v38  ;;  %v1814_v38 = vld [vmem:[#allocation9 + $0x1700] sm:$0xff] }
 0x21a   : > { %4822 = vmatpush1.bf16.msra.mxu1 %v4821_v49  ;;  %4696 = vmatprep.subr.bf16.mxu0 %v4695_v50  ;;  %v4841_v49 = vpack.c.bf16 %v1780_v47, %v1776_v40  ;;  %v4715_v50 = vpack.c.bf16 %v1787_v43, %v1783_v42  ;;  %v1818_v39 = vld [vmem:[#allocation9 + $0x1720] sm:$0xff]  ;;  %v1816_v40 = vld [vmem:[#allocation9 + $0x1710] sm:$0xff]  ;;  %v1823_v42 = vld [vmem:[#allocation9 + $0x1748] sm:$0xff] }
 0x21b   : > { %4824 = vmatprep.subr.bf16.mxu1 %v4823_v55  ;;  %v4843_v55 = vpack.c.bf16 %v1789_v46, %v1785_v44  ;;  %v1820_v47 = vld [vmem:[#allocation9 + $0x1730] sm:$0xff]  ;;  %v1827_v43 = vld [vmem:[#allocation9 + $0x1768] sm:$0xff]  ;;  %v1825_v44 = vld [vmem:[#allocation9 + $0x1758] sm:$0xff] }
 0x21c   : > { %v1829_v46 = vld [vmem:[#allocation9 + $0x1778] sm:$0xff] }
 0x21d   : > { %4698 = vmatpush1.bf16.msra.mxu0 %v4697_v62  ;;  %v4717_v62 = vpack.c.bf16 %v1786_v52, %v1782_v51  ;;  %v1822_v51 = vld [vmem:[#allocation9 + $0x1740] sm:$0xff] }
 0x21e   : > { %4826 = vmatpush1.bf16.msra.mxu1 %v4825_v63  ;;  %4700 = vmatprep.subr.bf16.mxu0 %v4699_v0  ;;  %v4845_v63 = vpack.c.bf16 %v1788_v56, %v1784_v54  ;;  %v4719_v0 = vpack.c.bf16 %v1795_v58, %v1791_v57  ;;  %v1826_v52 = vld [vmem:[#allocation9 + $0x1760] sm:$0xff]  ;;  %v1824_v54 = vld [vmem:[#allocation9 + $0x1750] sm:$0xff]  ;;  %v1831_v57 = vld [vmem:[#allocation9 + $0x1788] sm:$0xff] }
 0x21f   : > { %4828 = vmatprep.subr.bf16.mxu1 %v4827_v3  ;;  %v4847_v3 = vpack.c.bf16 %v1797_v61, %v1793_v59  ;;  %v1828_v56 = vld [vmem:[#allocation9 + $0x1770] sm:$0xff]  ;;  %v1835_v58 = vld [vmem:[#allocation9 + $0x17a8] sm:$0xff]  ;;  %v1833_v59 = vld [vmem:[#allocation9 + $0x1798] sm:$0xff] }
 0x220   : > { %v1837_v61 = vld [vmem:[#allocation9 + $0x17b8] sm:$0xff] }
 0x221   : > { %4702 = vmatpush1.bf16.msra.mxu0 %v4701_v9  ;;  %v4721_v9 = vpack.c.bf16 %v1794_v60, %v1790_v1  ;;  %v1830_v1 = vld [vmem:[#allocation9 + $0x1780] sm:$0xff] }
 0x222   : > { %4830 = vmatpush1.bf16.msra.mxu1 %v4829_v10  ;;  %4704 = vmatprep.subr.bf16.mxu0 %v4703_v13  ;;  %v4849_v10 = vpack.c.bf16 %v1796_v4, %v1792_v2  ;;  %v4723_v13 = vpack.c.bf16 %v1803_v6, %v1799_v5  ;;  %v1834_v60 = vld [vmem:[#allocation9 + $0x17a0] sm:$0xff]  ;;  %v1832_v2 = vld [vmem:[#allocation9 + $0x1790] sm:$0xff]  ;;  %v1839_v5 = vld [vmem:[#allocation9 + $0x17c8] sm:$0xff] }
 0x223   : > { %4832 = vmatprep.subr.bf16.mxu1 %v4831_v17  ;;  %v4851_v17 = vpack.c.bf16 %v1805_v8, %v1801_v7  ;;  %v1836_v4 = vld [vmem:[#allocation9 + $0x17b0] sm:$0xff]  ;;  %v1843_v6 = vld [vmem:[#allocation9 + $0x17e8] sm:$0xff]  ;;  %v1841_v7 = vld [vmem:[#allocation9 + $0x17d8] sm:$0xff] }
 0x224   : > { %v1845_v8 = vld [vmem:[#allocation9 + $0x17f8] sm:$0xff] }
 0x225   : > { %4706 = vmatpush1.bf16.msra.mxu0 %v4705_v22  ;;  %v4725_v22 = vpack.c.bf16 %v1802_v15, %v1798_v14  ;;  %v4869_v14 = vpack.c.bf16 %v1836_v4, %v1832_v2  ;;  %v4743_v15 = vpack.c.bf16 %v1843_v6, %v1839_v5  ;;  %v2502_v5 = vld [vmem:[#allocation12 + $0x8c0] sm:$0xff] }
 0x226   : > { %4834 = vmatpush1.bf16.msra.mxu1 %v4833_v23  ;;  %4708 = vmatprep.subr.bf16.mxu0 %v4707_v26  ;;  %v4853_v23 = vpack.c.bf16 %v1804_v18, %v1800_v16  ;;  %v4727_v26 = vpack.c.bf16 %v1811_v19, %v1807_v24  ;;  %v1840_v16 = vld [vmem:[#allocation9 + $0x17d0] sm:$0xff]  ;;  %v1587_v18 = vld [vmem:[#allocation2 + $0x30] sm:$0x3]  ;;  %v4871_v24 = vpack.c.bf16 %v1845_v8, %v1841_v7 }
 0x227   : > { %4836 = vmatprep.subr.bf16.mxu1 %v4835_v29  ;;  %v4855_v29 = vpack.c.bf16 %v1813_v21, %v1809_v20  ;;  %v1844_v19 = vld [vmem:[#allocation9 + $0x17f0] sm:$0xff]  ;;  %v2506_v6 = vld [vmem:[#allocation12 + $0x8e0] sm:$0xff] }
 0x228   : > { %v2479_v20 = vld [vmem:[#allocation12 + $0x808] sm:$0xff]  ;;  %v2504_v7 = vld [vmem:[#allocation12 + $0x8d0] sm:$0xff] }
 0x229   : > { %4710 = vmatpush1.bf16.msra.mxu0 %v4709_v35  ;;  %v4729_v35 = vpack.c.bf16 %v1810_v27, %v1806_v25  ;;  %v2483_v21 = vld [vmem:[#allocation12 + $0x828] sm:$0xff]  ;;  %v1862_v27 = vrot.slane %v1587_v18, 2 }
 0x22a   : > { %4838 = vmatpush1.bf16.msra.mxu1 %v4837_v36  ;;  %4712 = vmatprep.subr.bf16.mxu0 %v4711_v37  ;;  %v4857_v36 = vpack.c.bf16 %v1812_v30, %v1808_v28  ;;  %v4731_v37 = vpack.c.bf16 %v1819_v32, %v1815_v31  ;;  %v4873_v28 = vpack.c.bf16 %v1844_v19, %v1840_v16  ;;  %v2478_v30 = vld [vmem:[#allocation12 + $0x800] sm:$0xff]  ;;  %v2480_v32 = vld [vmem:[#allocation12 + $0x810] sm:$0xff] }
 0x22b   : > { %4840 = vmatprep.subr.bf16.mxu1 %v4839_v41  ;;  %v4859_v41 = vpack.c.bf16 %v1821_v34, %v1817_v33  ;;  %v2482_v31 = vld [vmem:[#allocation12 + $0x820] sm:$0xff]  ;;  %v2484_v34 = vld [vmem:[#allocation12 + $0x830] sm:$0xff]  ;;  %v4889_v16 = vpack.c.bf16 %v2506_v6, %v2502_v5 }
 0x22c   : > { %v2514_v19 = vld [vmem:[#allocation12 + $0x920] sm:$0xff] }
 0x22d   : > { %4714 = vmatpush1.bf16.msra.mxu0 %v4713_v48  ;;  %v4733_v48 = vpack.c.bf16 %v1818_v39, %v1814_v38  ;;  %v2493_v38 = vld [vmem:[#allocation12 + $0x878] sm:$0xff]  ;;  %v2542_v5 = vld [vmem:[#allocation12 + $0xa00] sm:$0xff] }
 0x22e   : > { %4842 = vmatpush1.bf16.msra.mxu1 %v4841_v49  ;;  %4716 = vmatprep.subr.bf16.mxu0 %v4715_v50  ;;  %v4861_v49 = vpack.c.bf16 %v1820_v47, %v1816_v40  ;;  %v4735_v50 = vpack.c.bf16 %v1827_v43, %v1823_v42  ;;  %v4877_v40 = vpack.c.bf16 %v2482_v31, %v2478_v30  ;;  %v2486_v42 = vld [vmem:[#allocation12 + $0x840] sm:$0xff] }
 0x22f   : > { %4844 = vmatprep.subr.bf16.mxu1 %v4843_v55  ;;  %v4863_v55 = vpack.c.bf16 %v1829_v46, %v1825_v44  ;;  %v2490_v43 = vld [vmem:[#allocation12 + $0x860] sm:$0xff]  ;;  %v2488_v44 = vld [vmem:[#allocation12 + $0x850] sm:$0xff] }
 0x230   : > { %v2518_v31 = vld [vmem:[#allocation12 + $0x940] sm:$0xff] }
 0x231   : > { %4718 = vmatpush1.bf16.msra.mxu0 %v4717_v62  ;;  %v4737_v62 = vpack.c.bf16 %v1826_v52, %v1822_v51  ;;  %v2497_v51 = vld [vmem:[#allocation12 + $0x898] sm:$0xff]  ;;  %v2546_v6 = vld [vmem:[#allocation12 + $0xa20] sm:$0xff] }
 0x232   : > { %4846 = vmatpush1.bf16.msra.mxu1 %v4845_v63  ;;  %4720 = vmatprep.subr.bf16.mxu0 %v4719_v0  ;;  %v4865_v63 = vpack.c.bf16 %v1828_v56, %v1824_v54  ;;  %v4739_v0 = vpack.c.bf16 %v1835_v58, %v1831_v57  ;;  %v2501_v52 = vld [vmem:[#allocation12 + $0x8b8] sm:$0xff]  ;;  %v4881_v54 = vpack.c.bf16 %v2490_v43, %v2486_v42  ;;  %v2494_v57 = vld [vmem:[#allocation12 + $0x880] sm:$0xff] }
 0x233   : > { %4848 = vmatprep.subr.bf16.mxu1 %v4847_v3  ;;  %v4867_v3 = vpack.c.bf16 %v1837_v61, %v1833_v59  ;;  %v2498_v58 = vld [vmem:[#allocation12 + $0x8a0] sm:$0xff]  ;;  %v2496_v59 = vld [vmem:[#allocation12 + $0x890] sm:$0xff]  ;;  %v5011_v61 = vpack.c.bf16 %v2501_v52, %v2497_v51  ;;  %v2537_v51 = vld [vmem:[#allocation12 + $0x9d8] sm:$0xff] }
 0x234   : > { %v4885_v2 = vpack.c.bf16 %v2498_v58, %v2494_v57  ;;  %v2526_v42 = vld [vmem:[#allocation12 + $0x980] sm:$0xff]  ;;  %v2541_v52 = vld [vmem:[#allocation12 + $0x9f8] sm:$0xff] }
 0x235   : > { %4722 = vmatpush1.bf16.msra.mxu0 %v4721_v9  ;;  %v4741_v9 = vpack.c.bf16 %v1834_v60, %v1830_v1  ;;  %v2505_v1 = vld [vmem:[#allocation12 + $0x8d8] sm:$0xff]  ;;  %v2530_v43 = vld [vmem:[#allocation12 + $0x9a0] sm:$0xff] }
 0x236   : > { %4850 = vmatpush1.bf16.msra.mxu1 %v4849_v10  ;;  %4724 = vmatprep.subr.bf16.mxu0 %v4723_v13  ;;  %v1838_v10 = vld [vmem:[#allocation9 + $0x17c0] sm:$0xff] }
 0x237   : > { %4852 = vmatprep.subr.bf16.mxu1 %v4851_v17  ;;  %v1842_v13 = vld [vmem:[#allocation9 + $0x17e0] sm:$0xff]  ;;  %v1583_v17 = vld [vmem:[#allocation2 + $0x10] sm:$0xfc] }
 0x238   : > { %v1861_v25 = vrot.slane %v1583_v17, 2  ;;  %v2509_v60 = vld [vmem:[#allocation12 + $0x8f8] sm:$0xff]  ;;  %v2534_v57 = vld [vmem:[#allocation12 + $0x9c0] sm:$0xff] }
 0x239   : > { %4726 = vmatpush1.bf16.msra.mxu0 %v4725_v22  ;;  %v2481_v22 = vld [vmem:[#allocation12 + $0x818] sm:$0xff]  ;;  %v5015_v8 = vpack.c.bf16 %v2509_v60, %v2505_v1  ;;  %v2538_v58 = vld [vmem:[#allocation12 + $0x9e0] sm:$0xff] }
 0x23a   : > { %4854 = vmatpush1.bf16.msra.mxu1 %v4853_v23  ;;  %4728 = vmatprep.subr.bf16.mxu0 %v4727_v26  ;;  %v2485_v23 = vld [vmem:[#allocation12 + $0x838] sm:$0xff]  ;;  %v4745_v26 = vpack.c.bf16 %v1842_v13, %v1838_v10  ;;  %v1863_v39 = vsel %vm1854_vm2, %v1861_v25, %v1862_v27  ;;  %v2511_v10 = vld [vmem:[#allocation12 + $0x908] sm:$0xff] }
 0x23b   : > { %4856 = vmatprep.subr.bf16.mxu1 %v4855_v29  ;;  %v4875_v29 = vpack.c.bf16 %v2483_v21, %v2479_v20  ;;  %v5003_v33 = vpack.c.bf16 %v2485_v23, %v2481_v22  ;;  %v2515_v13 = vld [vmem:[#allocation12 + $0x928] sm:$0xff]  ;;  %v2512_v20 = vld [vmem:[#allocation12 + $0x910] sm:$0xff]  ;;  %v2521_v25 = vld [vmem:[#allocation12 + $0x958] sm:$0xff] }
 0x23c   : > { %v4891_v18 = vpack.c.bf16 %v2515_v13, %v2511_v10  ;;  %v2516_v22 = vld [vmem:[#allocation12 + $0x930] sm:$0xff]  ;;  %v2519_v23 = vld [vmem:[#allocation12 + $0x948] sm:$0xff]  ;;  %v2525_v27 = vld [vmem:[#allocation12 + $0x978] sm:$0xff] }
 0x23d   : > { %4730 = vmatpush1.bf16.msra.mxu0 %v4729_v35  ;;  %v2487_v35 = vld [vmem:[#allocation12 + $0x848] sm:$0xff]  ;;  %v2545_v1 = vld [vmem:[#allocation12 + $0xa18] sm:$0xff] }
 0x23e   : > { %4858 = vmatpush1.bf16.msra.mxu1 %v4857_v36  ;;  %4732 = vmatprep.subr.bf16.mxu0 %v4731_v37  ;;  %v2491_v36 = vld [vmem:[#allocation12 + $0x868] sm:$0xff]  ;;  %v2489_v37 = vld [vmem:[#allocation12 + $0x858] sm:$0xff] }
 0x23f   : > { %4860 = vmatprep.subr.bf16.mxu1 %v4859_v41  ;;  %v5005_v41 = vpack.c.bf16 %v2484_v34, %v2480_v32  ;;  %v4879_v47 = vpack.c.bf16 %v2491_v36, %v2487_v35  ;;  %v5007_v46 = vpack.c.bf16 %v2493_v38, %v2489_v37  ;;  %v2522_v32 = vld [vmem:[#allocation12 + $0x960] sm:$0xff]  ;;  %v5023_v34 = vpack.c.bf16 %v2525_v27, %v2521_v25  ;;  %v2524_v35 = vld [vmem:[#allocation12 + $0x970] sm:$0xff]  ;;  %v2527_v36 = vld [vmem:[#allocation12 + $0x988] sm:$0xff] }
 0x240   : > { %v2531_v37 = vld [vmem:[#allocation12 + $0x9a8] sm:$0xff]  ;;  %v2529_v38 = vld [vmem:[#allocation12 + $0x998] sm:$0xff] }
 0x241   : > { %4734 = vmatpush1.bf16.msra.mxu0 %v4733_v48  ;;  %v2492_v48 = vld [vmem:[#allocation12 + $0x870] sm:$0xff]  ;;  %v2549_v60 = vld [vmem:[#allocation12 + $0xa38] sm:$0xff]  ;;  %v2551_v10 = vld [vmem:[#allocation12 + $0xa48] sm:$0xff] }
 0x242   : > { %4862 = vmatpush1.bf16.msra.mxu1 %v4861_v49  ;;  %4736 = vmatprep.subr.bf16.mxu0 %v4735_v50  ;;  %v2495_v49 = vld [vmem:[#allocation12 + $0x888] sm:$0xff]  ;;  %v2561_v25 = vld [vmem:[#allocation12 + $0xa98] sm:$0xff] }
 0x243   : > { %4864 = vmatprep.subr.bf16.mxu1 %v4863_v55  ;;  %v2499_v50 = vld [vmem:[#allocation12 + $0x8a8] sm:$0xff]  ;;  %v5009_v55 = vpack.c.bf16 %v2492_v48, %v2488_v44  ;;  %v2528_v44 = vld [vmem:[#allocation12 + $0x990] sm:$0xff]  ;;  %v2565_v27 = vld [vmem:[#allocation12 + $0xab8] sm:$0xff] }
 0x244   : > { %v4883_v56 = vpack.c.bf16 %v2499_v50, %v2495_v49  ;;  %v2532_v48 = vld [vmem:[#allocation12 + $0x9b0] sm:$0xff]  ;;  %v2535_v49 = vld [vmem:[#allocation12 + $0x9c8] sm:$0xff] }
 0x245   : > { %4738 = vmatpush1.bf16.msra.mxu0 %v4737_v62  ;;  %v2500_v62 = vld [vmem:[#allocation12 + $0x8b0] sm:$0xff]  ;;  %v2539_v50 = vld [vmem:[#allocation12 + $0x9e8] sm:$0xff] }
 0x246   : > { %4866 = vmatpush1.bf16.msra.mxu1 %v4865_v63  ;;  %4740 = vmatprep.subr.bf16.mxu0 %v4739_v0  ;;  %v2503_v63 = vld [vmem:[#allocation12 + $0x8c8] sm:$0xff] }
 0x247   : > { %4868 = vmatprep.subr.bf16.mxu1 %v4867_v3  ;;  %v2507_v0 = vld [vmem:[#allocation12 + $0x8e8] sm:$0xff]  ;;  %v5013_v3 = vpack.c.bf16 %v2500_v62, %v2496_v59  ;;  %v2536_v59 = vld [vmem:[#allocation12 + $0x9d0] sm:$0xff] }
 0x248   : > { %v4887_v4 = vpack.c.bf16 %v2507_v0, %v2503_v63  ;;  %v2540_v62 = vld [vmem:[#allocation12 + $0x9f0] sm:$0xff]  ;;  %v2543_v63 = vld [vmem:[#allocation12 + $0xa08] sm:$0xff] }
 0x249   : > { %4742 = vmatpush1.bf16.msra.mxu0 %v4741_v9  ;;  %v2508_v9 = vld [vmem:[#allocation12 + $0x8f0] sm:$0xff]  ;;  %v2547_v0 = vld [vmem:[#allocation12 + $0xa28] sm:$0xff] }
 0x24a   : > { %4870 = vmatpush1.bf16.msra.mxu1 %v4869_v14  ;;  %4744 = vmatprep.subr.bf16.mxu0 %v4743_v15  ;;  %v2513_v14 = vld [vmem:[#allocation12 + $0x918] sm:$0xff]  ;;  %v5017_v17 = vpack.c.bf16 %v2508_v9, %v2504_v7  ;;  %v2544_v7 = vld [vmem:[#allocation12 + $0xa10] sm:$0xff]  ;;  %v2555_v13 = vld [vmem:[#allocation12 + $0xa68] sm:$0xff] }
 0x24b   : > { %4872 = vmatprep.subr.bf16.mxu1 %v4871_v24  ;;  %v2517_v15 = vld [vmem:[#allocation12 + $0x938] sm:$0xff]  ;;  %v2510_v24 = vld [vmem:[#allocation12 + $0x900] sm:$0xff]  ;;  %v2548_v9 = vld [vmem:[#allocation12 + $0xa30] sm:$0xff] }
 0x24c   : > { %v5019_v21 = vpack.c.bf16 %v2517_v15, %v2513_v14  ;;  %v2553_v14 = vld [vmem:[#allocation12 + $0xa58] sm:$0xff] }
 0x24d   : > { %4746 = vmatpush1.bf16.msra.mxu0 %v4745_v26  ;;  %v2523_v26 = vld [vmem:[#allocation12 + $0x968] sm:$0xff]  ;;  %v2557_v15 = vld [vmem:[#allocation12 + $0xa78] sm:$0xff] }
 0x24e   : > { %4874 = vmatpush1.bf16.msra.mxu1 %v4873_v28  ;;  %4876 = vmatprep.subr.bf16.mxu0 %v4875_v29  ;;  %v4893_v28 = vpack.c.bf16 %v2514_v19, %v2510_v24  ;;  %v5021_v29 = vpack.c.bf16 %v2516_v22, %v2512_v20  ;;  %v4895_v30 = vpack.c.bf16 %v2523_v26, %v2519_v23  ;;  %v2550_v24 = vld [vmem:[#allocation12 + $0xa40] sm:$0xff]  ;;  %v2552_v20 = vld [vmem:[#allocation12 + $0xa50] sm:$0xff]  ;;  %v2559_v23 = vld [vmem:[#allocation12 + $0xa88] sm:$0xff] }
 0x24f   : > { %5004 = vmatprep.subr.bf16.mxu1 %v5003_v33  ;;  %v2520_v33 = vld [vmem:[#allocation12 + $0x950] sm:$0xff]  ;;  %v2554_v19 = vld [vmem:[#allocation12 + $0xa60] sm:$0xff]  ;;  %v2563_v26 = vld [vmem:[#allocation12 + $0xaa8] sm:$0xff] }
 0x250   : > { %2007 = vmatmul.mubr.f32.vlgmr.msra.gmra.mrb[0].mxu0 %v1863_v39  ;;  %v2556_v22 = vld [vmem:[#allocation12 + $0xa70] sm:$0xff] }
 0x251   : > { %2149 = vmatmul.mubr.f32.vlgmr.msra.gmra.mrb[0].mxu1 %v1863_v39  ;;  %4878 = vmatpush1.bf16.msra.mxu0 %v4877_v40  ;;  %v2533_v39 = vld [vmem:[#allocation12 + $0x9b8] sm:$0xff]  ;;  %v4897_v40 = vpack.c.bf16 %v2522_v32, %v2518_v31  ;;  %v2558_v31 = vld [vmem:[#allocation12 + $0xa80] sm:$0xff] }
 0x252   : > { %5006 = vmatpush1.bf16.msra.mxu1 %v5005_v41  ;;  %4880 = vmatprep.subr.bf16.mxu0 %v4879_v47  ;;  %v5025_v41 = vpack.c.bf16 %v2524_v35, %v2520_v33  ;;  %v4899_v47 = vpack.c.bf16 %v2531_v37, %v2527_v36  ;;  %v2562_v32 = vld [vmem:[#allocation12 + $0xaa0] sm:$0xff]  ;;  %v2560_v33 = vld [vmem:[#allocation12 + $0xa90] sm:$0xff]  ;;  %v2567_v36 = vld [vmem:[#allocation12 + $0xac8] sm:$0xff] }
 0x253   : > { %5008 = vmatprep.subr.bf16.mxu1 %v5007_v46  ;;  %v5027_v46 = vpack.c.bf16 %v2533_v39, %v2529_v38  ;;  %v2564_v35 = vld [vmem:[#allocation12 + $0xab0] sm:$0xff]  ;;  %v2571_v37 = vld [vmem:[#allocation12 + $0xae8] sm:$0xff]  ;;  %v2569_v38 = vld [vmem:[#allocation12 + $0xad8] sm:$0xff] }
 0x254   : > { %v2573_v39 = vld [vmem:[#allocation12 + $0xaf8] sm:$0xff] }
 0x255   : > { %4882 = vmatpush1.bf16.msra.mxu0 %v4881_v54  ;;  %v4901_v54 = vpack.c.bf16 %v2530_v43, %v2526_v42  ;;  %v5047_v42 = vpack.c.bf16 %v2573_v39, %v2569_v38  ;;  %v2566_v43 = vld [vmem:[#allocation12 + $0xac0] sm:$0xff]  ;;  %v2607_v38 = vld [vmem:[#allocation12 + $0xc08] sm:$0xff] }
 0x256   : > { %5010 = vmatpush1.bf16.msra.mxu1 %v5009_v55  ;;  %4884 = vmatprep.subr.bf16.mxu0 %v4883_v56  ;;  %v5029_v55 = vpack.c.bf16 %v2532_v48, %v2528_v44  ;;  %v4903_v56 = vpack.c.bf16 %v2539_v50, %v2535_v49  ;;  %v2570_v44 = vld [vmem:[#allocation12 + $0xae0] sm:$0xff]  ;;  %v2572_v49 = vld [vmem:[#allocation12 + $0xaf0] sm:$0xff]  ;;  %v2611_v39 = vld [vmem:[#allocation12 + $0xc28] sm:$0xff] }
 0x257   : > { %5012 = vmatprep.subr.bf16.mxu1 %v5011_v61  ;;  %v5031_v61 = vpack.c.bf16 %v2541_v52, %v2537_v51  ;;  %v4921_v48 = vpack.c.bf16 %v2570_v44, %v2566_v43  ;;  %v2575_v51 = vld [vmem:[#allocation12 + $0xb08] sm:$0xff]  ;;  %v2159_v43 = vld [vmem:[#allocation11] sm:$0xf] }
 0x258   : > { %v2579_v52 = vld [vmem:[#allocation12 + $0xb28] sm:$0xff]  ;;  %v2164_v44 = vrot.slane %v2159_v43, %v6402_v12 }
 0x259   : > { %4886 = vmatpush1.bf16.msra.mxu0 %v4885_v2  ;;  %v4905_v2 = vpack.c.bf16 %v2538_v58, %v2534_v57  ;;  %v2574_v57 = vld [vmem:[#allocation12 + $0xb00] sm:$0xff] }
 0x25a   : > { %5014 = vmatpush1.bf16.msra.mxu1 %v5013_v3  ;;  %4888 = vmatprep.subr.bf16.mxu0 %v4887_v4  ;;  %v5033_v3 = vpack.c.bf16 %v2540_v62, %v2536_v59  ;;  %v4907_v4 = vpack.c.bf16 %v2547_v0, %v2543_v63  ;;  %v2578_v58 = vld [vmem:[#allocation12 + $0xb20] sm:$0xff]  ;;  %v2576_v62 = vld [vmem:[#allocation12 + $0xb10] sm:$0xff] }
 0x25b   : > { %5016 = vmatprep.subr.bf16.mxu1 %v5015_v8  ;;  %v5035_v8 = vpack.c.bf16 %v2549_v60, %v2545_v1  ;;  %v2580_v63 = vld [vmem:[#allocation12 + $0xb30] sm:$0xff]  ;;  %v2583_v1 = vld [vmem:[#allocation12 + $0xb48] sm:$0xff] }
 0x25c   : > { %v5053_v0 = vpack.c.bf16 %v2580_v63, %v2576_v62  ;;  %v2587_v60 = vld [vmem:[#allocation12 + $0xb68] sm:$0xff] }
 0x25d   : > { %4890 = vmatpush1.bf16.msra.mxu0 %v4889_v16  ;;  %v4909_v16 = vpack.c.bf16 %v2546_v6, %v2542_v5  ;;  %v2582_v5 = vld [vmem:[#allocation12 + $0xb40] sm:$0xff] }
 0x25e   : > { %5018 = vmatpush1.bf16.msra.mxu1 %v5017_v17  ;;  %4892 = vmatprep.subr.bf16.mxu0 %v4891_v18  ;;  %v5037_v17 = vpack.c.bf16 %v2548_v9, %v2544_v7  ;;  %v4911_v18 = vpack.c.bf16 %v2555_v13, %v2551_v10  ;;  %v2586_v6 = vld [vmem:[#allocation12 + $0xb60] sm:$0xff]  ;;  %v2584_v9 = vld [vmem:[#allocation12 + $0xb50] sm:$0xff] }
 0x25f   : > { %5020 = vmatprep.subr.bf16.mxu1 %v5019_v21  ;;  %v5039_v21 = vpack.c.bf16 %v2557_v15, %v2553_v14  ;;  %v2588_v10 = vld [vmem:[#allocation12 + $0xb70] sm:$0xff]  ;;  %v2591_v14 = vld [vmem:[#allocation12 + $0xb88] sm:$0xff] }
 0x260   : > { %v5057_v13 = vpack.c.bf16 %v2588_v10, %v2584_v9  ;;  %v2595_v15 = vld [vmem:[#allocation12 + $0xba8] sm:$0xff] }
 0x261   : > { %4894 = vmatpush1.bf16.msra.mxu0 %v4893_v28  ;;  %v4913_v28 = vpack.c.bf16 %v2554_v19, %v2550_v24  ;;  %v2590_v24 = vld [vmem:[#allocation12 + $0xb80] sm:$0xff]  ;;  %v2615_v9 = vld [vmem:[#allocation12 + $0xc48] sm:$0xff] }
 0x262   : > { %5022 = vmatpush1.bf16.msra.mxu1 %v5021_v29  ;;  %4896 = vmatprep.subr.bf16.mxu0 %v4895_v30  ;;  %v5041_v29 = vpack.c.bf16 %v2556_v22, %v2552_v20  ;;  %v4915_v30 = vpack.c.bf16 %v2563_v26, %v2559_v23  ;;  %v2594_v19 = vld [vmem:[#allocation12 + $0xba0] sm:$0xff]  ;;  %v2592_v22 = vld [vmem:[#allocation12 + $0xb90] sm:$0xff]  ;;  %v2599_v26 = vld [vmem:[#allocation12 + $0xbc8] sm:$0xff] }
 0x263   : > { %5024 = vmatprep.subr.bf16.mxu1 %v5023_v34  ;;  %v5043_v34 = vpack.c.bf16 %v2565_v27, %v2561_v25  ;;  %v2596_v23 = vld [vmem:[#allocation12 + $0xbb0] sm:$0xff]  ;;  %v2603_v27 = vld [vmem:[#allocation12 + $0xbe8] sm:$0xff] }
 0x264   : > { %v5061_v25 = vpack.c.bf16 %v2596_v23, %v2592_v22  ;;  %v2619_v10 = vld [vmem:[#allocation12 + $0xc68] sm:$0xff] }
 0x265   : > { %4898 = vmatpush1.bf16.msra.mxu0 %v4897_v40  ;;  %v4917_v40 = vpack.c.bf16 %v2562_v32, %v2558_v31  ;;  %v2598_v32 = vld [vmem:[#allocation12 + $0xbc0] sm:$0xff] }
 0x266   : > { %5026 = vmatpush1.bf16.msra.mxu1 %v5025_v41  ;;  %4900 = vmatprep.subr.bf16.mxu0 %v4899_v47  ;;  %v5045_v41 = vpack.c.bf16 %v2564_v35, %v2560_v33  ;;  %v4919_v47 = vpack.c.bf16 %v2571_v37, %v2567_v36  ;;  %v2602_v33 = vld [vmem:[#allocation12 + $0xbe0] sm:$0xff]  ;;  %v2604_v36 = vld [vmem:[#allocation12 + $0xbf0] sm:$0xff] }
 0x267   : > { %5028 = vmatprep.subr.bf16.mxu1 %v5027_v46  ;;  %v2568_v46 = vld [vmem:[#allocation12 + $0xad0] sm:$0xff]  ;;  %v4937_v35 = vpack.c.bf16 %v2602_v33, %v2598_v32  ;;  %v2623_v32 = vld [vmem:[#allocation12 + $0xc88] sm:$0xff] }
 0x268   : > { %v5049_v50 = vpack.c.bf16 %v2572_v49, %v2568_v46  ;;  %v2172_v46 = vrot.slane %v2159_v43, %v6425_v53  ;;  %v2176_v49 = vrot.slane %v2159_v43, %v6422_v45 }
 0x269   : > { %4902 = vmatpush1.bf16.msra.mxu0 %v4901_v54  ;;  %v2577_v54 = vld [vmem:[#allocation12 + $0xb18] sm:$0xff] }
 0x26a   : > { %5030 = vmatpush1.bf16.msra.mxu1 %v5029_v55  ;;  %4904 = vmatprep.subr.bf16.mxu0 %v4903_v56  ;;  %v4923_v55 = vpack.c.bf16 %v2579_v52, %v2575_v51  ;;  %v2581_v56 = vld [vmem:[#allocation12 + $0xb38] sm:$0xff] }
 0x26b   : > { %5032 = vmatprep.subr.bf16.mxu1 %v5031_v61  ;;  %v5051_v59 = vpack.c.bf16 %v2581_v56, %v2577_v54  ;;  %v4925_v61 = vpack.c.bf16 %v2578_v58, %v2574_v57 }
 0x26d   : > { %4906 = vmatpush1.bf16.msra.mxu0 %v4905_v2  ;;  %v2585_v2 = vld [vmem:[#allocation12 + $0xb58] sm:$0xff] }
 0x26e   : > { %5034 = vmatpush1.bf16.msra.mxu1 %v5033_v3  ;;  %4908 = vmatprep.subr.bf16.mxu0 %v4907_v4  ;;  %v4927_v3 = vpack.c.bf16 %v2587_v60, %v2583_v1  ;;  %v2589_v4 = vld [vmem:[#allocation12 + $0xb78] sm:$0xff] }
 0x26f   : > { %5036 = vmatprep.subr.bf16.mxu1 %v5035_v8  ;;  %v5055_v7 = vpack.c.bf16 %v2589_v4, %v2585_v2  ;;  %v4929_v8 = vpack.c.bf16 %v2586_v6, %v2582_v5  ;;  %v2610_v4 = vld [vmem:[#allocation12 + $0xc20] sm:$0xff]  ;;  %v2608_v5 = vld [vmem:[#allocation12 + $0xc10] sm:$0xff] }
 0x270   : > { %v2612_v6 = vld [vmem:[#allocation12 + $0xc30] sm:$0xff] }
 0x271   : > { %4910 = vmatpush1.bf16.msra.mxu0 %v4909_v16  ;;  %v2593_v16 = vld [vmem:[#allocation12 + $0xb98] sm:$0xff]  ;;  %v5069_v23 = vpack.c.bf16 %v2612_v6, %v2608_v5  ;;  %v2642_v5 = vld [vmem:[#allocation12 + $0xd20] sm:$0xff] }
 0x272   : > { %5038 = vmatpush1.bf16.msra.mxu1 %v5037_v17  ;;  %4912 = vmatprep.subr.bf16.mxu0 %v4911_v18  ;;  %v4931_v17 = vpack.c.bf16 %v2595_v15, %v2591_v14  ;;  %v2597_v18 = vld [vmem:[#allocation12 + $0xbb8] sm:$0xff] }
 0x273   : > { %5040 = vmatprep.subr.bf16.mxu1 %v5039_v21  ;;  %v5059_v20 = vpack.c.bf16 %v2597_v18, %v2593_v16  ;;  %v4933_v21 = vpack.c.bf16 %v2594_v19, %v2590_v24  ;;  %v2621_v14 = vld [vmem:[#allocation12 + $0xc78] sm:$0xff] }
 0x275   : > { %4914 = vmatpush1.bf16.msra.mxu0 %v4913_v28  ;;  %v2601_v28 = vld [vmem:[#allocation12 + $0xbd8] sm:$0xff] }
 0x276   : > { %5042 = vmatpush1.bf16.msra.mxu1 %v5041_v29  ;;  %4916 = vmatprep.subr.bf16.mxu0 %v4915_v30  ;;  %v2605_v29 = vld [vmem:[#allocation12 + $0xbf8] sm:$0xff]  ;;  %v4935_v30 = vpack.c.bf16 %v2603_v27, %v2599_v26  ;;  %v2614_v27 = vld [vmem:[#allocation12 + $0xc40] sm:$0xff] }
 0x277   : > { %5044 = vmatprep.subr.bf16.mxu1 %v5043_v34  ;;  %v5063_v31 = vpack.c.bf16 %v2605_v29, %v2601_v28  ;;  %v2600_v34 = vld [vmem:[#allocation12 + $0xbd0] sm:$0xff]  ;;  %v2618_v28 = vld [vmem:[#allocation12 + $0xc60] sm:$0xff] }
 0x278   : > { %v5065_v37 = vpack.c.bf16 %v2604_v36, %v2600_v34  ;;  %v4943_v34 = vpack.c.bf16 %v2619_v10, %v2615_v9  ;;  %v2627_v36 = vld [vmem:[#allocation12 + $0xca8] sm:$0xff]  ;;  %v2644_v9 = vld [vmem:[#allocation12 + $0xd30] sm:$0xff] }
 0x279   : > { %4918 = vmatpush1.bf16.msra.mxu0 %v4917_v40  ;;  %v2609_v40 = vld [vmem:[#allocation12 + $0xc18] sm:$0xff]  ;;  %v2647_v10 = vld [vmem:[#allocation12 + $0xd48] sm:$0xff] }
 0x27a   : > { %5046 = vmatpush1.bf16.msra.mxu1 %v5045_v41  ;;  %4920 = vmatprep.subr.bf16.mxu0 %v4919_v47  ;;  %v4939_v41 = vpack.c.bf16 %v2611_v39, %v2607_v38  ;;  %v2613_v47 = vld [vmem:[#allocation12 + $0xc38] sm:$0xff] }
 0x27b   : > { %5048 = vmatprep.subr.bf16.mxu1 %v5047_v42  ;;  %v5067_v42 = vpack.c.bf16 %v2613_v47, %v2609_v40  ;;  %v2629_v38 = vld [vmem:[#allocation12 + $0xcb8] sm:$0xff]  ;;  %v4945_v40 = vpack.c.bf16 %v2618_v28, %v2614_v27  ;;  %v2622_v47 = vld [vmem:[#allocation12 + $0xc80] sm:$0xff] }
 0x27c   : > { %v2661_v27 = vld [vmem:[#allocation12 + $0xdb8] sm:$0xff] }
 0x27d   : > { %4922 = vmatpush1.bf16.msra.mxu0 %v4921_v48  ;;  %v2168_v48 = vrot.slane %v2159_v43, %v6399_v11  ;;  %v4947_v43 = vpack.c.bf16 %v2627_v36, %v2623_v32  ;;  %v2663_v36 = vld [vmem:[#allocation12 + $0xdc8] sm:$0xff] }
 0x27e   : > { %5050 = vmatpush1.bf16.msra.mxu1 %v5049_v50  ;;  %4924 = vmatprep.subr.bf16.mxu0 %v4923_v55 }
 0x27f   : > { %5052 = vmatprep.subr.bf16.mxu1 %v5051_v59 }
 0x281   : > { %4926 = vmatpush1.bf16.msra.mxu0 %v4925_v61 }
 0x282   : > { %5054 = vmatpush1.bf16.msra.mxu1 %v5053_v0  ;;  %4928 = vmatprep.subr.bf16.mxu0 %v4927_v3  ;;  %v2606_v3 = vld [vmem:[#allocation12 + $0xc00] sm:$0xff] }
 0x283   : > { %5056 = vmatprep.subr.bf16.mxu1 %v5055_v7  ;;  %v4941_v22 = vpack.c.bf16 %v2610_v4, %v2606_v3  ;;  %v2638_v4 = vld [vmem:[#allocation12 + $0xd00] sm:$0xff] }
 0x285   : > { %4930 = vmatpush1.bf16.msra.mxu0 %v4929_v8 }
 0x286   : > { %5058 = vmatpush1.bf16.msra.mxu1 %v5057_v13  ;;  %4932 = vmatprep.subr.bf16.mxu0 %v4931_v17  ;;  %v2617_v13 = vld [vmem:[#allocation12 + $0xc58] sm:$0xff] }
 0x287   : > { %5060 = vmatprep.subr.bf16.mxu1 %v5059_v20 }
 0x289   : > { %4934 = vmatpush1.bf16.msra.mxu0 %v4933_v21 }
 0x28a   : > { %5062 = vmatpush1.bf16.msra.mxu1 %v5061_v25  ;;  %4936 = vmatprep.subr.bf16.mxu0 %v4935_v30  ;;  %v2616_v30 = vld [vmem:[#allocation12 + $0xc50] sm:$0xff] }
 0x28b   : > { %5064 = vmatprep.subr.bf16.mxu1 %v5063_v31  ;;  %v2620_v31 = vld [vmem:[#allocation12 + $0xc70] sm:$0xff] }
 0x28d   : > { %4938 = vmatpush1.bf16.msra.mxu0 %v4937_v35  ;;  %v5071_v35 = vpack.c.bf16 %v2621_v14, %v2617_v13  ;;  %v2651_v13 = vld [vmem:[#allocation12 + $0xd68] sm:$0xff]  ;;  %v2649_v14 = vld [vmem:[#allocation12 + $0xd58] sm:$0xff] }
 0x28e   : > { %5066 = vmatpush1.bf16.msra.mxu1 %v5065_v37  ;;  %4940 = vmatprep.subr.bf16.mxu0 %v4939_v41  ;;  %v2625_v37 = vld [vmem:[#allocation12 + $0xc98] sm:$0xff]  ;;  %v5073_v41 = vpack.c.bf16 %v2620_v31, %v2616_v30  ;;  %v2654_v30 = vld [vmem:[#allocation12 + $0xd80] sm:$0xff] }
 0x28f   : > { %5068 = vmatprep.subr.bf16.mxu1 %v5067_v42  ;;  %v2626_v42 = vld [vmem:[#allocation12 + $0xca0] sm:$0xff] }
 0x290   : > { %v2658_v31 = vld [vmem:[#allocation12 + $0xda0] sm:$0xff] }
 0x323   : > { %v2008_v50 = vpop.f32.mrb[0].mxu0 }
 0x324   : > { %v2181_v51 = vadd.f32 %v2164_v44, %v2008_v50  ;;  %v2150_v52 = vpop.f32.mrb[0].mxu1  ;;  %v2010_v54 = vpop.f32.mrb[1].mxu0  ;;  %v5075_v44 = vpack.c.bf16 %v2629_v38, %v2625_v37  ;;  %v2635_v50 = vld [vmem:[#allocation12 + $0xce8] sm:$0xff]  ;;  %v2665_v38 = vld [vmem:[#allocation12 + $0xdd8] sm:$0xff] }
 0x325   : > { %v2183_v55 = vadd.f32 %v2172_v46, %v2150_v52  ;;  %v2182_v56 = vadd.f32 %v2168_v48, %v2010_v54  ;;  %v2152_v57 = vpop.f32.mrb[1].mxu1  ;;  %v2624_v46 = vld [vmem:[#allocation12 + $0xc90] sm:$0xff]  ;;  %v2637_v52 = vld [vmem:[#allocation12 + $0xcf8] sm:$0xff]  ;;  %v4949_v54 = vpack.c.bf16 %v2626_v42, %v2622_v47  ;;  %v2667_v37 = vld [vmem:[#allocation12 + $0xde8] sm:$0xff] }
 0x326   : > { %v2185_v58 = vmax.f32 %v2181_v51, 0.0  ;;  %v2184_v59 = vadd.f32 %v2176_v49, %v2152_v57  ;;  %v2628_v48 = vld [vmem:[#allocation12 + $0xcb0] sm:$0xff]  ;;  %v2631_v49 = vld [vmem:[#allocation12 + $0xcc8] sm:$0xff]  ;;  %v2633_v51 = vld [vmem:[#allocation12 + $0xcd8] sm:$0xff] }
 0x327   : > { %v2187_v61 = vmax.f32 %v2183_v55, 0.0  ;;  %v2186_v62 = vmax.f32 %v2182_v56, 0.0  ;;  %v5077_v55 = vpack.c.bf16 %v2628_v48, %v2624_v46  ;;  %v2630_v56 = vld [vmem:[#allocation12 + $0xcc0] sm:$0xff]  ;;  %v2664_v46 = vld [vmem:[#allocation12 + $0xdd0] sm:$0xff] }
 0x328   : > { %v2193_v63 = vrot.slane %v2185_v58, 7  ;;  %v2188_v0 = vmax.f32 %v2184_v59, 0.0  ;;  %v2634_v57 = vld [vmem:[#allocation12 + $0xce0] sm:$0xff]  ;;  %v4951_v58 = vpack.c.bf16 %v2635_v50, %v2631_v49  ;;  %v5079_v59 = vpack.c.bf16 %v2637_v52, %v2633_v51  ;;  %v2668_v48 = vld [vmem:[#allocation12 + $0xdf0] sm:$0xff]  ;;  %v2671_v49 = vld [vmem:[#allocation12 + $0xe08] sm:$0xff] }
 0x329   : > { %v2195_v1 = vrot.slane %v2187_v61, 7  ;;  %v2194_v60 = vrot.slane %v2186_v62, 7  ;;  %v2632_v61 = vld [vmem:[#allocation12 + $0xcd0] sm:$0xff]  ;;  %v2662_v47 = vld [vmem:[#allocation12 + $0xdc0] sm:$0xff]  ;;  %v2675_v50 = vld [vmem:[#allocation12 + $0xe28] sm:$0xff] }
 0x32a   : > { %2201 = vst [vmem:[#allocation2] sm:$0xfe] %v2193_v63  ;;  %2205 = vst [vmem:[#allocation2 + $0x20] sm:$0x1] %v2193_v63  ;;  %v2196_v2 = vrot.slane %v2188_v0, 7  ;;  %v2636_v62 = vld [vmem:[#allocation12 + $0xcf0] sm:$0xff] }
 0x32b   : > { %2203 = vst [vmem:[#allocation2 + $0x10] sm:$0xfe] %v2195_v1  ;;  %2207 = vst [vmem:[#allocation2 + $0x30] sm:$0x1] %v2195_v1  ;;  %v2639_v63 = vld [vmem:[#allocation12 + $0xd08] sm:$0xff]  ;;  %v2641_v1 = vld [vmem:[#allocation12 + $0xd18] sm:$0xff]  ;;  %v5081_v3 = vpack.c.bf16 %v2636_v62, %v2632_v61 }
 0x32c   : > { %2202 = vst [vmem:[#allocation2 + $0x8] sm:$0xfe] %v2194_v60  ;;  %2206 = vst [vmem:[#allocation2 + $0x28] sm:$0x1] %v2194_v60  ;;  %v2643_v0 = vld [vmem:[#allocation12 + $0xd28] sm:$0xff]  ;;  %v2645_v60 = vld [vmem:[#allocation12 + $0xd38] sm:$0xff] }
 0x32d   : > { %2204 = vst [vmem:[#allocation2 + $0x18] sm:$0xfe] %v2196_v2  ;;  %2208 = vst [vmem:[#allocation2 + $0x38] sm:$0x1] %v2196_v2  ;;  %v4953_v2 = vpack.c.bf16 %v2634_v57, %v2630_v56  ;;  %v4955_v6 = vpack.c.bf16 %v2643_v0, %v2639_v63  ;;  %v2666_v42 = vld [vmem:[#allocation12 + $0xde0] sm:$0xff]  ;;  %v2673_v51 = vld [vmem:[#allocation12 + $0xe18] sm:$0xff] }
 0x32e   : > { %v2677_v52 = vld [vmem:[#allocation12 + $0xe38] sm:$0xff]  ;;  %v2670_v56 = vld [vmem:[#allocation12 + $0xe00] sm:$0xff]  ;;  %v2672_v61 = vld [vmem:[#allocation12 + $0xe10] sm:$0xff] }
 0x32f   : > { %v2674_v57 = vld [vmem:[#allocation12 + $0xe20] sm:$0xff]  ;;  %v2676_v62 = vld [vmem:[#allocation12 + $0xe30] sm:$0xff]  ;;  %v2679_v63 = vld [vmem:[#allocation12 + $0xe48] sm:$0xff] }
 0x330   : > { %v2683_v0 = vld [vmem:[#allocation12 + $0xe68] sm:$0xff] }
 0x331   : > { %v2469_v7 = vld [vmem:[#allocation2] sm:$0xfe]  ;;  %v2473_v8 = vld [vmem:[#allocation2 + $0x20] sm:$0x1] }
 0x332   : > { %v2742_v17 = vrot.slane %v2469_v7, 1  ;;  %v2743_v18 = vrot.slane %v2473_v8, 1  ;;  %v5083_v7 = vpack.c.bf16 %v2645_v60, %v2641_v1  ;;  %v2640_v8 = vld [vmem:[#allocation12 + $0xd10] sm:$0xff]  ;;  %v2681_v1 = vld [vmem:[#allocation12 + $0xe58] sm:$0xff] }
 0x333   : > { %v2470_v15 = vld [vmem:[#allocation2 + $0x8] sm:$0xfe]  ;;  %v2474_v16 = vld [vmem:[#allocation2 + $0x28] sm:$0x1] }
 0x334   : > { %v2745_v24 = vrot.slane %v2470_v15, 1  ;;  %v2746_v19 = vrot.slane %v2474_v16, 1  ;;  %v2472_v20 = vld [vmem:[#allocation2 + $0x18] sm:$0xfe]  ;;  %v2476_v21 = vld [vmem:[#allocation2 + $0x38] sm:$0x1]  ;;  %v2744_v33 = vsel %vm996_vm1, %v2742_v17, %v2743_v18  ;;  %v4957_v16 = vpack.c.bf16 %v2642_v5, %v2638_v4 }
 0x335   : > { %v2751_v26 = vrot.slane %v2472_v20, 1  ;;  %v2752_v25 = vrot.slane %v2476_v21, 1  ;;  %v2653_v15 = vld [vmem:[#allocation12 + $0xd78] sm:$0xff]  ;;  %v5085_v17 = vpack.c.bf16 %v2644_v9, %v2640_v8  ;;  %v2646_v18 = vld [vmem:[#allocation12 + $0xd40] sm:$0xff]  ;;  %v2648_v21 = vld [vmem:[#allocation12 + $0xd50] sm:$0xff] }
 0x336   : > { %v2747_v29 = vsel %vm996_vm1, %v2745_v24, %v2746_v19  ;;  %v2650_v24 = vld [vmem:[#allocation12 + $0xd60] sm:$0xff]  ;;  %v4959_v19 = vpack.c.bf16 %v2651_v13, %v2647_v10  ;;  %v5087_v20 = vpack.c.bf16 %v2653_v15, %v2649_v14  ;;  %v2685_v60 = vld [vmem:[#allocation12 + $0xe78] sm:$0xff]  ;;  %v2680_v8 = vld [vmem:[#allocation12 + $0xe50] sm:$0xff] }
 0x337   : > { %2822 = vmatprep.mubr.f32.mxu0 %v2747_v29  ;;  %2964 = vmatprep.mubr.f32.mxu1 %v2747_v29  ;;  %v2753_v39 = vsel %vm996_vm1, %v2751_v26, %v2752_v25  ;;  %v2659_v26 = vld [vmem:[#allocation12 + $0xda8] sm:$0xff]  ;;  %v2657_v25 = vld [vmem:[#allocation12 + $0xd98] sm:$0xff]  ;;  %v4961_v28 = vpack.c.bf16 %v2650_v24, %v2646_v18  ;;  %v2678_v4 = vld [vmem:[#allocation12 + $0xe40] sm:$0xff] }
 0x338   : > { %2823 = vmatmul.mubr.f32.vlgmr.msra.gmra.mrb[2].mxu0 %v2744_v33  ;;  %2965 = vmatmul.mubr.f32.vlgmr.msra.gmra.mrb[2].mxu1 %v2744_v33  ;;  %v5091_v33 = vpack.c.bf16 %v2661_v27, %v2657_v25  ;;  %v2682_v5 = vld [vmem:[#allocation12 + $0xe60] sm:$0xff]  ;;  %v2684_v9 = vld [vmem:[#allocation12 + $0xe70] sm:$0xff]  ;;  %v2687_v10 = vld [vmem:[#allocation12 + $0xe88] sm:$0xff] }
 0x339   : > { %4942 = vmatpush1.bf16.msra.mxu0 %v4941_v22  ;;  %5070 = vmatpush1.bf16.msra.mxu1 %v5069_v23  ;;  %v2652_v22 = vld [vmem:[#allocation12 + $0xd70] sm:$0xff]  ;;  %v2655_v23 = vld [vmem:[#allocation12 + $0xd88] sm:$0xff]  ;;  %v2689_v14 = vld [vmem:[#allocation12 + $0xe98] sm:$0xff] }
 0x33a   : > { %2893 = vmatprep.mubr.f32.mxu0 %v2753_v39  ;;  %3035 = vmatprep.mubr.f32.mxu1 %v2753_v39  ;;  %v5089_v29 = vpack.c.bf16 %v2652_v22, %v2648_v21  ;;  %v4963_v32 = vpack.c.bf16 %v2659_v26, %v2655_v23  ;;  %v2669_v39 = vld [vmem:[#allocation12 + $0xdf8] sm:$0xff]  ;;  %v2691_v13 = vld [vmem:[#allocation12 + $0xea8] sm:$0xff]  ;;  %v2686_v18 = vld [vmem:[#allocation12 + $0xe80] sm:$0xff] }
 0x33b   : > { %4944 = vmatprep.subr.bf16.mxu0 %v4943_v34  ;;  %5072 = vmatprep.subr.bf16.mxu1 %v5071_v35  ;;  %v2656_v34 = vld [vmem:[#allocation12 + $0xd90] sm:$0xff]  ;;  %v2693_v15 = vld [vmem:[#allocation12 + $0xeb8] sm:$0xff]  ;;  %v2690_v24 = vld [vmem:[#allocation12 + $0xea0] sm:$0xff] }
 0x33c   : > { %v2660_v35 = vld [vmem:[#allocation12 + $0xdb0] sm:$0xff]  ;;  %v2695_v23 = vld [vmem:[#allocation12 + $0xec8] sm:$0xff]  ;;  %v2697_v25 = vld [vmem:[#allocation12 + $0xed8] sm:$0xff] }
 0x33d   : > { %4946 = vmatpush1.bf16.msra.mxu0 %v4945_v40  ;;  %5074 = vmatpush1.bf16.msra.mxu1 %v5073_v41  ;;  %v4965_v40 = vpack.c.bf16 %v2658_v31, %v2654_v30  ;;  %v5093_v41 = vpack.c.bf16 %v2660_v35, %v2656_v34  ;;  %v2688_v21 = vld [vmem:[#allocation12 + $0xe90] sm:$0xff]  ;;  %v2699_v26 = vld [vmem:[#allocation12 + $0xee8] sm:$0xff]  ;;  %v2701_v27 = vld [vmem:[#allocation12 + $0xef8] sm:$0xff] }
 0x33e   : > { %4948 = vmatprep.subr.bf16.mxu0 %v4947_v43  ;;  %5076 = vmatprep.subr.bf16.mxu1 %v5075_v44  ;;  %v4967_v43 = vpack.c.bf16 %v2667_v37, %v2663_v36  ;;  %v5095_v44 = vpack.c.bf16 %v2669_v39, %v2665_v38  ;;  %v2692_v22 = vld [vmem:[#allocation12 + $0xeb0] sm:$0xff]  ;;  %v2694_v30 = vld [vmem:[#allocation12 + $0xec0] sm:$0xff]  ;;  %v2703_v36 = vld [vmem:[#allocation12 + $0xf08] sm:$0xff] }
 0x33f   : > { %v2698_v31 = vld [vmem:[#allocation12 + $0xee0] sm:$0xff]  ;;  %v2696_v34 = vld [vmem:[#allocation12 + $0xed0] sm:$0xff]  ;;  %v2707_v37 = vld [vmem:[#allocation12 + $0xf28] sm:$0xff] }
 0x340   : > { %v2700_v35 = vld [vmem:[#allocation12 + $0xef0] sm:$0xff]  ;;  %v2705_v38 = vld [vmem:[#allocation12 + $0xf18] sm:$0xff] }
 0x341   : > { %4950 = vmatpush1.bf16.msra.mxu0 %v4949_v54  ;;  %5078 = vmatpush1.bf16.msra.mxu1 %v5077_v55  ;;  %v4969_v54 = vpack.c.bf16 %v2666_v42, %v2662_v47  ;;  %v5097_v55 = vpack.c.bf16 %v2668_v48, %v2664_v46  ;;  %v2709_v39 = vld [vmem:[#allocation12 + $0xf38] sm:$0xff]  ;;  %v2702_v47 = vld [vmem:[#allocation12 + $0xf00] sm:$0xff]  ;;  %v2704_v46 = vld [vmem:[#allocation12 + $0xf10] sm:$0xff] }
 0x342   : > { %4952 = vmatprep.subr.bf16.mxu0 %v4951_v58  ;;  %5080 = vmatprep.subr.bf16.mxu1 %v5079_v59  ;;  %v4971_v58 = vpack.c.bf16 %v2675_v50, %v2671_v49  ;;  %v5099_v59 = vpack.c.bf16 %v2677_v52, %v2673_v51  ;;  %v2706_v42 = vld [vmem:[#allocation12 + $0xf20] sm:$0xff]  ;;  %v2708_v48 = vld [vmem:[#allocation12 + $0xf30] sm:$0xff]  ;;  %v2711_v49 = vld [vmem:[#allocation12 + $0xf48] sm:$0xff] }
 0x343   : > { %v2715_v50 = vld [vmem:[#allocation12 + $0xf68] sm:$0xff]  ;;  %v2713_v51 = vld [vmem:[#allocation12 + $0xf58] sm:$0xff] }
 0x344   : > { %v2717_v52 = vld [vmem:[#allocation12 + $0xf78] sm:$0xff] }
 0x345   : > { %4954 = vmatpush1.bf16.msra.mxu0 %v4953_v2  ;;  %5082 = vmatpush1.bf16.msra.mxu1 %v5081_v3  ;;  %v4973_v2 = vpack.c.bf16 %v2674_v57, %v2670_v56  ;;  %v5101_v3 = vpack.c.bf16 %v2676_v62, %v2672_v61  ;;  %v2710_v56 = vld [vmem:[#allocation12 + $0xf40] sm:$0xff]  ;;  %v2712_v61 = vld [vmem:[#allocation12 + $0xf50] sm:$0xff] }
 0x346   : > { %4956 = vmatprep.subr.bf16.mxu0 %v4955_v6  ;;  %5084 = vmatprep.subr.bf16.mxu1 %v5083_v7  ;;  %v4975_v6 = vpack.c.bf16 %v2683_v0, %v2679_v63  ;;  %v5103_v7 = vpack.c.bf16 %v2685_v60, %v2681_v1  ;;  %v2714_v57 = vld [vmem:[#allocation12 + $0xf60] sm:$0xff]  ;;  %v2716_v62 = vld [vmem:[#allocation12 + $0xf70] sm:$0xff]  ;;  %v2719_v63 = vld [vmem:[#allocation12 + $0xf88] sm:$0xff] }
 0x347   : > { %v2723_v0 = vld [vmem:[#allocation12 + $0xfa8] sm:$0xff]  ;;  %v2721_v1 = vld [vmem:[#allocation12 + $0xf98] sm:$0xff] }
 0x348   : > { %v2725_v60 = vld [vmem:[#allocation12 + $0xfb8] sm:$0xff] }
 0x349   : > { %4958 = vmatpush1.bf16.msra.mxu0 %v4957_v16  ;;  %5086 = vmatpush1.bf16.msra.mxu1 %v5085_v17  ;;  %v4977_v16 = vpack.c.bf16 %v2682_v5, %v2678_v4  ;;  %v5105_v17 = vpack.c.bf16 %v2684_v9, %v2680_v8  ;;  %v2718_v4 = vld [vmem:[#allocation12 + $0xf80] sm:$0xff]  ;;  %v2720_v8 = vld [vmem:[#allocation12 + $0xf90] sm:$0xff] }
 0x34a   : > { %4960 = vmatprep.subr.bf16.mxu0 %v4959_v19  ;;  %5088 = vmatprep.subr.bf16.mxu1 %v5087_v20  ;;  %v4979_v19 = vpack.c.bf16 %v2691_v13, %v2687_v10  ;;  %v5107_v20 = vpack.c.bf16 %v2693_v15, %v2689_v14  ;;  %v2722_v5 = vld [vmem:[#allocation12 + $0xfa0] sm:$0xff]  ;;  %v2724_v9 = vld [vmem:[#allocation12 + $0xfb0] sm:$0xff]  ;;  %v2727_v10 = vld [vmem:[#allocation12 + $0xfc8] sm:$0xff] }
 0x34b   : > { %v2731_v13 = vld [vmem:[#allocation12 + $0xfe8] sm:$0xff]  ;;  %v2729_v14 = vld [vmem:[#allocation12 + $0xfd8] sm:$0xff] }
 0x34c   : > { %v2733_v15 = vld [vmem:[#allocation12 + $0xff8] sm:$0xff] }
 0x34d   : > { %4962 = vmatpush1.bf16.msra.mxu0 %v4961_v28  ;;  %5090 = vmatpush1.bf16.msra.mxu1 %v5089_v29  ;;  %v4981_v28 = vpack.c.bf16 %v2690_v24, %v2686_v18  ;;  %v5109_v29 = vpack.c.bf16 %v2692_v22, %v2688_v21  ;;  %v2726_v18 = vld [vmem:[#allocation12 + $0xfc0] sm:$0xff]  ;;  %v2728_v21 = vld [vmem:[#allocation12 + $0xfd0] sm:$0xff] }
 0x34e   : > { %4964 = vmatprep.subr.bf16.mxu0 %v4963_v32  ;;  %5092 = vmatprep.subr.bf16.mxu1 %v5091_v33  ;;  %v4983_v32 = vpack.c.bf16 %v2699_v26, %v2695_v23  ;;  %v5111_v33 = vpack.c.bf16 %v2701_v27, %v2697_v25  ;;  %v2730_v24 = vld [vmem:[#allocation12 + $0xfe0] sm:$0xff]  ;;  %v2732_v22 = vld [vmem:[#allocation12 + $0xff0] sm:$0xff]  ;;  %v2214_v23 = vld [vmem:[#allocation12 + $0x8] sm:$0xff] }
 0x34f   : > { %v2218_v26 = vld [vmem:[#allocation12 + $0x28] sm:$0xff]  ;;  %v2216_v25 = vld [vmem:[#allocation12 + $0x18] sm:$0xff] }
 0x350   : > { %v2220_v27 = vld [vmem:[#allocation12 + $0x38] sm:$0xff] }
 0x351   : > { %4966 = vmatpush1.bf16.msra.mxu0 %v4965_v40  ;;  %5094 = vmatpush1.bf16.msra.mxu1 %v5093_v41  ;;  %v4985_v40 = vpack.c.bf16 %v2698_v31, %v2694_v30  ;;  %v5113_v41 = vpack.c.bf16 %v2700_v35, %v2696_v34  ;;  %v5001_v30 = vpack.c.bf16 %v2730_v24, %v2726_v18  ;;  %v2213_v34 = vld [vmem:[#allocation12] sm:$0xff]  ;;  %v2246_v18 = vld [vmem:[#allocation12 + $0x108] sm:$0xff] }
 0x352   : > { %4968 = vmatprep.subr.bf16.mxu0 %v4967_v43  ;;  %5096 = vmatprep.subr.bf16.mxu1 %v5095_v44  ;;  %v4987_v43 = vpack.c.bf16 %v2707_v37, %v2703_v36  ;;  %v5115_v44 = vpack.c.bf16 %v2709_v39, %v2705_v38  ;;  %v5129_v31 = vpack.c.bf16 %v2732_v22, %v2728_v21  ;;  %v2217_v35 = vld [vmem:[#allocation12 + $0x20] sm:$0xff]  ;;  %v2215_v38 = vld [vmem:[#allocation12 + $0x10] sm:$0xff]  ;;  %v2250_v24 = vld [vmem:[#allocation12 + $0x128] sm:$0xff] }
 0x353   : > { %v2219_v39 = vld [vmem:[#allocation12 + $0x30] sm:$0xff] }
 0x355   : > { %4970 = vmatpush1.bf16.msra.mxu0 %v4969_v54  ;;  %5098 = vmatpush1.bf16.msra.mxu1 %v5097_v55  ;;  %v4989_v54 = vpack.c.bf16 %v2706_v42, %v2702_v47  ;;  %v5117_v55 = vpack.c.bf16 %v2708_v48, %v2704_v46  ;;  %v2224_v47 = vld [vmem:[#allocation12 + $0x58] sm:$0xff]  ;;  %v2221_v46 = vld [vmem:[#allocation12 + $0x40] sm:$0xff] }
 0x356   : > { %4972 = vmatprep.subr.bf16.mxu0 %v4971_v58  ;;  %5100 = vmatprep.subr.bf16.mxu1 %v5099_v59  ;;  %v4991_v58 = vpack.c.bf16 %v2715_v50, %v2711_v49  ;;  %v5119_v59 = vpack.c.bf16 %v2717_v52, %v2713_v51  ;;  %v2228_v42 = vld [vmem:[#allocation12 + $0x78] sm:$0xff]  ;;  %v2225_v48 = vld [vmem:[#allocation12 + $0x60] sm:$0xff]  ;;  %v2223_v49 = vld [vmem:[#allocation12 + $0x50] sm:$0xff] }
 0x357   : > { %v5263_v52 = vpack.c.bf16 %v2228_v42, %v2224_v47  ;;  %v2262_v47 = vld [vmem:[#allocation12 + $0x188] sm:$0xff] }
 0x358   : > { %v2266_v42 = vld [vmem:[#allocation12 + $0x1a8] sm:$0xff] }
 0x359   : > { %4974 = vmatpush1.bf16.msra.mxu0 %v4973_v2  ;;  %5102 = vmatpush1.bf16.msra.mxu1 %v5101_v3  ;;  %v4993_v2 = vpack.c.bf16 %v2714_v57, %v2710_v56  ;;  %v5121_v3 = vpack.c.bf16 %v2716_v62, %v2712_v61  ;;  %v2234_v56 = vld [vmem:[#allocation12 + $0xa8] sm:$0xff]  ;;  %v2210_v57 = vld [vmem:[#allocation2 + $0x8] sm:$0xff]  ;;  %v5137_v61 = vpack.c.bf16 %v2225_v48, %v2221_v46 }
 0x35a   : > { %4976 = vmatprep.subr.bf16.mxu0 %v4975_v6  ;;  %5104 = vmatprep.subr.bf16.mxu1 %v5103_v7  ;;  %v4995_v6 = vpack.c.bf16 %v2723_v0, %v2719_v63  ;;  %v5123_v7 = vpack.c.bf16 %v2725_v60, %v2721_v1  ;;  %v2229_v0 = vld [vmem:[#allocation12 + $0x80] sm:$0xff]  ;;  %v2231_v60 = vld [vmem:[#allocation12 + $0x90] sm:$0xff] }
 0x35b   : > { %v2233_v1 = vld [vmem:[#allocation12 + $0xa0] sm:$0xff] }
 0x35d   : > { %4978 = vmatpush1.bf16.msra.mxu0 %v4977_v16  ;;  %5106 = vmatpush1.bf16.msra.mxu1 %v5105_v17  ;;  %v4997_v16 = vpack.c.bf16 %v2722_v5, %v2718_v4  ;;  %v5125_v17 = vpack.c.bf16 %v2724_v9, %v2720_v8  ;;  %v2238_v4 = vld [vmem:[#allocation12 + $0xc8] sm:$0xff]  ;;  %v5141_v8 = vpack.c.bf16 %v2233_v1, %v2229_v0  ;;  %v2269_v0 = vld [vmem:[#allocation12 + $0x1c0] sm:$0xff] }
 0x35e   : > { %4980 = vmatprep.subr.bf16.mxu0 %v4979_v19  ;;  %5108 = vmatprep.subr.bf16.mxu1 %v5107_v20  ;;  %v4999_v19 = vpack.c.bf16 %v2731_v13, %v2727_v10  ;;  %v5127_v20 = vpack.c.bf16 %v2733_v15, %v2729_v14  ;;  %v2242_v5 = vld [vmem:[#allocation12 + $0xe8] sm:$0xff]  ;;  %v2237_v13 = vld [vmem:[#allocation12 + $0xc0] sm:$0xff]  ;;  %v2239_v15 = vld [vmem:[#allocation12 + $0xd0] sm:$0xff] }
 0x35f   : > { %v5143_v10 = vpack.c.bf16 %v2242_v5, %v2238_v4  ;;  %v2241_v14 = vld [vmem:[#allocation12 + $0xe0] sm:$0xff]  ;;  %v2278_v4 = vld [vmem:[#allocation12 + $0x208] sm:$0xff] }
 0x360   : > { %v5145_v21 = vpack.c.bf16 %v2241_v14, %v2237_v13  ;;  %v2273_v1 = vld [vmem:[#allocation12 + $0x1e0] sm:$0xff]  ;;  %v2282_v5 = vld [vmem:[#allocation12 + $0x228] sm:$0xff] }
 0x361   : > { %4982 = vmatpush1.bf16.msra.mxu0 %v4981_v28  ;;  %5110 = vmatpush1.bf16.msra.mxu1 %v5109_v29  ;;  %v2471_v28 = vld [vmem:[#allocation2 + $0x10] sm:$0xfe]  ;;  %v2475_v29 = vld [vmem:[#allocation2 + $0x30] sm:$0x1] }
 0x362   : > { %4984 = vmatprep.subr.bf16.mxu0 %v4983_v32  ;;  %5112 = vmatprep.subr.bf16.mxu1 %v5111_v33  ;;  %v5131_v32 = vpack.c.bf16 %v2218_v26, %v2214_v23  ;;  %v5259_v33 = vpack.c.bf16 %v2220_v27, %v2216_v25  ;;  %v2748_v36 = vrot.slane %v2471_v28, 1  ;;  %v2749_v37 = vrot.slane %v2475_v29, 1  ;;  %v2245_v26 = vld [vmem:[#allocation12 + $0x100] sm:$0xff]  ;;  %v2247_v27 = vld [vmem:[#allocation12 + $0x110] sm:$0xff] }
 0x363   : > { %v5147_v23 = vpack.c.bf16 %v2250_v24, %v2246_v18  ;;  %v2249_v25 = vld [vmem:[#allocation12 + $0x120] sm:$0xff]  ;;  %v2251_v29 = vld [vmem:[#allocation12 + $0x130] sm:$0xff]  ;;  %v2286_v18 = vld [vmem:[#allocation12 + $0x248] sm:$0xff] }
 0x364   : > { %v2750_v50 = vsel %vm996_vm1, %v2748_v36, %v2749_v37  ;;  %v2253_v37 = vld [vmem:[#allocation12 + $0x140] sm:$0xff]  ;;  %v2290_v24 = vld [vmem:[#allocation12 + $0x268] sm:$0xff] }
 0x365   : > { %4986 = vmatpush1.bf16.msra.mxu0 %v4985_v40  ;;  %5114 = vmatpush1.bf16.msra.mxu1 %v5113_v41  ;;  %v2222_v40 = vld [vmem:[#allocation12 + $0x48] sm:$0xff]  ;;  %v2277_v13 = vld [vmem:[#allocation12 + $0x200] sm:$0xff] }
 0x366   : > { %4988 = vmatprep.subr.bf16.mxu0 %v4987_v43  ;;  %5116 = vmatprep.subr.bf16.mxu1 %v5115_v44  ;;  %v2226_v41 = vld [vmem:[#allocation12 + $0x68] sm:$0xff]  ;;  %v5133_v43 = vpack.c.bf16 %v2217_v35, %v2213_v34  ;;  %v5261_v44 = vpack.c.bf16 %v2219_v39, %v2215_v38  ;;  %v5149_v34 = vpack.c.bf16 %v2249_v25, %v2245_v26  ;;  %v2257_v38 = vld [vmem:[#allocation12 + $0x160] sm:$0xff]  ;;  %v2255_v39 = vld [vmem:[#allocation12 + $0x150] sm:$0xff] }
 0x367   : > { %v5135_v51 = vpack.c.bf16 %v2226_v41, %v2222_v40  ;;  %v5277_v35 = vpack.c.bf16 %v2251_v29, %v2247_v27  ;;  %v2259_v41 = vld [vmem:[#allocation12 + $0x170] sm:$0xff]  ;;  %v5153_v46 = vpack.c.bf16 %v2257_v38, %v2253_v37  ;;  %v2281_v14 = vld [vmem:[#allocation12 + $0x220] sm:$0xff] }
 0x368   : > { %v5281_v48 = vpack.c.bf16 %v2259_v41, %v2255_v39  ;;  %v2285_v26 = vld [vmem:[#allocation12 + $0x240] sm:$0xff]  ;;  %v2287_v27 = vld [vmem:[#allocation12 + $0x250] sm:$0xff] }
 0x369   : > { %4990 = vmatpush1.bf16.msra.mxu0 %v4989_v54  ;;  %5118 = vmatpush1.bf16.msra.mxu1 %v5117_v55  ;;  %v2227_v54 = vld [vmem:[#allocation12 + $0x70] sm:$0xff]  ;;  %v2230_v55 = vld [vmem:[#allocation12 + $0x88] sm:$0xff]  ;;  %v2289_v25 = vld [vmem:[#allocation12 + $0x260] sm:$0xff] }
 0x36a   : > { %4992 = vmatprep.subr.bf16.mxu0 %v4991_v58  ;;  %5120 = vmatprep.subr.bf16.mxu1 %v5119_v59  ;;  %v2232_v58 = vld [vmem:[#allocation12 + $0x98] sm:$0xff]  ;;  %v5265_v62 = vpack.c.bf16 %v2227_v54, %v2223_v49  ;;  %v5139_v63 = vpack.c.bf16 %v2234_v56, %v2230_v55  ;;  %v5155_v49 = vpack.c.bf16 %v2266_v42, %v2262_v47  ;;  %v2267_v55 = vld [vmem:[#allocation12 + $0x1b0] sm:$0xff]  ;;  %v2270_v56 = vld [vmem:[#allocation12 + $0x1c8] sm:$0xff] }
 0x36b   : > { %v2236_v59 = vld [vmem:[#allocation12 + $0xb8] sm:$0xff]  ;;  %v2291_v29 = vld [vmem:[#allocation12 + $0x270] sm:$0xff]  ;;  %v2293_v37 = vld [vmem:[#allocation12 + $0x280] sm:$0xff] }
 0x36c   : > { %v2297_v38 = vld [vmem:[#allocation12 + $0x2a0] sm:$0xff]  ;;  %v2295_v39 = vld [vmem:[#allocation12 + $0x290] sm:$0xff]  ;;  %v2302_v47 = vld [vmem:[#allocation12 + $0x2c8] sm:$0xff] }
 0x36d   : > { %4994 = vmatpush1.bf16.msra.mxu0 %v4993_v2  ;;  %5122 = vmatpush1.bf16.msra.mxu1 %v5121_v3  ;;  %v5267_v2 = vpack.c.bf16 %v2236_v59, %v2232_v58  ;;  %v2235_v3 = vld [vmem:[#allocation12 + $0xb0] sm:$0xff]  ;;  %v2272_v58 = vld [vmem:[#allocation12 + $0x1d8] sm:$0xff]  ;;  %v2306_v42 = vld [vmem:[#allocation12 + $0x2e8] sm:$0xff] }
 0x36e   : > { %4996 = vmatprep.subr.bf16.mxu0 %v4995_v6  ;;  %5124 = vmatprep.subr.bf16.mxu1 %v5123_v7  ;;  %v2240_v6 = vld [vmem:[#allocation12 + $0xd8] sm:$0xff]  ;;  %v5269_v9 = vpack.c.bf16 %v2235_v3, %v2231_v60  ;;  %v2271_v60 = vld [vmem:[#allocation12 + $0x1d0] sm:$0xff] }
 0x36f   : > { %v2244_v7 = vld [vmem:[#allocation12 + $0xf8] sm:$0xff]  ;;  %v2275_v3 = vld [vmem:[#allocation12 + $0x1f0] sm:$0xff] }
 0x370   : > { %v2276_v59 = vld [vmem:[#allocation12 + $0x1f8] sm:$0xff]  ;;  %v2299_v41 = vld [vmem:[#allocation12 + $0x2b0] sm:$0xff] }
 0x371   : > { %4998 = vmatpush1.bf16.msra.mxu0 %v4997_v16  ;;  %5126 = vmatpush1.bf16.msra.mxu1 %v5125_v17  ;;  %v5271_v16 = vpack.c.bf16 %v2244_v7, %v2240_v6  ;;  %v2243_v17 = vld [vmem:[#allocation12 + $0xf0] sm:$0xff]  ;;  %v2280_v6 = vld [vmem:[#allocation12 + $0x218] sm:$0xff] }
 0x372   : > { %5000 = vmatprep.subr.bf16.mxu0 %v4999_v19  ;;  %5128 = vmatprep.subr.bf16.mxu1 %v5127_v20  ;;  %v2248_v19 = vld [vmem:[#allocation12 + $0x118] sm:$0xff]  ;;  %v5273_v22 = vpack.c.bf16 %v2243_v17, %v2239_v15  ;;  %v2279_v15 = vld [vmem:[#allocation12 + $0x210] sm:$0xff] }
 0x373   : > { %v2252_v20 = vld [vmem:[#allocation12 + $0x138] sm:$0xff]  ;;  %v2283_v17 = vld [vmem:[#allocation12 + $0x230] sm:$0xff] }
 0x374   : > { %v5275_v28 = vpack.c.bf16 %v2252_v20, %v2248_v19  ;;  %v2284_v7 = vld [vmem:[#allocation12 + $0x238] sm:$0xff] }
 0x375   : > { %5002 = vmatpush1.bf16.msra.mxu0 %v5001_v30  ;;  %5130 = vmatpush1.bf16.msra.mxu1 %v5129_v31  ;;  %v2254_v30 = vld [vmem:[#allocation12 + $0x148] sm:$0xff]  ;;  %v2288_v19 = vld [vmem:[#allocation12 + $0x258] sm:$0xff] }
 0x376   : > { %5132 = vmatprep.subr.bf16.mxu0 %v5131_v32  ;;  %5260 = vmatprep.subr.bf16.mxu1 %v5259_v33  ;;  %v2258_v31 = vld [vmem:[#allocation12 + $0x168] sm:$0xff]  ;;  %v2256_v32 = vld [vmem:[#allocation12 + $0x158] sm:$0xff] }
 0x377   : > { %v2260_v33 = vld [vmem:[#allocation12 + $0x178] sm:$0xff]  ;;  %v5151_v36 = vpack.c.bf16 %v2258_v31, %v2254_v30  ;;  %v2294_v30 = vld [vmem:[#allocation12 + $0x288] sm:$0xff] }
 0x378   : > { %2894 = vmatmul.mubr.f32.vlgmr.msra.gmra.mrb[2].mxu0 %v2750_v50  ;;  %3036 = vmatmul.mubr.f32.vlgmr.msra.gmra.mrb[2].mxu1 %v2750_v50  ;;  %v5279_v40 = vpack.c.bf16 %v2260_v33, %v2256_v32  ;;  %v2261_v50 = vld [vmem:[#allocation12 + $0x180] sm:$0xff]  ;;  %v2292_v20 = vld [vmem:[#allocation12 + $0x278] sm:$0xff]  ;;  %v2298_v31 = vld [vmem:[#allocation12 + $0x2a8] sm:$0xff] }
 0x379   : > { %5134 = vmatpush1.bf16.msra.mxu0 %v5133_v43  ;;  %3106 = vmatprep.mubr.f32.mxu0 %v2210_v57  ;;  %v2264_v43 = vld [vmem:[#allocation12 + $0x198] sm:$0xff] }
 0x37a   : > { %5262 = vmatpush1.bf16.msra.mxu1 %v5261_v44  ;;  %3248 = vmatprep.mubr.f32.mxu1 %v2210_v57  ;;  %v2268_v44 = vld [vmem:[#allocation12 + $0x1b8] sm:$0xff]  ;;  %v2274_v57 = vld [vmem:[#allocation12 + $0x1e8] sm:$0xff] }
 0x37b   : > { %5136 = vmatprep.subr.bf16.mxu0 %v5135_v51  ;;  %5264 = vmatprep.subr.bf16.mxu1 %v5263_v52  ;;  %v2265_v51 = vld [vmem:[#allocation12 + $0x1a0] sm:$0xff]  ;;  %v2263_v52 = vld [vmem:[#allocation12 + $0x190] sm:$0xff]  ;;  %v5283_v54 = vpack.c.bf16 %v2268_v44, %v2264_v43  ;;  %v2296_v32 = vld [vmem:[#allocation12 + $0x298] sm:$0xff] }
 0x37c   : > { %v2300_v33 = vld [vmem:[#allocation12 + $0x2b8] sm:$0xff] }
 0x37d   : > { %5138 = vmatpush1.bf16.msra.mxu0 %v5137_v61  ;;  %v5157_v61 = vpack.c.bf16 %v2265_v51, %v2261_v50  ;;  %v2304_v43 = vld [vmem:[#allocation12 + $0x2d8] sm:$0xff]  ;;  %v2301_v50 = vld [vmem:[#allocation12 + $0x2c0] sm:$0xff] }
 0x37e   : > { %5266 = vmatpush1.bf16.msra.mxu1 %v5265_v62  ;;  %5140 = vmatprep.subr.bf16.mxu0 %v5139_v63  ;;  %v5285_v62 = vpack.c.bf16 %v2267_v55, %v2263_v52  ;;  %v5159_v63 = vpack.c.bf16 %v2274_v57, %v2270_v56  ;;  %v2308_v44 = vld [vmem:[#allocation12 + $0x2f8] sm:$0xff]  ;;  %v2305_v51 = vld [vmem:[#allocation12 + $0x2e0] sm:$0xff]  ;;  %v2303_v52 = vld [vmem:[#allocation12 + $0x2d0] sm:$0xff] }
 0x37f   : > { %5268 = vmatprep.subr.bf16.mxu1 %v5267_v2  ;;  %v5287_v2 = vpack.c.bf16 %v2276_v59, %v2272_v58  ;;  %v2307_v55 = vld [vmem:[#allocation12 + $0x2f0] sm:$0xff]  ;;  %v2310_v56 = vld [vmem:[#allocation12 + $0x308] sm:$0xff]  ;;  %v2312_v58 = vld [vmem:[#allocation12 + $0x318] sm:$0xff] }
 0x380   : > { %v2314_v57 = vld [vmem:[#allocation12 + $0x328] sm:$0xff]  ;;  %v2316_v59 = vld [vmem:[#allocation12 + $0x338] sm:$0xff] }
 0x381   : > { %5142 = vmatpush1.bf16.msra.mxu0 %v5141_v8  ;;  %v5161_v8 = vpack.c.bf16 %v2273_v1, %v2269_v0  ;;  %v2309_v0 = vld [vmem:[#allocation12 + $0x300] sm:$0xff] }
 0x382   : > { %5270 = vmatpush1.bf16.msra.mxu1 %v5269_v9  ;;  %5144 = vmatprep.subr.bf16.mxu0 %v5143_v10  ;;  %v5289_v9 = vpack.c.bf16 %v2275_v3, %v2271_v60  ;;  %v5163_v10 = vpack.c.bf16 %v2282_v5, %v2278_v4  ;;  %v2313_v1 = vld [vmem:[#allocation12 + $0x320] sm:$0xff]  ;;  %v2311_v60 = vld [vmem:[#allocation12 + $0x310] sm:$0xff]  ;;  %v2318_v4 = vld [vmem:[#allocation12 + $0x348] sm:$0xff] }
 0x383   : > { %5272 = vmatprep.subr.bf16.mxu1 %v5271_v16  ;;  %v5291_v16 = vpack.c.bf16 %v2284_v7, %v2280_v6  ;;  %v2315_v3 = vld [vmem:[#allocation12 + $0x330] sm:$0xff]  ;;  %v2322_v5 = vld [vmem:[#allocation12 + $0x368] sm:$0xff]  ;;  %v2320_v6 = vld [vmem:[#allocation12 + $0x358] sm:$0xff] }
 0x384   : > { %v2324_v7 = vld [vmem:[#allocation12 + $0x378] sm:$0xff] }
 0x385   : > { %5146 = vmatpush1.bf16.msra.mxu0 %v5145_v21  ;;  %v5165_v21 = vpack.c.bf16 %v2281_v14, %v2277_v13  ;;  %v2317_v13 = vld [vmem:[#allocation12 + $0x340] sm:$0xff] }
 0x386   : > { %5274 = vmatpush1.bf16.msra.mxu1 %v5273_v22  ;;  %5148 = vmatprep.subr.bf16.mxu0 %v5147_v23  ;;  %v5293_v22 = vpack.c.bf16 %v2283_v17, %v2279_v15  ;;  %v5167_v23 = vpack.c.bf16 %v2290_v24, %v2286_v18  ;;  %v2321_v14 = vld [vmem:[#allocation12 + $0x360] sm:$0xff]  ;;  %v2319_v15 = vld [vmem:[#allocation12 + $0x350] sm:$0xff]  ;;  %v2326_v18 = vld [vmem:[#allocation12 + $0x388] sm:$0xff] }
 0x387   : > { %5276 = vmatprep.subr.bf16.mxu1 %v5275_v28  ;;  %v5295_v28 = vpack.c.bf16 %v2292_v20, %v2288_v19  ;;  %v2323_v17 = vld [vmem:[#allocation12 + $0x370] sm:$0xff]  ;;  %v2330_v24 = vld [vmem:[#allocation12 + $0x3a8] sm:$0xff]  ;;  %v2328_v19 = vld [vmem:[#allocation12 + $0x398] sm:$0xff] }
 0x388   : > { %v2332_v20 = vld [vmem:[#allocation12 + $0x3b8] sm:$0xff] }
 0x389   : > { %5150 = vmatpush1.bf16.msra.mxu0 %v5149_v34  ;;  %v5169_v34 = vpack.c.bf16 %v2289_v25, %v2285_v26  ;;  %v2325_v26 = vld [vmem:[#allocation12 + $0x380] sm:$0xff] }
 0x38a   : > { %5278 = vmatpush1.bf16.msra.mxu1 %v5277_v35  ;;  %5152 = vmatprep.subr.bf16.mxu0 %v5151_v36  ;;  %v5297_v35 = vpack.c.bf16 %v2291_v29, %v2287_v27  ;;  %v5171_v36 = vpack.c.bf16 %v2298_v31, %v2294_v30  ;;  %v2329_v25 = vld [vmem:[#allocation12 + $0x3a0] sm:$0xff]  ;;  %v2327_v27 = vld [vmem:[#allocation12 + $0x390] sm:$0xff]  ;;  %v2334_v30 = vld [vmem:[#allocation12 + $0x3c8] sm:$0xff] }
 0x38b   : > { %5280 = vmatprep.subr.bf16.mxu1 %v5279_v40  ;;  %v5299_v40 = vpack.c.bf16 %v2300_v33, %v2296_v32  ;;  %v2331_v29 = vld [vmem:[#allocation12 + $0x3b0] sm:$0xff]  ;;  %v2338_v31 = vld [vmem:[#allocation12 + $0x3e8] sm:$0xff]  ;;  %v2336_v32 = vld [vmem:[#allocation12 + $0x3d8] sm:$0xff] }
 0x38c   : > { %v2340_v33 = vld [vmem:[#allocation12 + $0x3f8] sm:$0xff] }
 0x38d   : > { %5154 = vmatpush1.bf16.msra.mxu0 %v5153_v46  ;;  %v5173_v46 = vpack.c.bf16 %v2297_v38, %v2293_v37  ;;  %v2333_v37 = vld [vmem:[#allocation12 + $0x3c0] sm:$0xff] }
 0x38e   : > { %5282 = vmatpush1.bf16.msra.mxu1 %v5281_v48  ;;  %5156 = vmatprep.subr.bf16.mxu0 %v5155_v49  ;;  %v5301_v48 = vpack.c.bf16 %v2299_v41, %v2295_v39  ;;  %v5175_v49 = vpack.c.bf16 %v2306_v42, %v2302_v47  ;;  %v2337_v38 = vld [vmem:[#allocation12 + $0x3e0] sm:$0xff]  ;;  %v2335_v39 = vld [vmem:[#allocation12 + $0x3d0] sm:$0xff]  ;;  %v2342_v47 = vld [vmem:[#allocation12 + $0x408] sm:$0xff] }
 0x38f   : > { %5284 = vmatprep.subr.bf16.mxu1 %v5283_v54  ;;  %v5303_v54 = vpack.c.bf16 %v2308_v44, %v2304_v43  ;;  %v2339_v41 = vld [vmem:[#allocation12 + $0x3f0] sm:$0xff]  ;;  %v2346_v42 = vld [vmem:[#allocation12 + $0x428] sm:$0xff]  ;;  %v2344_v43 = vld [vmem:[#allocation12 + $0x418] sm:$0xff] }
 0x390   : > { %v2348_v44 = vld [vmem:[#allocation12 + $0x438] sm:$0xff] }
 0x391   : > { %5158 = vmatpush1.bf16.msra.mxu0 %v5157_v61  ;;  %v5177_v61 = vpack.c.bf16 %v2305_v51, %v2301_v50  ;;  %v2341_v50 = vld [vmem:[#allocation12 + $0x400] sm:$0xff] }
 0x392   : > { %5286 = vmatpush1.bf16.msra.mxu1 %v5285_v62  ;;  %5160 = vmatprep.subr.bf16.mxu0 %v5159_v63  ;;  %v5305_v62 = vpack.c.bf16 %v2307_v55, %v2303_v52  ;;  %v5179_v63 = vpack.c.bf16 %v2314_v57, %v2310_v56  ;;  %v2345_v51 = vld [vmem:[#allocation12 + $0x420] sm:$0xff]  ;;  %v5323_v52 = vpack.c.bf16 %v2348_v44, %v2344_v43  ;;  %v2347_v55 = vld [vmem:[#allocation12 + $0x430] sm:$0xff]  ;;  %v2350_v56 = vld [vmem:[#allocation12 + $0x448] sm:$0xff] }
 0x393   : > { %5288 = vmatprep.subr.bf16.mxu1 %v5287_v2  ;;  %v5307_v2 = vpack.c.bf16 %v2316_v59, %v2312_v58  ;;  %v2354_v57 = vld [vmem:[#allocation12 + $0x468] sm:$0xff]  ;;  %v2209_v58 = vld [vmem:[#allocation2] sm:$0xff]  ;;  %v5197_v59 = vpack.c.bf16 %v2345_v51, %v2341_v50 }
 0x394   : > { %v2382_v43 = vld [vmem:[#allocation12 + $0x548] sm:$0xff] }
 0x395   : > { %5162 = vmatpush1.bf16.msra.mxu0 %v5161_v8  ;;  %v5181_v8 = vpack.c.bf16 %v2313_v1, %v2309_v0  ;;  %v2349_v0 = vld [vmem:[#allocation12 + $0x440] sm:$0xff]  ;;  %v2386_v44 = vld [vmem:[#allocation12 + $0x568] sm:$0xff] }
 0x396   : > { %5290 = vmatpush1.bf16.msra.mxu1 %v5289_v9  ;;  %5164 = vmatprep.subr.bf16.mxu0 %v5163_v10  ;;  %v5309_v9 = vpack.c.bf16 %v2315_v3, %v2311_v60  ;;  %v5183_v10 = vpack.c.bf16 %v2322_v5, %v2318_v4  ;;  %v2353_v1 = vld [vmem:[#allocation12 + $0x460] sm:$0xff]  ;;  %v2351_v60 = vld [vmem:[#allocation12 + $0x450] sm:$0xff]  ;;  %v2358_v4 = vld [vmem:[#allocation12 + $0x488] sm:$0xff]  ;;  %v5215_v51 = vpack.c.bf16 %v2386_v44, %v2382_v43 }
 0x397   : > { %5292 = vmatprep.subr.bf16.mxu1 %v5291_v16  ;;  %v5311_v16 = vpack.c.bf16 %v2324_v7, %v2320_v6  ;;  %v2355_v3 = vld [vmem:[#allocation12 + $0x470] sm:$0xff]  ;;  %v2362_v5 = vld [vmem:[#allocation12 + $0x4a8] sm:$0xff]  ;;  %v2360_v7 = vld [vmem:[#allocation12 + $0x498] sm:$0xff] }
 0x398   : > { %v2422_v43 = vld [vmem:[#allocation12 + $0x688] sm:$0xff] }
 0x399   : > { %5166 = vmatpush1.bf16.msra.mxu0 %v5165_v21  ;;  %v5185_v21 = vpack.c.bf16 %v2321_v14, %v2317_v13  ;;  %v5329_v13 = vpack.c.bf16 %v2355_v3, %v2351_v60  ;;  %v5203_v14 = vpack.c.bf16 %v2362_v5, %v2358_v4  ;;  %v2389_v60 = vld [vmem:[#allocation12 + $0x580] sm:$0xff]  ;;  %v2391_v3 = vld [vmem:[#allocation12 + $0x590] sm:$0xff]  ;;  %v2426_v44 = vld [vmem:[#allocation12 + $0x6a8] sm:$0xff] }
 0x39a   : > { %5294 = vmatpush1.bf16.msra.mxu1 %v5293_v22  ;;  %5168 = vmatprep.subr.bf16.mxu0 %v5167_v23  ;;  %v5313_v22 = vpack.c.bf16 %v2323_v17, %v2319_v15  ;;  %v5187_v23 = vpack.c.bf16 %v2330_v24, %v2326_v18  ;;  %v2357_v15 = vld [vmem:[#allocation12 + $0x480] sm:$0xff]  ;;  %v2359_v17 = vld [vmem:[#allocation12 + $0x490] sm:$0xff] }
 0x39b   : > { %5296 = vmatprep.subr.bf16.mxu1 %v5295_v28  ;;  %v5315_v28 = vpack.c.bf16 %v2332_v20, %v2328_v19  ;;  %v2363_v24 = vld [vmem:[#allocation12 + $0x4b0] sm:$0xff]  ;;  %v2366_v19 = vld [vmem:[#allocation12 + $0x4c8] sm:$0xff] }
 0x39c   : > { %v2370_v20 = vld [vmem:[#allocation12 + $0x4e8] sm:$0xff]  ;;  %v2395_v5 = vld [vmem:[#allocation12 + $0x5b0] sm:$0xff] }
 0x39d   : > { %5170 = vmatpush1.bf16.msra.mxu0 %v5169_v34  ;;  %v5189_v34 = vpack.c.bf16 %v2329_v25, %v2325_v26  ;;  %v5333_v26 = vpack.c.bf16 %v2363_v24, %v2359_v17  ;;  %v5207_v25 = vpack.c.bf16 %v2370_v20, %v2366_v19  ;;  %v2399_v17 = vld [vmem:[#allocation12 + $0x5d0] sm:$0xff]  ;;  %v2406_v19 = vld [vmem:[#allocation12 + $0x608] sm:$0xff] }
 0x39e   : > { %5298 = vmatpush1.bf16.msra.mxu1 %v5297_v35  ;;  %5172 = vmatprep.subr.bf16.mxu0 %v5171_v36  ;;  %v5317_v35 = vpack.c.bf16 %v2331_v29, %v2327_v27  ;;  %v5191_v36 = vpack.c.bf16 %v2338_v31, %v2334_v30  ;;  %v2365_v27 = vld [vmem:[#allocation12 + $0x4c0] sm:$0xff]  ;;  %v2367_v29 = vld [vmem:[#allocation12 + $0x4d0] sm:$0xff]  ;;  %v2410_v20 = vld [vmem:[#allocation12 + $0x628] sm:$0xff] }
 0x39f   : > { %5300 = vmatprep.subr.bf16.mxu1 %v5299_v40  ;;  %v5319_v40 = vpack.c.bf16 %v2340_v33, %v2336_v32  ;;  %v2371_v31 = vld [vmem:[#allocation12 + $0x4f0] sm:$0xff]  ;;  %v2374_v32 = vld [vmem:[#allocation12 + $0x508] sm:$0xff] }
 0x3a0   : > { %v2378_v33 = vld [vmem:[#allocation12 + $0x528] sm:$0xff]  ;;  %v2403_v24 = vld [vmem:[#allocation12 + $0x5f0] sm:$0xff] }
 0x3a1   : > { %5174 = vmatpush1.bf16.msra.mxu0 %v5173_v46  ;;  %v5193_v46 = vpack.c.bf16 %v2337_v38, %v2333_v37  ;;  %v5337_v37 = vpack.c.bf16 %v2371_v31, %v2367_v29  ;;  %v5211_v38 = vpack.c.bf16 %v2378_v33, %v2374_v32  ;;  %v2407_v29 = vld [vmem:[#allocation12 + $0x610] sm:$0xff]  ;;  %v2414_v32 = vld [vmem:[#allocation12 + $0x648] sm:$0xff] }
 0x3a2   : > { %5302 = vmatpush1.bf16.msra.mxu1 %v5301_v48  ;;  %5176 = vmatprep.subr.bf16.mxu0 %v5175_v49  ;;  %v5321_v48 = vpack.c.bf16 %v2339_v41, %v2335_v39  ;;  %v5195_v49 = vpack.c.bf16 %v2346_v42, %v2342_v47  ;;  %v2373_v39 = vld [vmem:[#allocation12 + $0x500] sm:$0xff]  ;;  %v2375_v41 = vld [vmem:[#allocation12 + $0x510] sm:$0xff]  ;;  %v2418_v33 = vld [vmem:[#allocation12 + $0x668] sm:$0xff] }
 0x3a3   : > { %5304 = vmatprep.subr.bf16.mxu1 %v5303_v54  ;;  %v2343_v54 = vld [vmem:[#allocation12 + $0x410] sm:$0xff] }
 0x3a4   : > { %v2379_v42 = vld [vmem:[#allocation12 + $0x530] sm:$0xff] }
 0x3a5   : > { %5178 = vmatpush1.bf16.msra.mxu0 %v5177_v61  ;;  %v2352_v61 = vld [vmem:[#allocation12 + $0x458] sm:$0xff]  ;;  %v5341_v50 = vpack.c.bf16 %v2379_v42, %v2375_v41  ;;  %v2411_v31 = vld [vmem:[#allocation12 + $0x630] sm:$0xff] }
 0x3a6   : > { %5306 = vmatpush1.bf16.msra.mxu1 %v5305_v62  ;;  %5180 = vmatprep.subr.bf16.mxu0 %v5179_v63  ;;  %v2356_v62 = vld [vmem:[#allocation12 + $0x478] sm:$0xff]  ;;  %v5325_v63 = vpack.c.bf16 %v2347_v55, %v2343_v54  ;;  %v2385_v54 = vld [vmem:[#allocation12 + $0x560] sm:$0xff]  ;;  %v2383_v55 = vld [vmem:[#allocation12 + $0x550] sm:$0xff] }
 0x3a7   : > { %5308 = vmatprep.subr.bf16.mxu1 %v5307_v2  ;;  %v5199_v2 = vpack.c.bf16 %v2354_v57, %v2350_v56  ;;  %v5327_v6 = vpack.c.bf16 %v2356_v62, %v2352_v61  ;;  %v2387_v57 = vld [vmem:[#allocation12 + $0x570] sm:$0xff]  ;;  %v2392_v61 = vld [vmem:[#allocation12 + $0x598] sm:$0xff] }
 0x3a8   : > { %v2396_v62 = vld [vmem:[#allocation12 + $0x5b8] sm:$0xff]  ;;  %v2415_v41 = vld [vmem:[#allocation12 + $0x650] sm:$0xff] }
 0x3a9   : > { %5182 = vmatpush1.bf16.msra.mxu0 %v5181_v8  ;;  %v2364_v8 = vld [vmem:[#allocation12 + $0x4b8] sm:$0xff]  ;;  %v5347_v4 = vpack.c.bf16 %v2396_v62, %v2392_v61  ;;  %v2419_v42 = vld [vmem:[#allocation12 + $0x670] sm:$0xff] }
 0x3aa   : > { %5310 = vmatpush1.bf16.msra.mxu1 %v5309_v9  ;;  %5184 = vmatprep.subr.bf16.mxu0 %v5183_v10  ;;  %v2212_v9 = vld [vmem:[#allocation2 + $0x18] sm:$0xff]  ;;  %v5201_v10 = vpack.c.bf16 %v2353_v1, %v2349_v0  ;;  %v5331_v18 = vpack.c.bf16 %v2364_v8, %v2360_v7  ;;  %v5345_v0 = vpack.c.bf16 %v2387_v57, %v2383_v55  ;;  %v2400_v8 = vld [vmem:[#allocation12 + $0x5d8] sm:$0xff] }
 0x3ab   : > { %5312 = vmatprep.subr.bf16.mxu1 %v5311_v16  ;;  %v2361_v16 = vld [vmem:[#allocation12 + $0x4a0] sm:$0xff]  ;;  %v2402_v7 = vld [vmem:[#allocation12 + $0x5e8] sm:$0xff]  ;;  %v2423_v55 = vld [vmem:[#allocation12 + $0x690] sm:$0xff] }
 0x3ac   : > { %v2427_v57 = vld [vmem:[#allocation12 + $0x6b0] sm:$0xff]  ;;  %v2432_v61 = vld [vmem:[#allocation12 + $0x6d8] sm:$0xff] }
 0x3ad   : > { %5186 = vmatpush1.bf16.msra.mxu0 %v5185_v21  ;;  %v2368_v21 = vld [vmem:[#allocation12 + $0x4d8] sm:$0xff] }
 0x3ae   : > { %5314 = vmatpush1.bf16.msra.mxu1 %v5313_v22  ;;  %5188 = vmatprep.subr.bf16.mxu0 %v5187_v23  ;;  %v2372_v22 = vld [vmem:[#allocation12 + $0x4f8] sm:$0xff]  ;;  %v5205_v23 = vpack.c.bf16 %v2361_v16, %v2357_v15  ;;  %v2397_v15 = vld [vmem:[#allocation12 + $0x5c0] sm:$0xff] }
 0x3af   : > { %5316 = vmatprep.subr.bf16.mxu1 %v5315_v28  ;;  %v2369_v28 = vld [vmem:[#allocation12 + $0x4e0] sm:$0xff]  ;;  %v5335_v30 = vpack.c.bf16 %v2372_v22, %v2368_v21  ;;  %v2408_v21 = vld [vmem:[#allocation12 + $0x618] sm:$0xff] }
 0x3b0   : > { %v2401_v16 = vld [vmem:[#allocation12 + $0x5e0] sm:$0xff]  ;;  %v2412_v22 = vld [vmem:[#allocation12 + $0x638] sm:$0xff] }
 0x3b1   : > { %5190 = vmatpush1.bf16.msra.mxu0 %v5189_v34  ;;  %v2376_v34 = vld [vmem:[#allocation12 + $0x518] sm:$0xff] }
 0x3b2   : > { %5318 = vmatpush1.bf16.msra.mxu1 %v5317_v35  ;;  %5192 = vmatprep.subr.bf16.mxu0 %v5191_v36  ;;  %v2380_v35 = vld [vmem:[#allocation12 + $0x538] sm:$0xff]  ;;  %v5209_v36 = vpack.c.bf16 %v2369_v28, %v2365_v27  ;;  %v2405_v27 = vld [vmem:[#allocation12 + $0x600] sm:$0xff] }
 0x3b3   : > { %5320 = vmatprep.subr.bf16.mxu1 %v5319_v40  ;;  %v2377_v40 = vld [vmem:[#allocation12 + $0x520] sm:$0xff]  ;;  %v5339_v47 = vpack.c.bf16 %v2380_v35, %v2376_v34  ;;  %v2416_v34 = vld [vmem:[#allocation12 + $0x658] sm:$0xff] }
 0x3b4   : > { %v2409_v28 = vld [vmem:[#allocation12 + $0x620] sm:$0xff]  ;;  %v2420_v35 = vld [vmem:[#allocation12 + $0x678] sm:$0xff] }
 0x3b5   : > { %5194 = vmatpush1.bf16.msra.mxu0 %v5193_v46  ;;  %v2384_v46 = vld [vmem:[#allocation12 + $0x558] sm:$0xff] }
 0x3b6   : > { %5322 = vmatpush1.bf16.msra.mxu1 %v5321_v48  ;;  %5196 = vmatprep.subr.bf16.mxu0 %v5195_v49  ;;  %v2388_v48 = vld [vmem:[#allocation12 + $0x578] sm:$0xff]  ;;  %v5213_v49 = vpack.c.bf16 %v2377_v40, %v2373_v39  ;;  %v2413_v39 = vld [vmem:[#allocation12 + $0x640] sm:$0xff] }
 0x3b7   : > { %5324 = vmatprep.subr.bf16.mxu1 %v5323_v52  ;;  %v2381_v52 = vld [vmem:[#allocation12 + $0x540] sm:$0xff]  ;;  %v5343_v56 = vpack.c.bf16 %v2388_v48, %v2384_v46  ;;  %v2424_v46 = vld [vmem:[#allocation12 + $0x698] sm:$0xff] }
 0x3b8   : > { %3107 = vmatmul.mubr.f32.vlgmr.msra.gmra.mrb[2].mxu0 %v2209_v58  ;;  %v2417_v40 = vld [vmem:[#allocation12 + $0x660] sm:$0xff]  ;;  %v2428_v48 = vld [vmem:[#allocation12 + $0x6b8] sm:$0xff] }
 0x3b9   : > { %3249 = vmatmul.mubr.f32.vlgmr.msra.gmra.mrb[2].mxu1 %v2209_v58  ;;  %5198 = vmatpush1.bf16.msra.mxu0 %v5197_v59  ;;  %v2390_v58 = vld [vmem:[#allocation12 + $0x588] sm:$0xff]  ;;  %v2436_v62 = vld [vmem:[#allocation12 + $0x6f8] sm:$0xff] }
 0x3ba   : > { %3177 = vmatprep.mubr.f32.mxu0 %v2212_v9  ;;  %5326 = vmatpush1.bf16.msra.mxu1 %v5325_v63  ;;  %v2394_v59 = vld [vmem:[#allocation12 + $0x5a8] sm:$0xff]  ;;  %v5217_v63 = vpack.c.bf16 %v2385_v54, %v2381_v52  ;;  %v2421_v52 = vld [vmem:[#allocation12 + $0x680] sm:$0xff] }
 0x3bb   : > { %3319 = vmatprep.mubr.f32.mxu1 %v2212_v9  ;;  %5200 = vmatprep.subr.bf16.mxu0 %v5199_v2  ;;  %v5219_v1 = vpack.c.bf16 %v2394_v59, %v2390_v58  ;;  %v2393_v2 = vld [vmem:[#allocation12 + $0x5a0] sm:$0xff]  ;;  %v2404_v9 = vld [vmem:[#allocation12 + $0x5f8] sm:$0xff]  ;;  %v2430_v58 = vld [vmem:[#allocation12 + $0x6c8] sm:$0xff] }
 0x3bc   : > { %5328 = vmatprep.subr.bf16.mxu1 %v5327_v6  ;;  %v2398_v6 = vld [vmem:[#allocation12 + $0x5c8] sm:$0xff]  ;;  %v2425_v54 = vld [vmem:[#allocation12 + $0x6a0] sm:$0xff] }
 0x3bd   : > { %5202 = vmatpush1.bf16.msra.mxu0 %v5201_v10  ;;  %v5221_v10 = vpack.c.bf16 %v2393_v2, %v2389_v60  ;;  %v2434_v59 = vld [vmem:[#allocation12 + $0x6e8] sm:$0xff]  ;;  %v2429_v60 = vld [vmem:[#allocation12 + $0x6c0] sm:$0xff] }
 0x3be   : > { %5330 = vmatpush1.bf16.msra.mxu1 %v5329_v13  ;;  %5204 = vmatprep.subr.bf16.mxu0 %v5203_v14  ;;  %v5349_v13 = vpack.c.bf16 %v2395_v5, %v2391_v3  ;;  %v5223_v14 = vpack.c.bf16 %v2402_v7, %v2398_v6  ;;  %v2433_v2 = vld [vmem:[#allocation12 + $0x6e0] sm:$0xff]  ;;  %v2431_v3 = vld [vmem:[#allocation12 + $0x6d0] sm:$0xff]  ;;  %v2438_v6 = vld [vmem:[#allocation12 + $0x708] sm:$0xff] }
 0x3bf   : > { %5332 = vmatprep.subr.bf16.mxu1 %v5331_v18  ;;  %v5351_v18 = vpack.c.bf16 %v2404_v9, %v2400_v8  ;;  %v2435_v5 = vld [vmem:[#allocation12 + $0x6f0] sm:$0xff]  ;;  %v2442_v7 = vld [vmem:[#allocation12 + $0x728] sm:$0xff]  ;;  %v2440_v8 = vld [vmem:[#allocation12 + $0x718] sm:$0xff] }
 0x3c0   : > { %v2444_v9 = vld [vmem:[#allocation12 + $0x738] sm:$0xff] }
 0x3c1   : > { %5206 = vmatpush1.bf16.msra.mxu0 %v5205_v23  ;;  %v5225_v23 = vpack.c.bf16 %v2401_v16, %v2397_v15  ;;  %v2437_v15 = vld [vmem:[#allocation12 + $0x700] sm:$0xff] }
 0x3c2   : > { %5334 = vmatpush1.bf16.msra.mxu1 %v5333_v26  ;;  %5208 = vmatprep.subr.bf16.mxu0 %v5207_v25  ;;  %v5353_v26 = vpack.c.bf16 %v2403_v24, %v2399_v17  ;;  %v5227_v25 = vpack.c.bf16 %v2410_v20, %v2406_v19  ;;  %v2441_v16 = vld [vmem:[#allocation12 + $0x720] sm:$0xff]  ;;  %v2439_v17 = vld [vmem:[#allocation12 + $0x710] sm:$0xff]  ;;  %v2446_v19 = vld [vmem:[#allocation12 + $0x748] sm:$0xff] }
 0x3c3   : > { %5336 = vmatprep.subr.bf16.mxu1 %v5335_v30  ;;  %v5355_v30 = vpack.c.bf16 %v2412_v22, %v2408_v21  ;;  %v2443_v24 = vld [vmem:[#allocation12 + $0x730] sm:$0xff]  ;;  %v2450_v20 = vld [vmem:[#allocation12 + $0x768] sm:$0xff]  ;;  %v2448_v21 = vld [vmem:[#allocation12 + $0x758] sm:$0xff] }
 0x3c4   : > { %v2452_v22 = vld [vmem:[#allocation12 + $0x778] sm:$0xff] }
 0x3c5   : > { %5210 = vmatpush1.bf16.msra.mxu0 %v5209_v36  ;;  %v5229_v36 = vpack.c.bf16 %v2409_v28, %v2405_v27  ;;  %v2445_v27 = vld [vmem:[#allocation12 + $0x740] sm:$0xff] }
 0x3c6   : > { %5338 = vmatpush1.bf16.msra.mxu1 %v5337_v37  ;;  %5212 = vmatprep.subr.bf16.mxu0 %v5211_v38  ;;  %v5357_v37 = vpack.c.bf16 %v2411_v31, %v2407_v29  ;;  %v5231_v38 = vpack.c.bf16 %v2418_v33, %v2414_v32  ;;  %v2449_v28 = vld [vmem:[#allocation12 + $0x760] sm:$0xff]  ;;  %v2447_v29 = vld [vmem:[#allocation12 + $0x750] sm:$0xff]  ;;  %v2454_v32 = vld [vmem:[#allocation12 + $0x788] sm:$0xff] }
 0x3c7   : > { %5340 = vmatprep.subr.bf16.mxu1 %v5339_v47  ;;  %v5359_v47 = vpack.c.bf16 %v2420_v35, %v2416_v34  ;;  %v2451_v31 = vld [vmem:[#allocation12 + $0x770] sm:$0xff]  ;;  %v2458_v33 = vld [vmem:[#allocation12 + $0x7a8] sm:$0xff]  ;;  %v2456_v34 = vld [vmem:[#allocation12 + $0x798] sm:$0xff] }
 0x3c8   : > { %v2460_v35 = vld [vmem:[#allocation12 + $0x7b8] sm:$0xff] }
 0x3c9   : > { %5214 = vmatpush1.bf16.msra.mxu0 %v5213_v49  ;;  %v5233_v49 = vpack.c.bf16 %v2417_v40, %v2413_v39  ;;  %v2453_v39 = vld [vmem:[#allocation12 + $0x780] sm:$0xff] }
 0x3ca   : > { %5342 = vmatpush1.bf16.msra.mxu1 %v5341_v50  ;;  %5216 = vmatprep.subr.bf16.mxu0 %v5215_v51  ;;  %v5361_v50 = vpack.c.bf16 %v2419_v42, %v2415_v41  ;;  %v5235_v51 = vpack.c.bf16 %v2426_v44, %v2422_v43  ;;  %v2457_v40 = vld [vmem:[#allocation12 + $0x7a0] sm:$0xff]  ;;  %v2455_v41 = vld [vmem:[#allocation12 + $0x790] sm:$0xff]  ;;  %v2462_v43 = vld [vmem:[#allocation12 + $0x7c8] sm:$0xff] }
 0x3cb   : > { %5344 = vmatprep.subr.bf16.mxu1 %v5343_v56  ;;  %v5363_v56 = vpack.c.bf16 %v2428_v48, %v2424_v46  ;;  %v2459_v42 = vld [vmem:[#allocation12 + $0x7b0] sm:$0xff]  ;;  %v2466_v44 = vld [vmem:[#allocation12 + $0x7e8] sm:$0xff]  ;;  %v2464_v46 = vld [vmem:[#allocation12 + $0x7d8] sm:$0xff] }
 0x3cc   : > { %v2468_v48 = vld [vmem:[#allocation12 + $0x7f8] sm:$0xff] }
 0x3cd   : > { %5218 = vmatpush1.bf16.msra.mxu0 %v5217_v63  ;;  %v5237_v63 = vpack.c.bf16 %v2425_v54, %v2421_v52  ;;  %v2461_v52 = vld [vmem:[#allocation12 + $0x7c0] sm:$0xff] }
 0x3ce   : > { %5346 = vmatpush1.bf16.msra.mxu1 %v5345_v0  ;;  %5220 = vmatprep.subr.bf16.mxu0 %v5219_v1  ;;  %v5365_v0 = vpack.c.bf16 %v2427_v57, %v2423_v55  ;;  %v5239_v1 = vpack.c.bf16 %v2434_v59, %v2430_v58  ;;  %v2465_v54 = vld [vmem:[#allocation12 + $0x7e0] sm:$0xff]  ;;  %v2463_v55 = vld [vmem:[#allocation12 + $0x7d0] sm:$0xff]  ;;  %v3336_v58 = vld [vmem:[#allocation12 + $0x1008] sm:$0xff] }
 0x3cf   : > { %5348 = vmatprep.subr.bf16.mxu1 %v5347_v4  ;;  %v5367_v4 = vpack.c.bf16 %v2436_v62, %v2432_v61  ;;  %v2467_v57 = vld [vmem:[#allocation12 + $0x7f0] sm:$0xff]  ;;  %v3340_v59 = vld [vmem:[#allocation12 + $0x1028] sm:$0xff]  ;;  %v3338_v61 = vld [vmem:[#allocation12 + $0x1018] sm:$0xff] }
 0x3d0   : > { %v3342_v62 = vld [vmem:[#allocation12 + $0x1038] sm:$0xff] }
 0x3d1   : > { %5222 = vmatpush1.bf16.msra.mxu0 %v5221_v10  ;;  %v5241_v10 = vpack.c.bf16 %v2433_v2, %v2429_v60  ;;  %v5387_v60 = vpack.c.bf16 %v3340_v59, %v3336_v58  ;;  %v3335_v2 = vld [vmem:[#allocation12 + $0x1000] sm:$0xff] }
 0x3d2   : > { %5350 = vmatpush1.bf16.msra.mxu1 %v5349_v13  ;;  %5224 = vmatprep.subr.bf16.mxu0 %v5223_v14  ;;  %v5369_v13 = vpack.c.bf16 %v2435_v5, %v2431_v3  ;;  %v5243_v14 = vpack.c.bf16 %v2442_v7, %v2438_v6  ;;  %v3339_v3 = vld [vmem:[#allocation12 + $0x1020] sm:$0xff]  ;;  %v5515_v5 = vpack.c.bf16 %v3342_v62, %v3338_v61  ;;  %v3337_v6 = vld [vmem:[#allocation12 + $0x1010] sm:$0xff] }
 0x3d3   : > { %5352 = vmatprep.subr.bf16.mxu1 %v5351_v18  ;;  %v5371_v18 = vpack.c.bf16 %v2444_v9, %v2440_v8  ;;  %v3341_v7 = vld [vmem:[#allocation12 + $0x1030] sm:$0xff]  ;;  %v3344_v8 = vld [vmem:[#allocation12 + $0x1048] sm:$0xff]  ;;  %v3367_v59 = vld [vmem:[#allocation12 + $0x1100] sm:$0xff] }
 0x3d4   : > { %v3348_v9 = vld [vmem:[#allocation12 + $0x1068] sm:$0xff]  ;;  %v3371_v61 = vld [vmem:[#allocation12 + $0x1120] sm:$0xff]  ;;  %v3369_v62 = vld [vmem:[#allocation12 + $0x1110] sm:$0xff] }
 0x3d5   : > { %5226 = vmatpush1.bf16.msra.mxu0 %v5225_v23  ;;  %v5245_v23 = vpack.c.bf16 %v2441_v16, %v2437_v15  ;;  %v3346_v16 = vld [vmem:[#allocation12 + $0x1058] sm:$0xff] }
 0x3d6   : > { %5354 = vmatpush1.bf16.msra.mxu1 %v5353_v26  ;;  %5228 = vmatprep.subr.bf16.mxu0 %v5227_v25  ;;  %v5373_v26 = vpack.c.bf16 %v2443_v24, %v2439_v17  ;;  %v5247_v25 = vpack.c.bf16 %v2450_v20, %v2446_v19  ;;  %v3350_v17 = vld [vmem:[#allocation12 + $0x1078] sm:$0xff]  ;;  %v3343_v24 = vld [vmem:[#allocation12 + $0x1040] sm:$0xff]  ;;  %v3345_v20 = vld [vmem:[#allocation12 + $0x1050] sm:$0xff] }
 0x3d7   : > { %5356 = vmatprep.subr.bf16.mxu1 %v5355_v30  ;;  %v5375_v30 = vpack.c.bf16 %v2452_v22, %v2448_v21  ;;  %v3347_v19 = vld [vmem:[#allocation12 + $0x1060] sm:$0xff]  ;;  %v5391_v21 = vpack.c.bf16 %v3348_v9, %v3344_v8  ;;  %v3349_v22 = vld [vmem:[#allocation12 + $0x1070] sm:$0xff] }
 0x3d8   : > { %v3379_v8 = vld [vmem:[#allocation12 + $0x1160] sm:$0xff]  ;;  %v3377_v9 = vld [vmem:[#allocation12 + $0x1150] sm:$0xff] }
 0x3d9   : > { %5230 = vmatpush1.bf16.msra.mxu0 %v5229_v36  ;;  %v5249_v36 = vpack.c.bf16 %v2449_v28, %v2445_v27  ;;  %v3354_v27 = vld [vmem:[#allocation12 + $0x1098] sm:$0xff] }
 0x3da   : > { %5358 = vmatpush1.bf16.msra.mxu1 %v5357_v37  ;;  %5232 = vmatprep.subr.bf16.mxu0 %v5231_v38  ;;  %v5377_v37 = vpack.c.bf16 %v2451_v31, %v2447_v29  ;;  %v5251_v38 = vpack.c.bf16 %v2458_v33, %v2454_v32  ;;  %v3358_v28 = vld [vmem:[#allocation12 + $0x10b8] sm:$0xff]  ;;  %v5521_v31 = vpack.c.bf16 %v3349_v22, %v3345_v20  ;;  %v3351_v33 = vld [vmem:[#allocation12 + $0x1080] sm:$0xff]  ;;  %v3385_v22 = vld [vmem:[#allocation12 + $0x1190] sm:$0xff] }
 0x3db   : > { %5360 = vmatprep.subr.bf16.mxu1 %v5359_v47  ;;  %v5379_v47 = vpack.c.bf16 %v2460_v35, %v2456_v34  ;;  %v3355_v34 = vld [vmem:[#allocation12 + $0x10a0] sm:$0xff]  ;;  %v3353_v35 = vld [vmem:[#allocation12 + $0x1090] sm:$0xff] }
 0x3dc   : > { %v3383_v20 = vld [vmem:[#allocation12 + $0x1180] sm:$0xff] }
 0x3dd   : > { %5234 = vmatpush1.bf16.msra.mxu0 %v5233_v49  ;;  %v5253_v49 = vpack.c.bf16 %v2457_v40, %v2453_v39  ;;  %v3364_v39 = vld [vmem:[#allocation12 + $0x10e8] sm:$0xff]  ;;  %v3362_v40 = vld [vmem:[#allocation12 + $0x10d8] sm:$0xff] }
 0x3de   : > { %5362 = vmatpush1.bf16.msra.mxu1 %v5361_v50  ;;  %5236 = vmatprep.subr.bf16.mxu0 %v5235_v51  ;;  %v5381_v50 = vpack.c.bf16 %v2459_v42, %v2455_v41  ;;  %v5255_v51 = vpack.c.bf16 %v2466_v44, %v2462_v43  ;;  %v3366_v41 = vld [vmem:[#allocation12 + $0x10f8] sm:$0xff]  ;;  %v3359_v44 = vld [vmem:[#allocation12 + $0x10c0] sm:$0xff] }
 0x3df   : > { %5364 = vmatprep.subr.bf16.mxu1 %v5363_v56  ;;  %v5383_v56 = vpack.c.bf16 %v2468_v48, %v2464_v46  ;;  %v3363_v46 = vld [vmem:[#allocation12 + $0x10e0] sm:$0xff]  ;;  %v3361_v48 = vld [vmem:[#allocation12 + $0x10d0] sm:$0xff] }
 0x3e1   : > { %5238 = vmatpush1.bf16.msra.mxu0 %v5237_v63  ;;  %v5257_v63 = vpack.c.bf16 %v2465_v54, %v2461_v52  ;;  %v3372_v52 = vld [vmem:[#allocation12 + $0x1128] sm:$0xff]  ;;  %v3370_v54 = vld [vmem:[#allocation12 + $0x1118] sm:$0xff] }
 0x3e2   : > { %5366 = vmatpush1.bf16.msra.mxu1 %v5365_v0  ;;  %5240 = vmatprep.subr.bf16.mxu0 %v5239_v1  ;;  %v3327_v0 = vld [vmem:[#allocation2 + $0x8] sm:$0xfc]  ;;  %v5385_v1 = vpack.c.bf16 %v2467_v57, %v2463_v55 }
 0x3e3   : > { %5368 = vmatprep.subr.bf16.mxu1 %v5367_v4  ;;  %v3331_v4 = vld [vmem:[#allocation2 + $0x28] sm:$0x3] }
 0x3e4   : > { %v3603_v15 = vrot.slane %v3331_v4, 2  ;;  %v3374_v55 = vld [vmem:[#allocation12 + $0x1138] sm:$0xff]  ;;  %v5405_v4 = vpack.c.bf16 %v3371_v61, %v3367_v59  ;;  %v3407_v59 = vld [vmem:[#allocation12 + $0x1240] sm:$0xff] }
 0x3e5   : > { %5242 = vmatpush1.bf16.msra.mxu0 %v5241_v10  ;;  %v2211_v10 = vld [vmem:[#allocation2 + $0x10] sm:$0xff] }
 0x3e6   : > { %5370 = vmatpush1.bf16.msra.mxu1 %v5369_v13  ;;  %5244 = vmatprep.subr.bf16.mxu0 %v5243_v14  ;;  %v5389_v13 = vpack.c.bf16 %v3339_v3, %v3335_v2  ;;  %v3602_v14 = vrot.slane %v3327_v0, 2  ;;  %v3373_v0 = vld [vmem:[#allocation12 + $0x1130] sm:$0xff]  ;;  %v3378_v2 = vld [vmem:[#allocation12 + $0x1158] sm:$0xff]  ;;  %v3411_v61 = vld [vmem:[#allocation12 + $0x1260] sm:$0xff] }
 0x3e7   : > { %5372 = vmatprep.subr.bf16.mxu1 %v5371_v18  ;;  %v5517_v18 = vpack.c.bf16 %v3341_v7, %v3337_v6  ;;  %v3382_v3 = vld [vmem:[#allocation12 + $0x1178] sm:$0xff]  ;;  %v3375_v7 = vld [vmem:[#allocation12 + $0x1140] sm:$0xff] }
 0x3e8   : > { %v3604_v29 = vsel %vm1854_vm2, %v3602_v14, %v3603_v15  ;;  %v3384_v14 = vld [vmem:[#allocation12 + $0x1188] sm:$0xff] }
 0x3e9   : > { %5246 = vmatpush1.bf16.msra.mxu0 %v5245_v23  ;;  %v3352_v23 = vld [vmem:[#allocation12 + $0x1088] sm:$0xff] }
 0x3ea   : > { %5374 = vmatpush1.bf16.msra.mxu1 %v5373_v26  ;;  %5248 = vmatprep.subr.bf16.mxu0 %v5247_v25  ;;  %v3356_v26 = vld [vmem:[#allocation12 + $0x10a8] sm:$0xff]  ;;  %v5519_v25 = vpack.c.bf16 %v3350_v17, %v3346_v16  ;;  %v3386_v16 = vld [vmem:[#allocation12 + $0x1198] sm:$0xff] }
 0x3eb   : > { %5376 = vmatprep.subr.bf16.mxu1 %v5375_v30  ;;  %v5393_v30 = vpack.c.bf16 %v3347_v19, %v3343_v24  ;;  %v5395_v32 = vpack.c.bf16 %v3356_v26, %v3352_v23  ;;  %v3388_v15 = vld [vmem:[#allocation12 + $0x11a8] sm:$0xff]  ;;  %v3390_v17 = vld [vmem:[#allocation12 + $0x11b8] sm:$0xff]  ;;  %v3389_v26 = vld [vmem:[#allocation12 + $0x11b0] sm:$0xff] }
 0x3ec   : > { %v5411_v19 = vpack.c.bf16 %v3388_v15, %v3384_v14  ;;  %v5539_v23 = vpack.c.bf16 %v3390_v17, %v3386_v16  ;;  %v3424_v14 = vld [vmem:[#allocation12 + $0x12c8] sm:$0xff]  ;;  %v3426_v16 = vld [vmem:[#allocation12 + $0x12d8] sm:$0xff] }
 0x3ed   : > { %5250 = vmatpush1.bf16.msra.mxu0 %v5249_v36  ;;  %v5523_v36 = vpack.c.bf16 %v3358_v28, %v3354_v27  ;;  %v3396_v27 = vld [vmem:[#allocation12 + $0x11e8] sm:$0xff]  ;;  %v3394_v28 = vld [vmem:[#allocation12 + $0x11d8] sm:$0xff] }
 0x3ee   : > { %5378 = vmatpush1.bf16.msra.mxu1 %v5377_v37  ;;  %5252 = vmatprep.subr.bf16.mxu0 %v5251_v38  ;;  %v3357_v37 = vld [vmem:[#allocation12 + $0x10b0] sm:$0xff]  ;;  %v3360_v38 = vld [vmem:[#allocation12 + $0x10c8] sm:$0xff]  ;;  %v3430_v17 = vld [vmem:[#allocation12 + $0x12f8] sm:$0xff] }
 0x3ef   : > { %5380 = vmatprep.subr.bf16.mxu1 %v5379_v47  ;;  %v5397_v47 = vpack.c.bf16 %v3355_v34, %v3351_v33  ;;  %v5525_v42 = vpack.c.bf16 %v3357_v37, %v3353_v35  ;;  %v5399_v43 = vpack.c.bf16 %v3364_v39, %v3360_v38  ;;  %v3391_v33 = vld [vmem:[#allocation12 + $0x11c0] sm:$0xff]  ;;  %v3393_v35 = vld [vmem:[#allocation12 + $0x11d0] sm:$0xff]  ;;  %v3400_v38 = vld [vmem:[#allocation12 + $0x1208] sm:$0xff] }
 0x3f0   : > { %v3395_v34 = vld [vmem:[#allocation12 + $0x11e0] sm:$0xff]  ;;  %v3397_v37 = vld [vmem:[#allocation12 + $0x11f0] sm:$0xff]  ;;  %v3404_v39 = vld [vmem:[#allocation12 + $0x1228] sm:$0xff] }
 0x3f1   : > { %5254 = vmatpush1.bf16.msra.mxu0 %v5253_v49  ;;  %v5527_v49 = vpack.c.bf16 %v3366_v41, %v3362_v40  ;;  %v3402_v40 = vld [vmem:[#allocation12 + $0x1218] sm:$0xff]  ;;  %v3428_v15 = vld [vmem:[#allocation12 + $0x12e8] sm:$0xff] }
 0x3f2   : > { %5382 = vmatpush1.bf16.msra.mxu1 %v5381_v50  ;;  %5256 = vmatprep.subr.bf16.mxu0 %v5255_v51  ;;  %v3365_v50 = vld [vmem:[#allocation12 + $0x10f0] sm:$0xff]  ;;  %v3368_v51 = vld [vmem:[#allocation12 + $0x1108] sm:$0xff]  ;;  %v3406_v41 = vld [vmem:[#allocation12 + $0x1238] sm:$0xff] }
 0x3f3   : > { %5384 = vmatprep.subr.bf16.mxu1 %v5383_v56  ;;  %v5401_v56 = vpack.c.bf16 %v3363_v46, %v3359_v44  ;;  %v5529_v57 = vpack.c.bf16 %v3365_v50, %v3361_v48  ;;  %v5403_v58 = vpack.c.bf16 %v3372_v52, %v3368_v51  ;;  %v3399_v44 = vld [vmem:[#allocation12 + $0x1200] sm:$0xff]  ;;  %v3401_v48 = vld [vmem:[#allocation12 + $0x1210] sm:$0xff]  ;;  %v3408_v51 = vld [vmem:[#allocation12 + $0x1248] sm:$0xff] }
 0x3f4   : > { %v3403_v46 = vld [vmem:[#allocation12 + $0x1220] sm:$0xff]  ;;  %v3405_v50 = vld [vmem:[#allocation12 + $0x1230] sm:$0xff]  ;;  %v3412_v52 = vld [vmem:[#allocation12 + $0x1268] sm:$0xff] }
 0x3f5   : > { %5258 = vmatpush1.bf16.msra.mxu0 %v5257_v63  ;;  %v5531_v63 = vpack.c.bf16 %v3374_v55, %v3370_v54  ;;  %v3410_v54 = vld [vmem:[#allocation12 + $0x1258] sm:$0xff] }
 0x3f6   : > { %5386 = vmatpush1.bf16.msra.mxu1 %v5385_v1  ;;  %5388 = vmatprep.subr.bf16.mxu0 %v5387_v60  ;;  %v3376_v1 = vld [vmem:[#allocation12 + $0x1148] sm:$0xff]  ;;  %v3414_v55 = vld [vmem:[#allocation12 + $0x1278] sm:$0xff] }
 0x3f7   : > { %5516 = vmatprep.subr.bf16.mxu1 %v5515_v5  ;;  %v3380_v60 = vld [vmem:[#allocation12 + $0x1168] sm:$0xff]  ;;  %v5533_v5 = vpack.c.bf16 %v3373_v0, %v3369_v62  ;;  %v3409_v62 = vld [vmem:[#allocation12 + $0x1250] sm:$0xff] }
 0x3f8   : > { %3178 = vmatmul.mubr.f32.vlgmr.msra.gmra.mrb[2].mxu0 %v2211_v10  ;;  %v5407_v6 = vpack.c.bf16 %v3380_v60, %v3376_v1  ;;  %v3413_v0 = vld [vmem:[#allocation12 + $0x1270] sm:$0xff]  ;;  %v3416_v1 = vld [vmem:[#allocation12 + $0x1288] sm:$0xff] }
 0x3f9   : > { %3320 = vmatmul.mubr.f32.vlgmr.msra.gmra.mrb[2].mxu1 %v2211_v10  ;;  %5390 = vmatpush1.bf16.msra.mxu0 %v5389_v13  ;;  %v5535_v10 = vpack.c.bf16 %v3382_v3, %v3378_v2  ;;  %v3381_v13 = vld [vmem:[#allocation12 + $0x1170] sm:$0xff]  ;;  %v3420_v60 = vld [vmem:[#allocation12 + $0x12a8] sm:$0xff]  ;;  %v3418_v2 = vld [vmem:[#allocation12 + $0x1298] sm:$0xff] }
 0x3fa   : > { %3679 = vmatprep.mubr.f32.mxu0 %v3604_v29  ;;  %5518 = vmatpush1.bf16.msra.mxu1 %v5517_v18  ;;  %v5409_v18 = vpack.c.bf16 %v3379_v8, %v3375_v7  ;;  %v5537_v24 = vpack.c.bf16 %v3381_v13, %v3377_v9  ;;  %v3422_v3 = vld [vmem:[#allocation12 + $0x12b8] sm:$0xff]  ;;  %v3415_v7 = vld [vmem:[#allocation12 + $0x1280] sm:$0xff]  ;;  %v3417_v9 = vld [vmem:[#allocation12 + $0x1290] sm:$0xff] }
 0x3fb   : > { %3821 = vmatprep.mubr.f32.mxu1 %v3604_v29  ;;  %5392 = vmatprep.subr.bf16.mxu0 %v5391_v21  ;;  %v3387_v21 = vld [vmem:[#allocation12 + $0x11a0] sm:$0xff]  ;;  %v3398_v29 = vld [vmem:[#allocation12 + $0x11f8] sm:$0xff]  ;;  %v3421_v13 = vld [vmem:[#allocation12 + $0x12b0] sm:$0xff] }
 0x3fc   : > { %5520 = vmatprep.subr.bf16.mxu1 %v5519_v25  ;;  %v3392_v25 = vld [vmem:[#allocation12 + $0x11c8] sm:$0xff]  ;;  %v3419_v8 = vld [vmem:[#allocation12 + $0x12a0] sm:$0xff] }
 0x3fd   : > { %5394 = vmatpush1.bf16.msra.mxu0 %v5393_v30  ;;  %v5413_v30 = vpack.c.bf16 %v3387_v21, %v3383_v20  ;;  %v3423_v20 = vld [vmem:[#allocation12 + $0x12c0] sm:$0xff] }
 0x3fe   : > { %5522 = vmatpush1.bf16.msra.mxu1 %v5521_v31  ;;  %5396 = vmatprep.subr.bf16.mxu0 %v5395_v32  ;;  %v5541_v31 = vpack.c.bf16 %v3389_v26, %v3385_v22  ;;  %v5415_v32 = vpack.c.bf16 %v3396_v27, %v3392_v25  ;;  %v3427_v21 = vld [vmem:[#allocation12 + $0x12e0] sm:$0xff]  ;;  %v3425_v22 = vld [vmem:[#allocation12 + $0x12d0] sm:$0xff]  ;;  %v3432_v25 = vld [vmem:[#allocation12 + $0x1308] sm:$0xff] }
 0x3ff   : > { %5524 = vmatprep.subr.bf16.mxu1 %v5523_v36  ;;  %v5543_v36 = vpack.c.bf16 %v3398_v29, %v3394_v28  ;;  %v3429_v26 = vld [vmem:[#allocation12 + $0x12f0] sm:$0xff]  ;;  %v3436_v27 = vld [vmem:[#allocation12 + $0x1328] sm:$0xff]  ;;  %v3434_v28 = vld [vmem:[#allocation12 + $0x1318] sm:$0xff] }
 0x400   : > { %v3438_v29 = vld [vmem:[#allocation12 + $0x1338] sm:$0xff] }
 0x401   : > { %5398 = vmatpush1.bf16.msra.mxu0 %v5397_v47  ;;  %v5417_v47 = vpack.c.bf16 %v3395_v34, %v3391_v33  ;;  %v3431_v33 = vld [vmem:[#allocation12 + $0x1300] sm:$0xff] }
 0x402   : > { %5526 = vmatpush1.bf16.msra.mxu1 %v5525_v42  ;;  %5400 = vmatprep.subr.bf16.mxu0 %v5399_v43  ;;  %v5545_v42 = vpack.c.bf16 %v3397_v37, %v3393_v35  ;;  %v5419_v43 = vpack.c.bf16 %v3404_v39, %v3400_v38  ;;  %v3435_v34 = vld [vmem:[#allocation12 + $0x1320] sm:$0xff]  ;;  %v3433_v35 = vld [vmem:[#allocation12 + $0x1310] sm:$0xff]  ;;  %v3440_v38 = vld [vmem:[#allocation12 + $0x1348] sm:$0xff] }
 0x403   : > { %5528 = vmatprep.subr.bf16.mxu1 %v5527_v49  ;;  %v5547_v49 = vpack.c.bf16 %v3406_v41, %v3402_v40  ;;  %v3437_v37 = vld [vmem:[#allocation12 + $0x1330] sm:$0xff]  ;;  %v3444_v39 = vld [vmem:[#allocation12 + $0x1368] sm:$0xff]  ;;  %v3442_v40 = vld [vmem:[#allocation12 + $0x1358] sm:$0xff] }
 0x404   : > { %v3446_v41 = vld [vmem:[#allocation12 + $0x1378] sm:$0xff] }
 0x405   : > { %5402 = vmatpush1.bf16.msra.mxu0 %v5401_v56  ;;  %v5421_v56 = vpack.c.bf16 %v3403_v46, %v3399_v44  ;;  %v3439_v44 = vld [vmem:[#allocation12 + $0x1340] sm:$0xff] }
 0x406   : > { %5530 = vmatpush1.bf16.msra.mxu1 %v5529_v57  ;;  %5404 = vmatprep.subr.bf16.mxu0 %v5403_v58  ;;  %v5549_v57 = vpack.c.bf16 %v3405_v50, %v3401_v48  ;;  %v5423_v58 = vpack.c.bf16 %v3412_v52, %v3408_v51  ;;  %v3443_v46 = vld [vmem:[#allocation12 + $0x1360] sm:$0xff]  ;;  %v3441_v48 = vld [vmem:[#allocation12 + $0x1350] sm:$0xff]  ;;  %v3448_v51 = vld [vmem:[#allocation12 + $0x1388] sm:$0xff] }
 0x407   : > { %5532 = vmatprep.subr.bf16.mxu1 %v5531_v63  ;;  %v5551_v63 = vpack.c.bf16 %v3414_v55, %v3410_v54  ;;  %v3445_v50 = vld [vmem:[#allocation12 + $0x1370] sm:$0xff]  ;;  %v3452_v52 = vld [vmem:[#allocation12 + $0x13a8] sm:$0xff]  ;;  %v3450_v54 = vld [vmem:[#allocation12 + $0x1398] sm:$0xff] }
 0x408   : > { %v3454_v55 = vld [vmem:[#allocation12 + $0x13b8] sm:$0xff] }
 0x409   : > { %5406 = vmatpush1.bf16.msra.mxu0 %v5405_v4  ;;  %v5425_v4 = vpack.c.bf16 %v3411_v61, %v3407_v59  ;;  %v3447_v59 = vld [vmem:[#allocation12 + $0x1380] sm:$0xff] }
 0x40a   : > { %5534 = vmatpush1.bf16.msra.mxu1 %v5533_v5  ;;  %5408 = vmatprep.subr.bf16.mxu0 %v5407_v6  ;;  %v5553_v5 = vpack.c.bf16 %v3413_v0, %v3409_v62  ;;  %v5427_v6 = vpack.c.bf16 %v3420_v60, %v3416_v1  ;;  %v3451_v61 = vld [vmem:[#allocation12 + $0x13a0] sm:$0xff]  ;;  %v3449_v62 = vld [vmem:[#allocation12 + $0x1390] sm:$0xff]  ;;  %v3456_v1 = vld [vmem:[#allocation12 + $0x13c8] sm:$0xff] }
 0x40b   : > { %5536 = vmatprep.subr.bf16.mxu1 %v5535_v10  ;;  %v5555_v10 = vpack.c.bf16 %v3422_v3, %v3418_v2  ;;  %v3453_v0 = vld [vmem:[#allocation12 + $0x13b0] sm:$0xff]  ;;  %v3460_v60 = vld [vmem:[#allocation12 + $0x13e8] sm:$0xff]  ;;  %v3458_v2 = vld [vmem:[#allocation12 + $0x13d8] sm:$0xff] }
 0x40c   : > { %v3462_v3 = vld [vmem:[#allocation12 + $0x13f8] sm:$0xff] }
 0x40d   : > { %5410 = vmatpush1.bf16.msra.mxu0 %v5409_v18  ;;  %v5429_v18 = vpack.c.bf16 %v3419_v8, %v3415_v7  ;;  %v3455_v7 = vld [vmem:[#allocation12 + $0x13c0] sm:$0xff] }
 0x40e   : > { %5538 = vmatpush1.bf16.msra.mxu1 %v5537_v24  ;;  %5412 = vmatprep.subr.bf16.mxu0 %v5411_v19  ;;  %v5557_v24 = vpack.c.bf16 %v3421_v13, %v3417_v9  ;;  %v5431_v19 = vpack.c.bf16 %v3428_v15, %v3424_v14  ;;  %v3459_v8 = vld [vmem:[#allocation12 + $0x13e0] sm:$0xff]  ;;  %v3457_v9 = vld [vmem:[#allocation12 + $0x13d0] sm:$0xff]  ;;  %v5575_v13 = vpack.c.bf16 %v3462_v3, %v3458_v2  ;;  %v3464_v15 = vld [vmem:[#allocation12 + $0x1408] sm:$0xff] }
 0x40f   : > { %5540 = vmatprep.subr.bf16.mxu1 %v5539_v23  ;;  %v5559_v23 = vpack.c.bf16 %v3430_v17, %v3426_v16  ;;  %v3461_v14 = vld [vmem:[#allocation12 + $0x13f0] sm:$0xff]  ;;  %v3468_v16 = vld [vmem:[#allocation12 + $0x1428] sm:$0xff] }
 0x410   : > { %v3330_v17 = vld [vmem:[#allocation2 + $0x20] sm:$0x3] }
 0x411   : > { %5414 = vmatpush1.bf16.msra.mxu0 %v5413_v30  ;;  %v5433_v30 = vpack.c.bf16 %v3427_v21, %v3423_v20  ;;  %v3329_v20 = vld [vmem:[#allocation2 + $0x18] sm:$0xfc]  ;;  %v5577_v21 = vpack.c.bf16 %v3461_v14, %v3457_v9  ;;  %v3498_v14 = vld [vmem:[#allocation12 + $0x1518] sm:$0xff] }
 0x412   : > { %5542 = vmatpush1.bf16.msra.mxu1 %v5541_v31  ;;  %5416 = vmatprep.subr.bf16.mxu0 %v5415_v32  ;;  %v5561_v31 = vpack.c.bf16 %v3429_v26, %v3425_v22  ;;  %v5435_v32 = vpack.c.bf16 %v3436_v27, %v3432_v25  ;;  %v5451_v22 = vpack.c.bf16 %v3468_v16, %v3464_v15  ;;  %v3467_v26 = vld [vmem:[#allocation12 + $0x1420] sm:$0xff]  ;;  %v3333_v25 = vld [vmem:[#allocation2 + $0x38] sm:$0x3]  ;;  %v3493_v9 = vld [vmem:[#allocation12 + $0x14f0] sm:$0xff] }
 0x413   : > { %5544 = vmatprep.subr.bf16.mxu1 %v5543_v36  ;;  %v5563_v36 = vpack.c.bf16 %v3438_v29, %v3434_v28  ;;  %v3600_v28 = vrot.slane %v3330_v17, 2  ;;  %v3502_v15 = vld [vmem:[#allocation12 + $0x1538] sm:$0xff] }
 0x415   : > { %5418 = vmatpush1.bf16.msra.mxu0 %v5417_v47  ;;  %v5437_v47 = vpack.c.bf16 %v3435_v34, %v3431_v33  ;;  %v3476_v33 = vld [vmem:[#allocation12 + $0x1468] sm:$0xff] }
 0x416   : > { %5546 = vmatpush1.bf16.msra.mxu1 %v5545_v42  ;;  %5420 = vmatprep.subr.bf16.mxu0 %v5419_v43  ;;  %v5565_v42 = vpack.c.bf16 %v3437_v37, %v3433_v35  ;;  %v5439_v43 = vpack.c.bf16 %v3444_v39, %v3440_v38  ;;  %v3608_v35 = vrot.slane %v3329_v20, 2  ;;  %v3474_v37 = vld [vmem:[#allocation12 + $0x1458] sm:$0xff]  ;;  %v3497_v20 = vld [vmem:[#allocation12 + $0x1510] sm:$0xff] }
 0x417   : > { %5548 = vmatprep.subr.bf16.mxu1 %v5547_v49  ;;  %v5567_v49 = vpack.c.bf16 %v3446_v41, %v3442_v40  ;;  %v3478_v38 = vld [vmem:[#allocation12 + $0x1478] sm:$0xff]  ;;  %v3471_v40 = vld [vmem:[#allocation12 + $0x1440] sm:$0xff] }
 0x418   : > { %v3475_v41 = vld [vmem:[#allocation12 + $0x1460] sm:$0xff] }
 0x419   : > { %5422 = vmatpush1.bf16.msra.mxu0 %v5421_v56  ;;  %v5441_v56 = vpack.c.bf16 %v3443_v46, %v3439_v44  ;;  %v3477_v44 = vld [vmem:[#allocation12 + $0x1470] sm:$0xff]  ;;  %v3480_v46 = vld [vmem:[#allocation12 + $0x1488] sm:$0xff] }
 0x41a   : > { %5550 = vmatpush1.bf16.msra.mxu1 %v5549_v57  ;;  %5424 = vmatprep.subr.bf16.mxu0 %v5423_v58  ;;  %v5569_v57 = vpack.c.bf16 %v3445_v50, %v3441_v48  ;;  %v5443_v58 = vpack.c.bf16 %v3452_v52, %v3448_v51  ;;  %v3484_v48 = vld [vmem:[#allocation12 + $0x14a8] sm:$0xff]  ;;  %v3482_v50 = vld [vmem:[#allocation12 + $0x1498] sm:$0xff] }
 0x41b   : > { %5552 = vmatprep.subr.bf16.mxu1 %v5551_v63  ;;  %v5571_v63 = vpack.c.bf16 %v3454_v55, %v3450_v54  ;;  %v3486_v51 = vld [vmem:[#allocation12 + $0x14b8] sm:$0xff]  ;;  %v5457_v54 = vpack.c.bf16 %v3475_v41, %v3471_v40 }
 0x41d   : > { %5426 = vmatpush1.bf16.msra.mxu0 %v5425_v4  ;;  %v5445_v4 = vpack.c.bf16 %v3451_v61, %v3447_v59  ;;  %v3481_v59 = vld [vmem:[#allocation12 + $0x1490] sm:$0xff]  ;;  %v5587_v61 = vpack.c.bf16 %v3486_v51, %v3482_v50  ;;  %v3524_v50 = vld [vmem:[#allocation12 + $0x15e8] sm:$0xff]  ;;  %v3522_v51 = vld [vmem:[#allocation12 + $0x15d8] sm:$0xff] }
 0x41e   : > { %5554 = vmatpush1.bf16.msra.mxu1 %v5553_v5  ;;  %5428 = vmatprep.subr.bf16.mxu0 %v5427_v6  ;;  %v5573_v5 = vpack.c.bf16 %v3453_v0, %v3449_v62  ;;  %v5447_v6 = vpack.c.bf16 %v3460_v60, %v3456_v1  ;;  %v3485_v62 = vld [vmem:[#allocation12 + $0x14b0] sm:$0xff]  ;;  %v3492_v0 = vld [vmem:[#allocation12 + $0x14e8] sm:$0xff]  ;;  %v3490_v1 = vld [vmem:[#allocation12 + $0x14d8] sm:$0xff] }
 0x41f   : > { %5556 = vmatprep.subr.bf16.mxu1 %v5555_v10  ;;  %v3326_v10 = vld [vmem:[#allocation2] sm:$0xfc]  ;;  %v5589_v3 = vpack.c.bf16 %v3485_v62, %v3481_v59 }
 0x420   : > { %v3599_v27 = vrot.slane %v3326_v10, 2  ;;  %v3494_v60 = vld [vmem:[#allocation12 + $0x14f8] sm:$0xff]  ;;  %v3496_v10 = vld [vmem:[#allocation12 + $0x1508] sm:$0xff]  ;;  %v3521_v59 = vld [vmem:[#allocation12 + $0x15d0] sm:$0xff] }
 0x421   : > { %5430 = vmatpush1.bf16.msra.mxu0 %v5429_v18  ;;  %v3466_v18 = vld [vmem:[#allocation12 + $0x1418] sm:$0xff]  ;;  %v3525_v62 = vld [vmem:[#allocation12 + $0x15f0] sm:$0xff] }
 0x422   : > { %5558 = vmatpush1.bf16.msra.mxu1 %v5557_v24  ;;  %5432 = vmatprep.subr.bf16.mxu0 %v5431_v19  ;;  %v3470_v24 = vld [vmem:[#allocation12 + $0x1438] sm:$0xff]  ;;  %v5449_v19 = vpack.c.bf16 %v3459_v8, %v3455_v7  ;;  %v3489_v7 = vld [vmem:[#allocation12 + $0x14d0] sm:$0xff]  ;;  %v5591_v8 = vpack.c.bf16 %v3494_v60, %v3490_v1 }
 0x423   : > { %5560 = vmatprep.subr.bf16.mxu1 %v5559_v23  ;;  %v3463_v23 = vld [vmem:[#allocation12 + $0x1400] sm:$0xff]  ;;  %v5579_v29 = vpack.c.bf16 %v3470_v24, %v3466_v18  ;;  %v5593_v17 = vpack.c.bf16 %v3493_v9, %v3489_v7  ;;  %v3530_v1 = vld [vmem:[#allocation12 + $0x1618] sm:$0xff]  ;;  %v3529_v7 = vld [vmem:[#allocation12 + $0x1610] sm:$0xff] }
 0x424   : > { %v5453_v34 = vpack.c.bf16 %v3467_v26, %v3463_v23  ;;  %v3495_v24 = vld [vmem:[#allocation12 + $0x1500] sm:$0xff]  ;;  %v3504_v23 = vld [vmem:[#allocation12 + $0x1548] sm:$0xff]  ;;  %v3534_v60 = vld [vmem:[#allocation12 + $0x1638] sm:$0xff] }
 0x425   : > { %5434 = vmatpush1.bf16.msra.mxu0 %v5433_v30  ;;  %v3465_v30 = vld [vmem:[#allocation12 + $0x1410] sm:$0xff]  ;;  %v3508_v26 = vld [vmem:[#allocation12 + $0x1568] sm:$0xff] }
 0x426   : > { %5562 = vmatpush1.bf16.msra.mxu1 %v5561_v31  ;;  %5436 = vmatprep.subr.bf16.mxu0 %v5435_v32  ;;  %v3469_v31 = vld [vmem:[#allocation12 + $0x1430] sm:$0xff]  ;;  %v3472_v32 = vld [vmem:[#allocation12 + $0x1448] sm:$0xff] }
 0x427   : > { %5564 = vmatprep.subr.bf16.mxu1 %v5563_v36  ;;  %v3609_v36 = vrot.slane %v3333_v25, 2  ;;  %v5581_v39 = vpack.c.bf16 %v3469_v31, %v3465_v30  ;;  %v3506_v25 = vld [vmem:[#allocation12 + $0x1558] sm:$0xff]  ;;  %v5471_v30 = vpack.c.bf16 %v3508_v26, %v3504_v23  ;;  %v3503_v31 = vld [vmem:[#allocation12 + $0x1540] sm:$0xff]  ;;  %v3533_v9 = vld [vmem:[#allocation12 + $0x1630] sm:$0xff] }
 0x428   : > { %v3544_v23 = vld [vmem:[#allocation12 + $0x1688] sm:$0xff] }
 0x429   : > { %5438 = vmatpush1.bf16.msra.mxu0 %v5437_v47  ;;  %v3473_v47 = vld [vmem:[#allocation12 + $0x1450] sm:$0xff]  ;;  %v3610_v52 = vsel %vm1854_vm2, %v3608_v35, %v3609_v36  ;;  %v3512_v36 = vld [vmem:[#allocation12 + $0x1588] sm:$0xff] }
 0x42a   : > { %5566 = vmatpush1.bf16.msra.mxu1 %v5565_v42  ;;  %5440 = vmatprep.subr.bf16.mxu0 %v5439_v43  ;;  %v3601_v42 = vsel %vm1854_vm2, %v3599_v27, %v3600_v28  ;;  %v5455_v43 = vpack.c.bf16 %v3476_v33, %v3472_v32  ;;  %v5585_v55 = vpack.c.bf16 %v3477_v44, %v3473_v47  ;;  %v3510_v27 = vld [vmem:[#allocation12 + $0x1578] sm:$0xff]  ;;  %v3507_v32 = vld [vmem:[#allocation12 + $0x1560] sm:$0xff]  ;;  %v3505_v33 = vld [vmem:[#allocation12 + $0x1550] sm:$0xff] }
 0x42b   : > { %5568 = vmatprep.subr.bf16.mxu1 %v5567_v49  ;;  %v5583_v49 = vpack.c.bf16 %v3478_v38, %v3474_v37  ;;  %v3509_v35 = vld [vmem:[#allocation12 + $0x1570] sm:$0xff]  ;;  %v3516_v37 = vld [vmem:[#allocation12 + $0x15a8] sm:$0xff]  ;;  %v3514_v38 = vld [vmem:[#allocation12 + $0x1598] sm:$0xff]  ;;  %v5473_v40 = vpack.c.bf16 %v3507_v32, %v3503_v31 }
 0x42c   : > { %v5601_v41 = vpack.c.bf16 %v3509_v35, %v3505_v33  ;;  %v5475_v47 = vpack.c.bf16 %v3516_v37, %v3512_v36  ;;  %v3513_v44 = vld [vmem:[#allocation12 + $0x1590] sm:$0xff]  ;;  %v3548_v26 = vld [vmem:[#allocation12 + $0x16a8] sm:$0xff]  ;;  %v3543_v31 = vld [vmem:[#allocation12 + $0x1680] sm:$0xff] }
 0x42d   : > { %5442 = vmatpush1.bf16.msra.mxu0 %v5441_v56  ;;  %v5459_v56 = vpack.c.bf16 %v3484_v48, %v3480_v46  ;;  %v3517_v48 = vld [vmem:[#allocation12 + $0x15b0] sm:$0xff]  ;;  %v3547_v32 = vld [vmem:[#allocation12 + $0x16a0] sm:$0xff]  ;;  %v3552_v36 = vld [vmem:[#allocation12 + $0x16c8] sm:$0xff] }
 0x42e   : > { %5570 = vmatpush1.bf16.msra.mxu1 %v5569_v57  ;;  %5444 = vmatprep.subr.bf16.mxu0 %v5443_v58  ;;  %v3479_v57 = vld [vmem:[#allocation12 + $0x1480] sm:$0xff]  ;;  %v3545_v33 = vld [vmem:[#allocation12 + $0x1690] sm:$0xff]  ;;  %v3556_v37 = vld [vmem:[#allocation12 + $0x16e8] sm:$0xff] }
 0x42f   : > { %5572 = vmatprep.subr.bf16.mxu1 %v5571_v63  ;;  %v3483_v58 = vld [vmem:[#allocation12 + $0x14a0] sm:$0xff]  ;;  %v3488_v63 = vld [vmem:[#allocation12 + $0x14c8] sm:$0xff]  ;;  %v3549_v35 = vld [vmem:[#allocation12 + $0x16b0] sm:$0xff] }
 0x430   : > { %v5461_v2 = vpack.c.bf16 %v3483_v58, %v3479_v57  ;;  %v3519_v57 = vld [vmem:[#allocation12 + $0x15c0] sm:$0xff] }
 0x431   : > { %5446 = vmatpush1.bf16.msra.mxu0 %v5445_v4  ;;  %v5463_v4 = vpack.c.bf16 %v3492_v0, %v3488_v63  ;;  %v3523_v58 = vld [vmem:[#allocation12 + $0x15e0] sm:$0xff]  ;;  %v3528_v63 = vld [vmem:[#allocation12 + $0x1608] sm:$0xff] }
 0x432   : > { %5574 = vmatpush1.bf16.msra.mxu1 %v5573_v5  ;;  %5448 = vmatprep.subr.bf16.mxu0 %v5447_v6  ;;  %v3487_v5 = vld [vmem:[#allocation12 + $0x14c0] sm:$0xff]  ;;  %v3532_v0 = vld [vmem:[#allocation12 + $0x1628] sm:$0xff] }
 0x433   : > { %5576 = vmatprep.subr.bf16.mxu1 %v5575_v13  ;;  %v3491_v6 = vld [vmem:[#allocation12 + $0x14e0] sm:$0xff]  ;;  %v3500_v13 = vld [vmem:[#allocation12 + $0x1528] sm:$0xff] }
 0x434   : > { %v5465_v16 = vpack.c.bf16 %v3491_v6, %v3487_v5  ;;  %v5467_v18 = vpack.c.bf16 %v3500_v13, %v3496_v10  ;;  %v3527_v5 = vld [vmem:[#allocation12 + $0x1600] sm:$0xff]  ;;  %v3536_v10 = vld [vmem:[#allocation12 + $0x1648] sm:$0xff] }
 0x435   : > { %5450 = vmatpush1.bf16.msra.mxu0 %v5449_v19  ;;  %v3499_v19 = vld [vmem:[#allocation12 + $0x1520] sm:$0xff]  ;;  %v3540_v13 = vld [vmem:[#allocation12 + $0x1668] sm:$0xff] }
 0x436   : > { %5578 = vmatpush1.bf16.msra.mxu1 %v5577_v21  ;;  %5452 = vmatprep.subr.bf16.mxu0 %v5451_v22  ;;  %v5595_v21 = vpack.c.bf16 %v3502_v15, %v3498_v14  ;;  %v3501_v22 = vld [vmem:[#allocation12 + $0x1530] sm:$0xff]  ;;  %v5469_v28 = vpack.c.bf16 %v3499_v19, %v3495_v24  ;;  %v3531_v6 = vld [vmem:[#allocation12 + $0x1620] sm:$0xff]  ;;  %v3538_v14 = vld [vmem:[#allocation12 + $0x1658] sm:$0xff] }
 0x437   : > { %5580 = vmatprep.subr.bf16.mxu1 %v5579_v29  ;;  %v5597_v29 = vpack.c.bf16 %v3501_v22, %v3497_v20  ;;  %v3542_v15 = vld [vmem:[#allocation12 + $0x1678] sm:$0xff]  ;;  %v3535_v24 = vld [vmem:[#allocation12 + $0x1640] sm:$0xff]  ;;  %v3537_v20 = vld [vmem:[#allocation12 + $0x1650] sm:$0xff] }
 0x438   : > { %3680 = vmatmul.mubr.f32.vlgmr.msra.gmra.mrb[2].mxu0 %v3601_v42  ;;  %v3539_v19 = vld [vmem:[#allocation12 + $0x1660] sm:$0xff]  ;;  %v3541_v22 = vld [vmem:[#allocation12 + $0x1670] sm:$0xff] }
 0x439   : > { %3822 = vmatmul.mubr.f32.vlgmr.msra.gmra.mrb[2].mxu1 %v3601_v42  ;;  %5454 = vmatpush1.bf16.msra.mxu0 %v5453_v34  ;;  %v5599_v34 = vpack.c.bf16 %v3510_v27, %v3506_v25  ;;  %v3511_v42 = vld [vmem:[#allocation12 + $0x1580] sm:$0xff]  ;;  %v3546_v25 = vld [vmem:[#allocation12 + $0x1698] sm:$0xff] }
 0x43a   : > { %3750 = vmatprep.mubr.f32.mxu0 %v3610_v52  ;;  %5582 = vmatpush1.bf16.msra.mxu1 %v5581_v39  ;;  %v3518_v39 = vld [vmem:[#allocation12 + $0x15b8] sm:$0xff] }
 0x43b   : > { %3892 = vmatprep.mubr.f32.mxu1 %v3610_v52  ;;  %5456 = vmatprep.subr.bf16.mxu0 %v5455_v43  ;;  %v3515_v43 = vld [vmem:[#allocation12 + $0x15a0] sm:$0xff]  ;;  %v5603_v46 = vpack.c.bf16 %v3518_v39, %v3514_v38  ;;  %v3526_v52 = vld [vmem:[#allocation12 + $0x15f8] sm:$0xff] }
 0x43c   : > { %5584 = vmatprep.subr.bf16.mxu1 %v5583_v49  ;;  %v3520_v49 = vld [vmem:[#allocation12 + $0x15c8] sm:$0xff]  ;;  %v3550_v27 = vld [vmem:[#allocation12 + $0x16b8] sm:$0xff] }
 0x43d   : > { %5458 = vmatpush1.bf16.msra.mxu0 %v5457_v54  ;;  %v5477_v54 = vpack.c.bf16 %v3515_v43, %v3511_v42  ;;  %v3554_v38 = vld [vmem:[#allocation12 + $0x16d8] sm:$0xff]  ;;  %v3551_v42 = vld [vmem:[#allocation12 + $0x16c0] sm:$0xff] }
 0x43e   : > { %5586 = vmatpush1.bf16.msra.mxu1 %v5585_v55  ;;  %5460 = vmatprep.subr.bf16.mxu0 %v5459_v56  ;;  %v5605_v55 = vpack.c.bf16 %v3517_v48, %v3513_v44  ;;  %v5479_v56 = vpack.c.bf16 %v3524_v50, %v3520_v49  ;;  %v3558_v39 = vld [vmem:[#allocation12 + $0x16f8] sm:$0xff]  ;;  %v3555_v43 = vld [vmem:[#allocation12 + $0x16e0] sm:$0xff]  ;;  %v3553_v44 = vld [vmem:[#allocation12 + $0x16d0] sm:$0xff] }
 0x43f   : > { %5588 = vmatprep.subr.bf16.mxu1 %v5587_v61  ;;  %v5607_v61 = vpack.c.bf16 %v3526_v52, %v3522_v51  ;;  %v3557_v48 = vld [vmem:[#allocation12 + $0x16f0] sm:$0xff]  ;;  %v3560_v49 = vld [vmem:[#allocation12 + $0x1708] sm:$0xff]  ;;  %v3562_v51 = vld [vmem:[#allocation12 + $0x1718] sm:$0xff] }
 0x440   : > { %v3564_v50 = vld [vmem:[#allocation12 + $0x1728] sm:$0xff]  ;;  %v3566_v52 = vld [vmem:[#allocation12 + $0x1738] sm:$0xff] }
 0x441   : > { %5462 = vmatpush1.bf16.msra.mxu0 %v5461_v2  ;;  %v5481_v2 = vpack.c.bf16 %v3523_v58, %v3519_v57  ;;  %v3559_v57 = vld [vmem:[#allocation12 + $0x1700] sm:$0xff] }
 0x442   : > { %5590 = vmatpush1.bf16.msra.mxu1 %v5589_v3  ;;  %5464 = vmatprep.subr.bf16.mxu0 %v5463_v4  ;;  %v5609_v3 = vpack.c.bf16 %v3525_v62, %v3521_v59  ;;  %v5483_v4 = vpack.c.bf16 %v3532_v0, %v3528_v63  ;;  %v3563_v58 = vld [vmem:[#allocation12 + $0x1720] sm:$0xff]  ;;  %v3561_v59 = vld [vmem:[#allocation12 + $0x1710] sm:$0xff]  ;;  %v3568_v63 = vld [vmem:[#allocation12 + $0x1748] sm:$0xff] }
 0x443   : > { %5592 = vmatprep.subr.bf16.mxu1 %v5591_v8  ;;  %v5611_v8 = vpack.c.bf16 %v3534_v60, %v3530_v1  ;;  %v3565_v62 = vld [vmem:[#allocation12 + $0x1730] sm:$0xff]  ;;  %v3572_v0 = vld [vmem:[#allocation12 + $0x1768] sm:$0xff]  ;;  %v3570_v1 = vld [vmem:[#allocation12 + $0x1758] sm:$0xff] }
 0x444   : > { %v3574_v60 = vld [vmem:[#allocation12 + $0x1778] sm:$0xff] }
 0x445   : > { %5466 = vmatpush1.bf16.msra.mxu0 %v5465_v16  ;;  %v5485_v16 = vpack.c.bf16 %v3531_v6, %v3527_v5  ;;  %v3567_v5 = vld [vmem:[#allocation12 + $0x1740] sm:$0xff] }
 0x446   : > { %5594 = vmatpush1.bf16.msra.mxu1 %v5593_v17  ;;  %5468 = vmatprep.subr.bf16.mxu0 %v5467_v18  ;;  %v5613_v17 = vpack.c.bf16 %v3533_v9, %v3529_v7  ;;  %v5487_v18 = vpack.c.bf16 %v3540_v13, %v3536_v10  ;;  %v3571_v6 = vld [vmem:[#allocation12 + $0x1760] sm:$0xff]  ;;  %v3569_v7 = vld [vmem:[#allocation12 + $0x1750] sm:$0xff]  ;;  %v3576_v10 = vld [vmem:[#allocation12 + $0x1788] sm:$0xff] }
 0x447   : > { %5596 = vmatprep.subr.bf16.mxu1 %v5595_v21  ;;  %v5615_v21 = vpack.c.bf16 %v3542_v15, %v3538_v14  ;;  %v3573_v9 = vld [vmem:[#allocation12 + $0x1770] sm:$0xff]  ;;  %v3580_v13 = vld [vmem:[#allocation12 + $0x17a8] sm:$0xff]  ;;  %v3578_v14 = vld [vmem:[#allocation12 + $0x1798] sm:$0xff] }
 0x448   : > { %v3582_v15 = vld [vmem:[#allocation12 + $0x17b8] sm:$0xff] }
 0x449   : > { %5470 = vmatpush1.bf16.msra.mxu0 %v5469_v28  ;;  %v5489_v28 = vpack.c.bf16 %v3539_v19, %v3535_v24  ;;  %v3575_v24 = vld [vmem:[#allocation12 + $0x1780] sm:$0xff] }
 0x44a   : > { %5598 = vmatpush1.bf16.msra.mxu1 %v5597_v29  ;;  %5472 = vmatprep.subr.bf16.mxu0 %v5471_v30  ;;  %v5617_v29 = vpack.c.bf16 %v3541_v22, %v3537_v20  ;;  %v5491_v30 = vpack.c.bf16 %v3548_v26, %v3544_v23  ;;  %v3579_v19 = vld [vmem:[#allocation12 + $0x17a0] sm:$0xff]  ;;  %v3577_v20 = vld [vmem:[#allocation12 + $0x1790] sm:$0xff]  ;;  %v3584_v23 = vld [vmem:[#allocation12 + $0x17c8] sm:$0xff] }
 0x44b   : > { %5600 = vmatprep.subr.bf16.mxu1 %v5599_v34  ;;  %v5619_v34 = vpack.c.bf16 %v3550_v27, %v3546_v25  ;;  %v3581_v22 = vld [vmem:[#allocation12 + $0x17b0] sm:$0xff]  ;;  %v3588_v26 = vld [vmem:[#allocation12 + $0x17e8] sm:$0xff]  ;;  %v3586_v25 = vld [vmem:[#allocation12 + $0x17d8] sm:$0xff] }
 0x44c   : > { %v3590_v27 = vld [vmem:[#allocation12 + $0x17f8] sm:$0xff] }
 0x44d   : > { %5474 = vmatpush1.bf16.msra.mxu0 %v5473_v40  ;;  %v5493_v40 = vpack.c.bf16 %v3547_v32, %v3543_v31  ;;  %v3583_v31 = vld [vmem:[#allocation12 + $0x17c0] sm:$0xff] }
 0x44e   : > { %5602 = vmatpush1.bf16.msra.mxu1 %v5601_v41  ;;  %5476 = vmatprep.subr.bf16.mxu0 %v5475_v47  ;;  %v5621_v41 = vpack.c.bf16 %v3549_v35, %v3545_v33  ;;  %v5495_v47 = vpack.c.bf16 %v3556_v37, %v3552_v36  ;;  %v3587_v32 = vld [vmem:[#allocation12 + $0x17e0] sm:$0xff]  ;;  %v5639_v33 = vpack.c.bf16 %v3590_v27, %v3586_v25  ;;  %v3589_v35 = vld [vmem:[#allocation12 + $0x17f0] sm:$0xff] }
 0x44f   : > { %5604 = vmatprep.subr.bf16.mxu1 %v5603_v46  ;;  %v5623_v46 = vpack.c.bf16 %v3558_v39, %v3554_v38  ;;  %v3328_v36 = vld [vmem:[#allocation2 + $0x10] sm:$0xfc]  ;;  %v3332_v37 = vld [vmem:[#allocation2 + $0x30] sm:$0x3]  ;;  %v5513_v38 = vpack.c.bf16 %v3587_v32, %v3583_v31 }
 0x451   : > { %5478 = vmatpush1.bf16.msra.mxu0 %v5477_v54  ;;  %v5497_v54 = vpack.c.bf16 %v3555_v43, %v3551_v42  ;;  %v3903_v42 = vld [vmem:[#allocation14] sm:$0xf] }
 0x452   : > { %5606 = vmatpush1.bf16.msra.mxu1 %v5605_v55  ;;  %5480 = vmatprep.subr.bf16.mxu0 %v5479_v56  ;;  %v5625_v55 = vpack.c.bf16 %v3557_v48, %v3553_v44  ;;  %v5499_v56 = vpack.c.bf16 %v3564_v50, %v3560_v49  ;;  %v3908_v43 = vrot.slane %v3903_v42, %v6402_v12  ;;  %v5793_v12 = vld [vmem:[%s6377_s14] sm:$0xff] }
 0x453   : > { %5608 = vmatprep.subr.bf16.mxu1 %v5607_v61  ;;  %v5627_v61 = vpack.c.bf16 %v3566_v52, %v3562_v51  ;;  %v3916_v44 = vrot.slane %v3903_v42, %v6425_v53  ;;  %v3920_v48 = vrot.slane %v3903_v42, %v6422_v45 }
 0x455   : > { %5482 = vmatpush1.bf16.msra.mxu0 %v5481_v2  ;;  %v5501_v2 = vpack.c.bf16 %v3563_v58, %v3559_v57  ;;  %v5795_v58 = vld [vmem:[%s6377_s14 + $0x8] sm:$0xff] }
 0x456   : > { %5610 = vmatpush1.bf16.msra.mxu1 %v5609_v3  ;;  %5484 = vmatprep.subr.bf16.mxu0 %v5483_v4  ;;  %v5629_v3 = vpack.c.bf16 %v3565_v62, %v3561_v59  ;;  %v5503_v4 = vpack.c.bf16 %v3572_v0, %v3568_v63 }
 0x457   : > { %5612 = vmatprep.subr.bf16.mxu1 %v5611_v8  ;;  %v5631_v8 = vpack.c.bf16 %v3574_v60, %v3570_v1 }
 0x459   : > { %5486 = vmatpush1.bf16.msra.mxu0 %v5485_v16  ;;  %v5505_v16 = vpack.c.bf16 %v3571_v6, %v3567_v5 }
 0x45a   : > { %5614 = vmatpush1.bf16.msra.mxu1 %v5613_v17  ;;  %5488 = vmatprep.subr.bf16.mxu0 %v5487_v18  ;;  %v5633_v17 = vpack.c.bf16 %v3573_v9, %v3569_v7  ;;  %v5507_v18 = vpack.c.bf16 %v3580_v13, %v3576_v10 }
 0x45b   : > { %5616 = vmatprep.subr.bf16.mxu1 %v5615_v21  ;;  %v5635_v21 = vpack.c.bf16 %v3582_v15, %v3578_v14 }
 0x45d   : > { %5490 = vmatpush1.bf16.msra.mxu0 %v5489_v28  ;;  %v5509_v28 = vpack.c.bf16 %v3579_v19, %v3575_v24 }
 0x45e   : > { %5618 = vmatpush1.bf16.msra.mxu1 %v5617_v29  ;;  %5492 = vmatprep.subr.bf16.mxu0 %v5491_v30  ;;  %v5637_v29 = vpack.c.bf16 %v3581_v22, %v3577_v20  ;;  %v5511_v30 = vpack.c.bf16 %v3588_v26, %v3584_v23 }
 0x45f   : > { %5620 = vmatprep.subr.bf16.mxu1 %v5619_v34  ;;  %v3585_v34 = vld [vmem:[#allocation12 + $0x17d0] sm:$0xff] }
 0x460   : > { %v5641_v39 = vpack.c.bf16 %v3589_v35, %v3585_v34 }
 0x461   : > { %5494 = vmatpush1.bf16.msra.mxu0 %v5493_v40  ;;  %v3605_v40 = vrot.slane %v3328_v36, 2 }
 0x462   : > { %5622 = vmatpush1.bf16.msra.mxu1 %v5621_v41  ;;  %5496 = vmatprep.subr.bf16.mxu0 %v5495_v47  ;;  %v3606_v41 = vrot.slane %v3332_v37, 2 }
 0x463   : > { %5624 = vmatprep.subr.bf16.mxu1 %v5623_v46  ;;  %v3912_v46 = vrot.slane %v3903_v42, %v6399_v11  ;;  %v5794_v11 = vld [vmem:[%s6377_s14 + $0x10] sm:$0xff] }
 0x464   : > { %v3607_v47 = vsel %vm1854_vm2, %v3605_v40, %v3606_v41 }
 0x465   : > { %5498 = vmatpush1.bf16.msra.mxu0 %v5497_v54 }
 0x466   : > { %5626 = vmatpush1.bf16.msra.mxu1 %v5625_v55  ;;  %5500 = vmatprep.subr.bf16.mxu0 %v5499_v56 }
 0x467   : > { %5628 = vmatprep.subr.bf16.mxu1 %v5627_v61  ;;  %v5796_v61 = vld [vmem:[%s6377_s14 + $0x18] sm:$0xff] }
 0x469   : > { %5502 = vmatpush1.bf16.msra.mxu0 %v5501_v2 }
 0x46a   : > { %5630 = vmatpush1.bf16.msra.mxu1 %v5629_v3  ;;  %5504 = vmatprep.subr.bf16.mxu0 %v5503_v4 }
 0x46b   : > { %5632 = vmatprep.subr.bf16.mxu1 %v5631_v8 }
 0x46d   : > { %5506 = vmatpush1.bf16.msra.mxu0 %v5505_v16 }
 0x46e   : > { %5634 = vmatpush1.bf16.msra.mxu1 %v5633_v17  ;;  %5508 = vmatprep.subr.bf16.mxu0 %v5507_v18 }
 0x46f   : > { %5636 = vmatprep.subr.bf16.mxu1 %v5635_v21 }
 0x471   : > { %5510 = vmatpush1.bf16.msra.mxu0 %v5509_v28 }
 0x472   : > { %5638 = vmatpush1.bf16.msra.mxu1 %v5637_v29  ;;  %5512 = vmatprep.subr.bf16.mxu0 %v5511_v30 }
 0x473   : > { %5640 = vmatprep.subr.bf16.mxu1 %v5639_v33 }
 0x475   : > { %5514 = vmatpush1.bf16.msra.mxu0 %v5513_v38 }
 0x476   : > { %5642 = vmatpush1.bf16.msra.mxu1 %v5641_v39 }
 0x478   : > { %3751 = vmatmul.mubr.f32.vlgmr.msra.gmra.mrb[2].mxu0 %v3607_v47 }
 0x479   : > { %3893 = vmatmul.mubr.f32.vlgmr.msra.gmra.mrb[2].mxu1 %v3607_v47 }
 0x54b   : > { %v3752_v49 = vpop.f32.mrb[2].mxu0 }
 0x54c   : > { %v3925_v50 = vadd.f32 %v3908_v43, %v3752_v49  ;;  %v3894_v51 = vpop.f32.mrb[2].mxu1  ;;  %v3754_v52 = vpop.f32.mrb[3].mxu0 }
 0x54d   : > { %v3927_v54 = vadd.f32 %v3916_v44, %v3894_v51  ;;  %v3926_v55 = vadd.f32 %v3912_v46, %v3754_v52  ;;  %v3896_v56 = vpop.f32.mrb[3].mxu1 }
 0x54e   : > { %v3929_v53 = vadd.f32 %v5793_v12, %v3925_v50  ;;  %v3928_v57 = vadd.f32 %v3920_v48, %v3896_v56 }
 0x54f   : > { %v3931_v45 = vadd.f32 %v5794_v11, %v3927_v54  ;;  %v3930_v59 = vadd.f32 %v5795_v58, %v3926_v55 }
 0x550   : > { %3933 = vst [vmem:[%s373_s13] sm:$0xff] %v3929_v53  ;;  %v3932_v62 = vadd.f32 %v5796_v61, %v3928_v57 }
 0x551   : > { %3935 = vst [vmem:[%s373_s13 + $0x10] sm:$0xff] %v3931_v45  ;;  %3934 = vst [vmem:[%s373_s13 + $0x8] sm:$0xff] %v3930_v59 }
 0x552   : > { %3936 = vst [vmem:[%s373_s13 + $0x18] sm:$0xff] %v3932_v62 }
 0x553   : > { %6008 = shalt.err (!%p6005_p9)
}
 0x554   : > { %s6009_s23 = scalar_lea.hbm %s6469_s17, 512  ;;  %s6013_s14 = scalar_lea.hbm %s6520_s7, 1024 }
 0x555   : > { %p6010_p13 = scmp.ne.s32.totalorder %s6469_s17, %s6009_s23  ;;  %p6014_p8 = scmp.lt.u32.totalorder %s6469_s17, %s6520_s7 }
 0x556   : > { %p6015_p10 = scmp.lt.u32.totalorder %s6013_s14, %s6009_s23  ;;  %p6017_p6 = scmp.lt.u32.totalorder %s6009_s23, %s6469_s17 }
 0x557   : > { %p6011_p0 = pnand %p6010_p13, %p6540_p12 }
 0x558   : > { %p6016_p11 = por %p6015_p10, %p6014_p8 }
 0x559   : > { %p6012_p2 = pneg %p6011_p0 }
 0x55a   : > { %p6018_p5 = por %p6017_p6, %p6016_p11 }
 0x55c   : > { %p6019_p7 = pnand %p6018_p5, %p6012_p2 }
 0x55e   : > { %6022 = shalt.err (!%p6019_p7)
}
 0x55f   : > { %5709 = dma.vmem_to_hbm [thread:$0]  (%p6540_p12), %s6471_s9, 512, %s6469_s17, %s3938_s30  }
 0x560 PF: > { %s3964_s16 = sand.u32 1, %s6061_s24   ;;  %p6541_p4 = scmp.ne.s32.totalorder %s6531_s29, 0 }
 0x561   : > { %p6542_p1 = scmp.ge.s32.totalorder %s6073_s27, 2  ;;  %s3965_s19 = scalar_lea.sflag [#allocation5], %s3964_s16 }
 0x563   : > { %p5735_p3 = pnand %p6542_p1, %p6541_p4 }
 0x565   : > { %6056 = dma.done.wait (!%p5735_p3), %s3965_s19, 512  }
 0x566   : > { %6058 = vsyncadd (!%p5735_p3), %s3965_s19, 4294966784  ;;  %p23_p9 = scmp.ge.s32.totalorder %s6295_s11, 4   ;;  %s6543_s24 = smov %s6065_s25 }
 0x567   : > { %s6544_s25 = smov %s6069_s26  ;;  %s6545_s26 = smov %s6306_s10 }
 0x568   : > { %s6546_s27 = smov %s6295_s11  ;;  %25 = sbr.rel (!%p23_p9) target bundleno = 8 (0x8), region = 122 }
 0x56f   :  { %3970 = vsyncpa [#allocation4], 1 }
 0x570   :  { %3972 = vsyncpa [#allocation4 + $0x1], 1 }
 0x571   :  { %3973 = vsyncpa [#allocation7], 1 }
 0x572   :  { %3974 = vsyncpa [#allocation10], 1 }
 0x573   :  { %3975 = vsyncpa [#allocation13], 1 }
 0x574   :  { %3976 = vsyncpa [#allocation5], 1 }
 0x575   :  { %3978 = vsyncpa [#allocation5 + $0x1], 1 }

</bundles_post_ra>
